<compile_context>
chip_gen: v7x
topology: tpu7x:2x2x1
jax: 0.10.0
libtpu: 0.0.40
codegen_flags: <defaults>
</compile_context>

<pallas_src>
import functools
import math

import jax
import jax.numpy as jnp
import numpy as np
from jax.experimental import pallas as pl
from jax.experimental.pallas import tpu as pltpu

# Make the pure-JAX reference matmuls full-f32 so they match the MXU kernel.
jax.config.update("jax_default_matmul_precision", "highest")


# ----------------------------- kernel helpers --------------------------------
def _erf_poly(z):
    """Abramowitz & Stegun 7.1.26 erf approximation (|err| <= 1.5e-7)."""
    a1, a2, a3, a4, a5 = (0.254829592, -0.284496736, 1.421413741,
                          -1.453152027, 1.061405429)
    c = 0.3275911
    az = jnp.abs(z)
    t = 1.0 / (1.0 + c * az)
    poly = ((((a5 * t + a4) * t + a3) * t + a2) * t + a1) * t
    y = 1.0 - poly * jnp.exp(-az * az)
    return jnp.where(z >= 0.0, y, -y)


def _gelu(x):
    # HuggingFace gelu: x * 0.5 * (1 + erf(x / sqrt(2)))
    return x * 0.5 * (1.0 + _erf_poly(x * (1.0 / math.sqrt(2.0))))


def _layernorm(h, g, b, eps):
    # TF-style: epsilon inside the square root.  All f32 VPU math.
    u = jnp.mean(h, axis=-1, keepdims=True)
    d = h - u
    s = jnp.mean(d * d, axis=-1, keepdims=True)
    return g * (d * jax.lax.rsqrt(s + eps)) + b


def _fast_recip(x):
    # EUP approximate reciprocal + one Newton step -> ~f32 accuracy, no VPU divide.
    r = pl.reciprocal(x, approx=True)
    return r * (2.0 - x * r)


# --------------------------------- kernel -------------------------------------
def _transformer_kernel(x_ref, w_emb_ref, b_emb_ref, pos_ref, ge_ref, be_ref,
                        wqkv_ref, bqkv_ref, wp_ref, bp_ref, g1_ref, b1_ref,
                        wf1_ref, bf1_ref, wf2_ref, bf2_ref, g2_ref, b2_ref,
                        o_ref, *, n_heads, n_layers, emb_norm, eps, mxu_dtype):
    TB, S, D = o_ref.shape
    F = x_ref.shape[2]
    M = TB * S                      # rows per grid step for all dense matmuls
    H = n_heads
    W = D // H
    scale = 1.0 / math.sqrt(W)

    def mm(a, w_ref):
        # MXU matmul: operands in mxu_dtype (bf16 on v6e/v7x), f32 accumulation.
        return jnp.dot(a.astype(mxu_dtype), w_ref[...],
                       preferred_element_type=jnp.float32)

    # ---- Embeddings: lin -> (norm) -> + pos -> norm ---------------------------
    x = x_ref[...].reshape(M, F)                 # leading-dim merge only (free)
    e = mm(x, w_emb_ref) + b_emb_ref[...]
    if emb_norm:
        e = _layernorm(e, ge_ref[...], be_ref[...], eps)
    e = e + pos_ref[...]                         # pos pre-tiled to (M, D) in wrapper
    h = _layernorm(e, ge_ref[...], be_ref[...], eps)

    # Biases / LN params stay resident f32 values.
    bqkv = bqkv_ref[...]
    bp, g1, b1 = bp_ref[...], g1_ref[...], b1_ref[...]
    bf1, bf2, g2, b2 = bf1_ref[...], bf2_ref[...], g2_ref[...], b2_ref[...]

    def to_heads(t):
        # (M, D) -> (TB*H, S, W): heads become the leading batch dim.
        # Only static lane slices + leading-dim reshapes (layout-preserving).
        t3 = t.reshape(TB, S, D)
        parts = [t3[:, :, hd * W:(hd + 1) * W][:, None] for hd in range(H)]
        return jnp.concatenate(parts, axis=1).reshape(TB * H, S, W)

    # TODO(synk): switch to lax.fori_loop with h as carry once n_layers grows
    #             beyond a few (weights are shared, so the carry is trivial).
    for _ in range(n_layers):
        # ---- Multi-headed self-attention (fused qkv projection) ---------------
        qkv = mm(h, wqkv_ref) + bqkv             # (M, 3D), f32 accumulate
        q = qkv[:, 0:D] * scale                  # scale applied post-matmul in f32
        k = qkv[:, D:2 * D]
        v = qkv[:, 2 * D:3 * D]

        qh = to_heads(q).astype(mxu_dtype)       # (TB*H, S, W)
        kh = to_heads(k).astype(mxu_dtype)
        vh = to_heads(v).astype(mxu_dtype)

        # One batched matmul over all samples and heads (no per-head MXU pushes).
        sc = jnp.einsum("bqw,bkw->bqk", qh, kh,
                        preferred_element_type=jnp.float32)      # (TB*H, S, S)
        m = jnp.max(sc, axis=-1, keepdims=True)
        ex = jnp.exp(sc - m)
        p = ex * _fast_recip(jnp.sum(ex, axis=-1, keepdims=True))
        ctx = jnp.einsum("bqk,bkw->bqw", p.astype(mxu_dtype), vh,
                         preferred_element_type=jnp.float32)     # (TB*H, S, W)

        # Merge heads back in registers (no VMEM scratch round-trip).
        ctx4 = ctx.reshape(TB, H, S, W)
        h = jnp.concatenate([ctx4[:, hd] for hd in range(H)],
                            axis=-1).reshape(M, D)               # (M, D)

        # ---- h = norm1(h + proj(h)) -------------------------------------------
        ph = mm(h, wp_ref) + bp
        h = _layernorm(h + ph, g1, b1, eps)

        # ---- h = norm2(h + pwff(h)) -------------------------------------------
        f = _gelu(mm(h, wf1_ref) + bf1)
        f = mm(f, wf2_ref) + bf2
        h = _layernorm(h + f, g2, b2, eps)

    o_ref[...] = h.reshape(TB, S, D).astype(o_ref.dtype)


# -------------------------------- wrapper --------------------------------------
def _pick_batch_tile(B, S):
    """Samples per grid step: target ~128 rows per step, keep >=2 grid steps
    (so both v7x TensorCores get work), and require B % TB == 0."""
    tb = min(B, max(1, 128 // max(S, 1)))
    if B >= 2:
        tb = min(tb, B // 2)
    tb = max(tb, 1)
    while B % tb:
        tb -= 1
    return max(tb, 1)


def transformer_forward(x, params, *, n_heads, n_layers, emb_norm=True,
                        eps=1e-12, mxu_dtype=jnp.float32, batch_tile=None):
    """x: (B, S, F) f32.  Weights use the y = x @ W + b convention.

    mxu_dtype: dtype of MXU operands (weights + activations at matmul call
    sites).  Use jnp.bfloat16 on v6e/v7x for ~2-4x matmul throughput; all
    LayerNorm / softmax / gelu math stays f32 regardless.
    """
    B, S, F = x.shape
    D = params["w_emb"].shape[1]
    assert D % n_heads == 0

    TB = batch_tile if batch_tile is not None else _pick_batch_tile(B, S)
    assert B % TB == 0, "batch tile must divide batch"

    wd = lambda a: jnp.asarray(a, mxu_dtype)                     # MXU operands
    row = lambda v: jnp.asarray(v, jnp.float32).reshape(1, -1)   # f32 bias rows

    # Fuse q/k/v into one (D, 3D) weight (one MXU matmul per layer).  The
    # 1/sqrt(W) scale is applied post-matmul in f32 inside the kernel so bf16
    # weight quantization does not compound with it.
    wqkv = jnp.concatenate([params["wq"], params["wk"], params["wv"]], axis=1)
    bqkv = jnp.concatenate([params["bq"], params["bk"], params["bv"]])

    # Positional embedding pre-tiled to the (TB*S, D) activation slab.
    pos = jnp.tile(jnp.asarray(params["pos_embed"][:S], jnp.float32), (TB, 1))

    inputs = [
        x.astype(jnp.float32),
        wd(params["w_emb"]), row(params["b_emb"]),
        pos,
        row(params["g_e"]), row(params["b_e"]),
        wd(wqkv), row(bqkv),
        wd(params["w_proj"]), row(params["b_proj"]),
        row(params["g1"]), row(params["b1"]),
        wd(params["w_ff1"]), row(params["b_ff1"]),
        wd(params["w_ff2"]), row(params["b_ff2"]),
        row(params["g2"]), row(params["b2"]),
    ]

    def full_spec(a):
        # Constant-index full-array block: DMA'd once, resident in VMEM.
        # TODO(synk): single-buffer these (pipeline_mode=pl.Buffered(1)) once the
        # resident weight set matters against v7x's 64 MiB VMEM; ~100 KiB here.
        idx = (0,) * a.ndim
        return pl.BlockSpec(tuple(a.shape), lambda b, _idx=idx: _idx)

    in_specs = [pl.BlockSpec((TB, S, F), lambda b: (b, 0, 0))]
    in_specs += [full_spec(a) for a in inputs[1:]]

    kernel = functools.partial(_transformer_kernel, n_heads=n_heads,
                               n_layers=n_layers, emb_norm=emb_norm, eps=eps,
                               mxu_dtype=mxu_dtype)

    return pl.pallas_call(
        kernel,
        out_shape=jax.ShapeDtypeStruct((B, S, D), jnp.float32),
        grid_spec=pltpu.PrefetchScalarGridSpec(
            num_scalar_prefetch=0,
            grid=(B // TB,),          # batch-tiled grid; shards across v7x TCs
            in_specs=in_specs,
            out_specs=pl.BlockSpec((TB, S, D), lambda b: (b, 0, 0)),
        ),
        compiler_params=pltpu.CompilerParams(
            dimension_semantics=("parallel",)),
    )(*inputs)


# ------------------------------- reference -------------------------------------
def transformer_reference(x, params, *, n_heads, n_layers, emb_norm=True, eps=1e-12):
    """Pure-JAX mirror of the PyTorch Transformer_Original forward."""
    def layernorm(h, g, b):
        u = h.mean(-1, keepdims=True)
        s = ((h - u) ** 2).mean(-1, keepdims=True)
        return g * (h - u) / jnp.sqrt(s + eps) + b

    B, S, F = x.shape
    D = params["w_emb"].shape[1]
    W = D // n_heads

    e = x @ params["w_emb"] + params["b_emb"]
    if emb_norm:
        e = layernorm(e, params["g_e"], params["b_e"])
    e = e + params["pos_embed"][:S][None, :, :]
    h = layernorm(e, params["g_e"], params["b_e"])

    for _ in range(n_layers):
        q = h @ params["wq"] + params["bq"]
        k = h @ params["wk"] + params["bk"]
        v = h @ params["wv"] + params["bv"]

        def split(t):
            return jnp.transpose(t.reshape(B, S, n_heads, W), (0, 2, 1, 3))

        qh, kh, vh = split(q), split(k), split(v)
        sc = jnp.einsum("bhsw,bhtw->bhst", qh, kh) / np.sqrt(W)
        p = jax.nn.softmax(sc, axis=-1)
        a = jnp.einsum("bhst,bhtw->bhsw", p, vh)
        h = jnp.transpose(a, (0, 2, 1, 3)).reshape(B, S, D)

        h = layernorm(h + (h @ params["w_proj"] + params["b_proj"]),
                      params["g1"], params["b1"])

        f = h @ params["w_ff1"] + params["b_ff1"]
        f = f * 0.5 * (1.0 + jax.lax.erf(f / np.sqrt(2.0)))   # exact erf gelu
        f = f @ params["w_ff2"] + params["b_ff2"]
        h = layernorm(h + f, params["g2"], params["b2"])
    return h


# --------------------------------- main ----------------------------------------
if __name__ == "__main__":
    # Small shapes consistent with the module config.
    B, S, F, D, H, DFF, NL = 2, 8, 16, 32, 4, 64, 2

    keys = iter(jax.random.split(jax.random.PRNGKey(0), 22))
    nk = lambda: next(keys)

    def lin_w(fan_in, shape):
        bound = 1.0 / math.sqrt(fan_in)
        return jax.random.uniform(nk(), shape, jnp.float32, -bound, bound)

    params = {
        "w_emb": lin_w(F, (F, D)), "b_emb": lin_w(F, (D,)),
        "pos_embed": jax.random.normal(nk(), (S, D), jnp.float32),
        "g_e": 1.0 + 0.1 * jax.random.normal(nk(), (D,), jnp.float32),
        "b_e": 0.1 * jax.random.normal(nk(), (D,), jnp.float32),
        "wq": lin_w(D, (D, D)), "bq": lin_w(D, (D,)),
        "wk": lin_w(D, (D, D)), "bk": lin_w(D, (D,)),
        "wv": lin_w(D, (D, D)), "bv": lin_w(D, (D,)),
        "w_proj": lin_w(D, (D, D)), "b_proj": lin_w(D, (D,)),
        "g1": 1.0 + 0.1 * jax.random.normal(nk(), (D,), jnp.float32),
        "b1": 0.1 * jax.random.normal(nk(), (D,), jnp.float32),
        "w_ff1": lin_w(D, (D, DFF)), "b_ff1": lin_w(D, (DFF,)),
        "w_ff2": lin_w(DFF, (DFF, D)), "b_ff2": lin_w(DFF, (D,)),
        "g2": 1.0 + 0.1 * jax.random.normal(nk(), (D,), jnp.float32),
        "b2": 0.1 * jax.random.normal(nk(), (D,), jnp.float32),
    }
    x = jax.random.normal(nk(), (B, S, F), dtype=jnp.float32)

    ref = transformer_reference(x, params, n_heads=H, n_layers=NL, emb_norm=True)

    # f32 MXU operands: tight tolerance against the exact-erf f32 reference.
    out = transformer_forward(x, params, n_heads=H, n_layers=NL, emb_norm=True)
    out = jax.block_until_ready(out)
    np.testing.assert_allclose(np.asarray(out), np.asarray(ref),
                               rtol=1e-4, atol=1e-4)

    # bf16 MXU operands (v6e/v7x production path), f32 accumulation and f32
    # LayerNorm/softmax/gelu; tolerance relaxed for bf16 operand quantization.
    out_bf16 = transformer_forward(x, params, n_heads=H, n_layers=NL,
                                   emb_norm=True, mxu_dtype=jnp.bfloat16)
    out_bf16 = jax.block_until_ready(out_bf16)
    np.testing.assert_allclose(np.asarray(out_bf16), np.asarray(ref),
                               rtol=1e-1, atol=1e-1)

    print("KERNEL_OK")
</pallas_src>

<mosaic_0001>
module attributes {stable_mosaic.version = 11 : i64} {
  func.func @_transformer_kernel(%arg0: i32, %arg1: memref<1x8x16xf32, #tpu.memory_space<vmem>>, %arg2: memref<16x32xf32, #tpu.memory_space<vmem>>, %arg3: memref<1x32xf32, #tpu.memory_space<vmem>>, %arg4: memref<8x32xf32, #tpu.memory_space<vmem>>, %arg5: memref<1x32xf32, #tpu.memory_space<vmem>>, %arg6: memref<1x32xf32, #tpu.memory_space<vmem>>, %arg7: memref<32x96xf32, #tpu.memory_space<vmem>>, %arg8: memref<1x96xf32, #tpu.memory_space<vmem>>, %arg9: memref<32x32xf32, #tpu.memory_space<vmem>>, %arg10: memref<1x32xf32, #tpu.memory_space<vmem>>, %arg11: memref<1x32xf32, #tpu.memory_space<vmem>>, %arg12: memref<1x32xf32, #tpu.memory_space<vmem>>, %arg13: memref<32x64xf32, #tpu.memory_space<vmem>>, %arg14: memref<1x64xf32, #tpu.memory_space<vmem>>, %arg15: memref<64x32xf32, #tpu.memory_space<vmem>>, %arg16: memref<1x32xf32, #tpu.memory_space<vmem>>, %arg17: memref<1x32xf32, #tpu.memory_space<vmem>>, %arg18: memref<1x32xf32, #tpu.memory_space<vmem>>, %arg19: memref<1x8x32xf32, #tpu.memory_space<vmem>>) attributes {dimension_semantics = [#tpu.dimension_semantics<parallel>], iteration_bounds = array<i64: 2>, scalar_prefetch = 0 : i64, scratch_operands = 0 : i64, tpu.core_type = #tpu.core_type<tc>, window_params = [{transform_indices = @transform_0, window_bounds = array<i64: 1, 8, 16>}, {pipeline_mode = #tpu.pipeline_mode<synchronous>, transform_indices = @transform_1, window_bounds = array<i64: 16, 32>}, {pipeline_mode = #tpu.pipeline_mode<synchronous>, transform_indices = @transform_2, window_bounds = array<i64: 1, 32>}, {pipeline_mode = #tpu.pipeline_mode<synchronous>, transform_indices = @transform_3, window_bounds = array<i64: 8, 32>}, {pipeline_mode = #tpu.pipeline_mode<synchronous>, transform_indices = @transform_4, window_bounds = array<i64: 1, 32>}, {pipeline_mode = #tpu.pipeline_mode<synchronous>, transform_indices = @transform_5, window_bounds = array<i64: 1, 32>}, {pipeline_mode = #tpu.pipeline_mode<synchronous>, transform_indices = @transform_6, window_bounds = array<i64: 32, 96>}, {pipeline_mode = #tpu.pipeline_mode<synchronous>, transform_indices = @transform_7, window_bounds = array<i64: 1, 96>}, {pipeline_mode = #tpu.pipeline_mode<synchronous>, transform_indices = @transform_8, window_bounds = array<i64: 32, 32>}, {pipeline_mode = #tpu.pipeline_mode<synchronous>, transform_indices = @transform_9, window_bounds = array<i64: 1, 32>}, {pipeline_mode = #tpu.pipeline_mode<synchronous>, transform_indices = @transform_10, window_bounds = array<i64: 1, 32>}, {pipeline_mode = #tpu.pipeline_mode<synchronous>, transform_indices = @transform_11, window_bounds = array<i64: 1, 32>}, {pipeline_mode = #tpu.pipeline_mode<synchronous>, transform_indices = @transform_12, window_bounds = array<i64: 32, 64>}, {pipeline_mode = #tpu.pipeline_mode<synchronous>, transform_indices = @transform_13, window_bounds = array<i64: 1, 64>}, {pipeline_mode = #tpu.pipeline_mode<synchronous>, transform_indices = @transform_14, window_bounds = array<i64: 64, 32>}, {pipeline_mode = #tpu.pipeline_mode<synchronous>, transform_indices = @transform_15, window_bounds = array<i64: 1, 32>}, {pipeline_mode = #tpu.pipeline_mode<synchronous>, transform_indices = @transform_16, window_bounds = array<i64: 1, 32>}, {pipeline_mode = #tpu.pipeline_mode<synchronous>, transform_indices = @transform_17, window_bounds = array<i64: 1, 32>}, {transform_indices = @transform_18, window_bounds = array<i64: 1, 8, 32>}]} {
    %c0 = arith.constant 0 : index
    %c0_0 = arith.constant 0 : index
    %c0_1 = arith.constant 0 : index
    %0 = vector.load %arg1[%c0, %c0_0, %c0_1] : memref<1x8x16xf32, #tpu.memory_space<vmem>>, vector<1x8x16xf32>
    %1 = vector.shape_cast %0 : vector<1x8x16xf32> to vector<8x16xf32>
    %c0_2 = arith.constant 0 : index
    %c0_3 = arith.constant 0 : index
    %2 = vector.load %arg2[%c0_2, %c0_3] : memref<16x32xf32, #tpu.memory_space<vmem>>, vector<16x32xf32>
    %cst = arith.constant dense<0.000000e+00> : vector<8x32xf32>
    %3 = tpu.matmul %1, %2, %cst {dimension_numbers = #tpu.dot_dimension_numbers<[1], [0], [0], [1], [0, 0, 1, 1], [], []>, precision = #tpu.contract_precision<fp32>} : vector<8x16xf32>, vector<16x32xf32>, vector<8x32xf32> -> vector<8x32xf32>
    %c0_4 = arith.constant 0 : index
    %c0_5 = arith.constant 0 : index
    %4 = vector.load %arg3[%c0_4, %c0_5] : memref<1x32xf32, #tpu.memory_space<vmem>>, vector<1x32xf32>
    %5 = vector.broadcast %4 : vector<1x32xf32> to vector<8x32xf32>
    %6 = arith.addf %3, %5 : vector<8x32xf32>
    %c0_6 = arith.constant 0 : index
    %c0_7 = arith.constant 0 : index
    %7 = vector.load %arg5[%c0_6, %c0_7] : memref<1x32xf32, #tpu.memory_space<vmem>>, vector<1x32xf32>
    %c0_8 = arith.constant 0 : index
    %c0_9 = arith.constant 0 : index
    %8 = vector.load %arg6[%c0_8, %c0_9] : memref<1x32xf32, #tpu.memory_space<vmem>>, vector<1x32xf32>
    %cst_10 = arith.constant dense<0.000000e+00> : vector<8xf32>
    %9 = vector.multi_reduction <add>, %6, %cst_10 [1] : vector<8x32xf32> to vector<8xf32>
    %10 = vector.shape_cast %9 : vector<8xf32> to vector<8x1xf32>
    %cst_11 = arith.constant 3.200000e+01 : f32
    %11 = vector.broadcast %cst_11 : f32 to vector<8x1xf32>
    %12 = arith.divf %10, %11 : vector<8x1xf32>
    %13 = vector.broadcast %12 : vector<8x1xf32> to vector<8x32xf32>
    %14 = arith.subf %6, %13 : vector<8x32xf32>
    %15 = arith.mulf %14, %14 : vector<8x32xf32>
    %cst_12 = arith.constant dense<0.000000e+00> : vector<8xf32>
    %16 = vector.multi_reduction <add>, %15, %cst_12 [1] : vector<8x32xf32> to vector<8xf32>
    %17 = vector.shape_cast %16 : vector<8xf32> to vector<8x1xf32>
    %cst_13 = arith.constant 3.200000e+01 : f32
    %18 = vector.broadcast %cst_13 : f32 to vector<8x1xf32>
    %19 = arith.divf %17, %18 : vector<8x1xf32>
    %cst_14 = arith.constant 9.99999996E-13 : f32
    %20 = vector.broadcast %cst_14 : f32 to vector<8x1xf32>
    %21 = arith.addf %19, %20 : vector<8x1xf32>
    %22 = math.rsqrt %21 : vector<8x1xf32>
    %23 = vector.broadcast %22 : vector<8x1xf32> to vector<8x32xf32>
    %24 = arith.mulf %14, %23 : vector<8x32xf32>
    %25 = vector.broadcast %7 : vector<1x32xf32> to vector<8x32xf32>
    %26 = arith.mulf %25, %24 : vector<8x32xf32>
    %27 = vector.broadcast %8 : vector<1x32xf32> to vector<8x32xf32>
    %28 = arith.addf %26, %27 : vector<8x32xf32>
    %c0_15 = arith.constant 0 : index
    %c0_16 = arith.constant 0 : index
    %29 = vector.load %arg4[%c0_15, %c0_16] : memref<8x32xf32, #tpu.memory_space<vmem>>, vector<8x32xf32>
    %30 = arith.addf %28, %29 : vector<8x32xf32>
    %c0_17 = arith.constant 0 : index
    %c0_18 = arith.constant 0 : index
    %31 = vector.load %arg5[%c0_17, %c0_18] : memref<1x32xf32, #tpu.memory_space<vmem>>, vector<1x32xf32>
    %c0_19 = arith.constant 0 : index
    %c0_20 = arith.constant 0 : index
    %32 = vector.load %arg6[%c0_19, %c0_20] : memref<1x32xf32, #tpu.memory_space<vmem>>, vector<1x32xf32>
    %cst_21 = arith.constant dense<0.000000e+00> : vector<8xf32>
    %33 = vector.multi_reduction <add>, %30, %cst_21 [1] : vector<8x32xf32> to vector<8xf32>
    %34 = vector.shape_cast %33 : vector<8xf32> to vector<8x1xf32>
    %cst_22 = arith.constant 3.200000e+01 : f32
    %35 = vector.broadcast %cst_22 : f32 to vector<8x1xf32>
    %36 = arith.divf %34, %35 : vector<8x1xf32>
    %37 = vector.broadcast %36 : vector<8x1xf32> to vector<8x32xf32>
    %38 = arith.subf %30, %37 : vector<8x32xf32>
    %39 = arith.mulf %38, %38 : vector<8x32xf32>
    %cst_23 = arith.constant dense<0.000000e+00> : vector<8xf32>
    %40 = vector.multi_reduction <add>, %39, %cst_23 [1] : vector<8x32xf32> to vector<8xf32>
    %41 = vector.shape_cast %40 : vector<8xf32> to vector<8x1xf32>
    %cst_24 = arith.constant 3.200000e+01 : f32
    %42 = vector.broadcast %cst_24 : f32 to vector<8x1xf32>
    %43 = arith.divf %41, %42 : vector<8x1xf32>
    %cst_25 = arith.constant 9.99999996E-13 : f32
    %44 = vector.broadcast %cst_25 : f32 to vector<8x1xf32>
    %45 = arith.addf %43, %44 : vector<8x1xf32>
    %46 = math.rsqrt %45 : vector<8x1xf32>
    %47 = vector.broadcast %46 : vector<8x1xf32> to vector<8x32xf32>
    %48 = arith.mulf %38, %47 : vector<8x32xf32>
    %49 = vector.broadcast %31 : vector<1x32xf32> to vector<8x32xf32>
    %50 = arith.mulf %49, %48 : vector<8x32xf32>
    %51 = vector.broadcast %32 : vector<1x32xf32> to vector<8x32xf32>
    %52 = arith.addf %50, %51 : vector<8x32xf32>
    %c0_26 = arith.constant 0 : index
    %c0_27 = arith.constant 0 : index
    %53 = vector.load %arg8[%c0_26, %c0_27] : memref<1x96xf32, #tpu.memory_space<vmem>>, vector<1x96xf32>
    %c0_28 = arith.constant 0 : index
    %c0_29 = arith.constant 0 : index
    %54 = vector.load %arg10[%c0_28, %c0_29] : memref<1x32xf32, #tpu.memory_space<vmem>>, vector<1x32xf32>
    %c0_30 = arith.constant 0 : index
    %c0_31 = arith.constant 0 : index
    %55 = vector.load %arg11[%c0_30, %c0_31] : memref<1x32xf32, #tpu.memory_space<vmem>>, vector<1x32xf32>
    %c0_32 = arith.constant 0 : index
    %c0_33 = arith.constant 0 : index
    %56 = vector.load %arg12[%c0_32, %c0_33] : memref<1x32xf32, #tpu.memory_space<vmem>>, vector<1x32xf32>
    %c0_34 = arith.constant 0 : index
    %c0_35 = arith.constant 0 : index
    %57 = vector.load %arg14[%c0_34, %c0_35] : memref<1x64xf32, #tpu.memory_space<vmem>>, vector<1x64xf32>
    %c0_36 = arith.constant 0 : index
    %c0_37 = arith.constant 0 : index
    %58 = vector.load %arg16[%c0_36, %c0_37] : memref<1x32xf32, #tpu.memory_space<vmem>>, vector<1x32xf32>
    %c0_38 = arith.constant 0 : index
    %c0_39 = arith.constant 0 : index
    %59 = vector.load %arg17[%c0_38, %c0_39] : memref<1x32xf32, #tpu.memory_space<vmem>>, vector<1x32xf32>
    %c0_40 = arith.constant 0 : index
    %c0_41 = arith.constant 0 : index
    %60 = vector.load %arg18[%c0_40, %c0_41] : memref<1x32xf32, #tpu.memory_space<vmem>>, vector<1x32xf32>
    %c0_42 = arith.constant 0 : index
    %c0_43 = arith.constant 0 : index
    %61 = vector.load %arg7[%c0_42, %c0_43] : memref<32x96xf32, #tpu.memory_space<vmem>>, vector<32x96xf32>
    %cst_44 = arith.constant dense<0.000000e+00> : vector<8x96xf32>
    %62 = tpu.matmul %52, %61, %cst_44 {dimension_numbers = #tpu.dot_dimension_numbers<[1], [0], [0], [1], [0, 0, 1, 1], [], []>, precision = #tpu.contract_precision<fp32>} : vector<8x32xf32>, vector<32x96xf32>, vector<8x96xf32> -> vector<8x96xf32>
    %63 = vector.broadcast %53 : vector<1x96xf32> to vector<8x96xf32>
    %64 = arith.addf %62, %63 : vector<8x96xf32>
    %65 = vector.extract_strided_slice %64 {offsets = [0, 0], sizes = [8, 32], strides = [1, 1]} : vector<8x96xf32> to vector<8x32xf32>
    %cst_45 = arith.constant 0.353553385 : f32
    %66 = vector.broadcast %cst_45 : f32 to vector<8x32xf32>
    %67 = arith.mulf %65, %66 : vector<8x32xf32>
    %68 = vector.extract_strided_slice %64 {offsets = [0, 32], sizes = [8, 32], strides = [1, 1]} : vector<8x96xf32> to vector<8x32xf32>
    %69 = vector.extract_strided_slice %64 {offsets = [0, 64], sizes = [8, 32], strides = [1, 1]} : vector<8x96xf32> to vector<8x32xf32>
    %70 = vector.shape_cast %67 : vector<8x32xf32> to vector<1x8x32xf32>
    %71 = vector.extract_strided_slice %70 {offsets = [0, 0, 0], sizes = [1, 8, 8], strides = [1, 1, 1]} : vector<1x8x32xf32> to vector<1x8x8xf32>
    %72 = vector.shape_cast %71 : vector<1x8x8xf32> to vector<1x1x8x8xf32>
    %73 = vector.extract_strided_slice %70 {offsets = [0, 0, 8], sizes = [1, 8, 8], strides = [1, 1, 1]} : vector<1x8x32xf32> to vector<1x8x8xf32>
    %74 = vector.shape_cast %73 : vector<1x8x8xf32> to vector<1x1x8x8xf32>
    %75 = vector.extract_strided_slice %70 {offsets = [0, 0, 16], sizes = [1, 8, 8], strides = [1, 1, 1]} : vector<1x8x32xf32> to vector<1x8x8xf32>
    %76 = vector.shape_cast %75 : vector<1x8x8xf32> to vector<1x1x8x8xf32>
    %77 = vector.extract_strided_slice %70 {offsets = [0, 0, 24], sizes = [1, 8, 8], strides = [1, 1, 1]} : vector<1x8x32xf32> to vector<1x8x8xf32>
    %78 = vector.shape_cast %77 : vector<1x8x8xf32> to vector<1x1x8x8xf32>
    %79 = tpu.concatenate %72, %74, %76, %78 in 1 : vector<1x1x8x8xf32>, vector<1x1x8x8xf32>, vector<1x1x8x8xf32>, vector<1x1x8x8xf32> -> vector<1x4x8x8xf32>
    %80 = vector.shape_cast %79 : vector<1x4x8x8xf32> to vector<4x8x8xf32>
    %81 = vector.shape_cast %68 : vector<8x32xf32> to vector<1x8x32xf32>
    %82 = vector.extract_strided_slice %81 {offsets = [0, 0, 0], sizes = [1, 8, 8], strides = [1, 1, 1]} : vector<1x8x32xf32> to vector<1x8x8xf32>
    %83 = vector.shape_cast %82 : vector<1x8x8xf32> to vector<1x1x8x8xf32>
    %84 = vector.extract_strided_slice %81 {offsets = [0, 0, 8], sizes = [1, 8, 8], strides = [1, 1, 1]} : vector<1x8x32xf32> to vector<1x8x8xf32>
    %85 = vector.shape_cast %84 : vector<1x8x8xf32> to vector<1x1x8x8xf32>
    %86 = vector.extract_strided_slice %81 {offsets = [0, 0, 16], sizes = [1, 8, 8], strides = [1, 1, 1]} : vector<1x8x32xf32> to vector<1x8x8xf32>
    %87 = vector.shape_cast %86 : vector<1x8x8xf32> to vector<1x1x8x8xf32>
    %88 = vector.extract_strided_slice %81 {offsets = [0, 0, 24], sizes = [1, 8, 8], strides = [1, 1, 1]} : vector<1x8x32xf32> to vector<1x8x8xf32>
    %89 = vector.shape_cast %88 : vector<1x8x8xf32> to vector<1x1x8x8xf32>
    %90 = tpu.concatenate %83, %85, %87, %89 in 1 : vector<1x1x8x8xf32>, vector<1x1x8x8xf32>, vector<1x1x8x8xf32>, vector<1x1x8x8xf32> -> vector<1x4x8x8xf32>
    %91 = vector.shape_cast %90 : vector<1x4x8x8xf32> to vector<4x8x8xf32>
    %92 = vector.shape_cast %69 : vector<8x32xf32> to vector<1x8x32xf32>
    %93 = vector.extract_strided_slice %92 {offsets = [0, 0, 0], sizes = [1, 8, 8], strides = [1, 1, 1]} : vector<1x8x32xf32> to vector<1x8x8xf32>
    %94 = vector.shape_cast %93 : vector<1x8x8xf32> to vector<1x1x8x8xf32>
    %95 = vector.extract_strided_slice %92 {offsets = [0, 0, 8], sizes = [1, 8, 8], strides = [1, 1, 1]} : vector<1x8x32xf32> to vector<1x8x8xf32>
    %96 = vector.shape_cast %95 : vector<1x8x8xf32> to vector<1x1x8x8xf32>
    %97 = vector.extract_strided_slice %92 {offsets = [0, 0, 16], sizes = [1, 8, 8], strides = [1, 1, 1]} : vector<1x8x32xf32> to vector<1x8x8xf32>
    %98 = vector.shape_cast %97 : vector<1x8x8xf32> to vector<1x1x8x8xf32>
    %99 = vector.extract_strided_slice %92 {offsets = [0, 0, 24], sizes = [1, 8, 8], strides = [1, 1, 1]} : vector<1x8x32xf32> to vector<1x8x8xf32>
    %100 = vector.shape_cast %99 : vector<1x8x8xf32> to vector<1x1x8x8xf32>
    %101 = tpu.concatenate %94, %96, %98, %100 in 1 : vector<1x1x8x8xf32>, vector<1x1x8x8xf32>, vector<1x1x8x8xf32>, vector<1x1x8x8xf32> -> vector<1x4x8x8xf32>
    %102 = vector.shape_cast %101 : vector<1x4x8x8xf32> to vector<4x8x8xf32>
    "tpu.trace_start"() <{level = 10 : i32, message = "bqw,bkw->bqk"}> : () -> ()
    %cst_46 = arith.constant dense<0.000000e+00> : vector<4x8x8xf32>
    %103 = tpu.matmul %80, %91, %cst_46 {dimension_numbers = #tpu.dot_dimension_numbers<[2], [2], [1], [1], [0, 0, 0, 1, 1, 1], [0], [0]>, precision = #tpu.contract_precision<fp32>} : vector<4x8x8xf32>, vector<4x8x8xf32>, vector<4x8x8xf32> -> vector<4x8x8xf32>
    "tpu.trace_stop"() : () -> ()
    %cst_47 = arith.constant dense<0xFF800000> : vector<4x8xf32>
    %104 = vector.multi_reduction <maximumf>, %103, %cst_47 [2] : vector<4x8x8xf32> to vector<4x8xf32>
    %105 = vector.shape_cast %104 : vector<4x8xf32> to vector<4x8x1xf32>
    %106 = vector.broadcast %105 : vector<4x8x1xf32> to vector<4x8x8xf32>
    %107 = arith.subf %103, %106 : vector<4x8x8xf32>
    %108 = math.exp %107 : vector<4x8x8xf32>
    %cst_48 = arith.constant dense<0.000000e+00> : vector<4x8xf32>
    %109 = vector.multi_reduction <add>, %108, %cst_48 [2] : vector<4x8x8xf32> to vector<4x8xf32>
    %110 = vector.shape_cast %109 : vector<4x8xf32> to vector<4x8x1xf32>
    %111 = tpu.reciprocal %110 {approx = true} : vector<4x8x1xf32> -> vector<4x8x1xf32>
    %112 = arith.mulf %110, %111 : vector<4x8x1xf32>
    %cst_49 = arith.constant 2.000000e+00 : f32
    %113 = vector.broadcast %cst_49 : f32 to vector<4x8x1xf32>
    %114 = arith.subf %113, %112 : vector<4x8x1xf32>
    %115 = arith.mulf %111, %114 : vector<4x8x1xf32>
    %116 = vector.broadcast %115 : vector<4x8x1xf32> to vector<4x8x8xf32>
    %117 = arith.mulf %108, %116 : vector<4x8x8xf32>
    "tpu.trace_start"() <{level = 10 : i32, message = "bqk,bkw->bqw"}> : () -> ()
    %cst_50 = arith.constant dense<0.000000e+00> : vector<4x8x8xf32>
    %118 = tpu.matmul %117, %102, %cst_50 {dimension_numbers = #tpu.dot_dimension_numbers<[2], [1], [1], [2], [0, 0, 0, 1, 1, 2], [0], [0]>, precision = #tpu.contract_precision<fp32>} : vector<4x8x8xf32>, vector<4x8x8xf32>, vector<4x8x8xf32> -> vector<4x8x8xf32>
    "tpu.trace_stop"() : () -> ()
    %119 = vector.shape_cast %118 : vector<4x8x8xf32> to vector<1x4x8x8xf32>
    %120 = vector.extract_strided_slice %119 {offsets = [0, 0, 0, 0], sizes = [1, 1, 8, 8], strides = [1, 1, 1, 1]} : vector<1x4x8x8xf32> to vector<1x1x8x8xf32>
    %121 = vector.shape_cast %120 : vector<1x1x8x8xf32> to vector<1x8x8xf32>
    %122 = vector.extract_strided_slice %119 {offsets = [0, 1, 0, 0], sizes = [1, 1, 8, 8], strides = [1, 1, 1, 1]} : vector<1x4x8x8xf32> to vector<1x1x8x8xf32>
    %123 = vector.shape_cast %122 : vector<1x1x8x8xf32> to vector<1x8x8xf32>
    %124 = vector.extract_strided_slice %119 {offsets = [0, 2, 0, 0], sizes = [1, 1, 8, 8], strides = [1, 1, 1, 1]} : vector<1x4x8x8xf32> to vector<1x1x8x8xf32>
    %125 = vector.shape_cast %124 : vector<1x1x8x8xf32> to vector<1x8x8xf32>
    %126 = vector.extract_strided_slice %119 {offsets = [0, 3, 0, 0], sizes = [1, 1, 8, 8], strides = [1, 1, 1, 1]} : vector<1x4x8x8xf32> to vector<1x1x8x8xf32>
    %127 = vector.shape_cast %126 : vector<1x1x8x8xf32> to vector<1x8x8xf32>
    %128 = tpu.concatenate %121, %123, %125, %127 in 2 : vector<1x8x8xf32>, vector<1x8x8xf32>, vector<1x8x8xf32>, vector<1x8x8xf32> -> vector<1x8x32xf32>
    %129 = vector.shape_cast %128 : vector<1x8x32xf32> to vector<8x32xf32>
    %c0_51 = arith.constant 0 : index
    %c0_52 = arith.constant 0 : index
    %130 = vector.load %arg9[%c0_51, %c0_52] : memref<32x32xf32, #tpu.memory_space<vmem>>, vector<32x32xf32>
    %cst_53 = arith.constant dense<0.000000e+00> : vector<8x32xf32>
    %131 = tpu.matmul %129, %130, %cst_53 {dimension_numbers = #tpu.dot_dimension_numbers<[1], [0], [0], [1], [0, 0, 1, 1], [], []>, precision = #tpu.contract_precision<fp32>} : vector<8x32xf32>, vector<32x32xf32>, vector<8x32xf32> -> vector<8x32xf32>
    %132 = vector.broadcast %54 : vector<1x32xf32> to vector<8x32xf32>
    %133 = arith.addf %131, %132 : vector<8x32xf32>
    %134 = arith.addf %129, %133 : vector<8x32xf32>
    %cst_54 = arith.constant dense<0.000000e+00> : vector<8xf32>
    %135 = vector.multi_reduction <add>, %134, %cst_54 [1] : vector<8x32xf32> to vector<8xf32>
    %136 = vector.shape_cast %135 : vector<8xf32> to vector<8x1xf32>
    %cst_55 = arith.constant 3.200000e+01 : f32
    %137 = vector.broadcast %cst_55 : f32 to vector<8x1xf32>
    %138 = arith.divf %136, %137 : vector<8x1xf32>
    %139 = vector.broadcast %138 : vector<8x1xf32> to vector<8x32xf32>
    %140 = arith.subf %134, %139 : vector<8x32xf32>
    %141 = arith.mulf %140, %140 : vector<8x32xf32>
    %cst_56 = arith.constant dense<0.000000e+00> : vector<8xf32>
    %142 = vector.multi_reduction <add>, %141, %cst_56 [1] : vector<8x32xf32> to vector<8xf32>
    %143 = vector.shape_cast %142 : vector<8xf32> to vector<8x1xf32>
    %cst_57 = arith.constant 3.200000e+01 : f32
    %144 = vector.broadcast %cst_57 : f32 to vector<8x1xf32>
    %145 = arith.divf %143, %144 : vector<8x1xf32>
    %cst_58 = arith.constant 9.99999996E-13 : f32
    %146 = vector.broadcast %cst_58 : f32 to vector<8x1xf32>
    %147 = arith.addf %145, %146 : vector<8x1xf32>
    %148 = math.rsqrt %147 : vector<8x1xf32>
    %149 = vector.broadcast %148 : vector<8x1xf32> to vector<8x32xf32>
    %150 = arith.mulf %140, %149 : vector<8x32xf32>
    %151 = vector.broadcast %55 : vector<1x32xf32> to vector<8x32xf32>
    %152 = arith.mulf %151, %150 : vector<8x32xf32>
    %153 = vector.broadcast %56 : vector<1x32xf32> to vector<8x32xf32>
    %154 = arith.addf %152, %153 : vector<8x32xf32>
    %c0_59 = arith.constant 0 : index
    %c0_60 = arith.constant 0 : index
    %155 = vector.load %arg13[%c0_59, %c0_60] : memref<32x64xf32, #tpu.memory_space<vmem>>, vector<32x64xf32>
    %cst_61 = arith.constant dense<0.000000e+00> : vector<8x64xf32>
    %156 = tpu.matmul %154, %155, %cst_61 {dimension_numbers = #tpu.dot_dimension_numbers<[1], [0], [0], [1], [0, 0, 1, 1], [], []>, precision = #tpu.contract_precision<fp32>} : vector<8x32xf32>, vector<32x64xf32>, vector<8x64xf32> -> vector<8x64xf32>
    %157 = vector.broadcast %57 : vector<1x64xf32> to vector<8x64xf32>
    %158 = arith.addf %156, %157 : vector<8x64xf32>
    %cst_62 = arith.constant 5.000000e-01 : f32
    %159 = vector.broadcast %cst_62 : f32 to vector<8x64xf32>
    %160 = arith.mulf %158, %159 : vector<8x64xf32>
    %cst_63 = arith.constant 0.707106769 : f32
    %161 = vector.broadcast %cst_63 : f32 to vector<8x64xf32>
    %162 = arith.mulf %158, %161 : vector<8x64xf32>
    %163 = math.absf %162 : vector<8x64xf32>
    %cst_64 = arith.constant 0.327591091 : f32
    %164 = vector.broadcast %cst_64 : f32 to vector<8x64xf32>
    %165 = arith.mulf %164, %163 : vector<8x64xf32>
    %cst_65 = arith.constant 1.000000e+00 : f32
    %166 = vector.broadcast %cst_65 : f32 to vector<8x64xf32>
    %167 = arith.addf %166, %165 : vector<8x64xf32>
    %cst_66 = arith.constant 1.000000e+00 : f32
    %168 = vector.broadcast %cst_66 : f32 to vector<8x64xf32>
    %169 = arith.divf %168, %167 : vector<8x64xf32>
    %cst_67 = arith.constant 1.06140542 : f32
    %170 = vector.broadcast %cst_67 : f32 to vector<8x64xf32>
    %171 = arith.mulf %170, %169 : vector<8x64xf32>
    %cst_68 = arith.constant -1.45315206 : f32
    %172 = vector.broadcast %cst_68 : f32 to vector<8x64xf32>
    %173 = arith.addf %171, %172 : vector<8x64xf32>
    %174 = arith.mulf %173, %169 : vector<8x64xf32>
    %cst_69 = arith.constant 1.42141378 : f32
    %175 = vector.broadcast %cst_69 : f32 to vector<8x64xf32>
    %176 = arith.addf %174, %175 : vector<8x64xf32>
    %177 = arith.mulf %176, %169 : vector<8x64xf32>
    %cst_70 = arith.constant -0.284496725 : f32
    %178 = vector.broadcast %cst_70 : f32 to vector<8x64xf32>
    %179 = arith.addf %177, %178 : vector<8x64xf32>
    %180 = arith.mulf %179, %169 : vector<8x64xf32>
    %cst_71 = arith.constant 0.254829586 : f32
    %181 = vector.broadcast %cst_71 : f32 to vector<8x64xf32>
    %182 = arith.addf %180, %181 : vector<8x64xf32>
    %183 = arith.mulf %182, %169 : vector<8x64xf32>
    %cst_72 = arith.constant 0.000000e+00 : f32
    %184 = vector.broadcast %cst_72 : f32 to vector<8x64xf32>
    %185 = arith.subf %184, %163 : vector<8x64xf32>
    %186 = arith.mulf %185, %163 : vector<8x64xf32>
    %187 = math.exp %186 : vector<8x64xf32>
    %188 = arith.mulf %183, %187 : vector<8x64xf32>
    %cst_73 = arith.constant 1.000000e+00 : f32
    %189 = vector.broadcast %cst_73 : f32 to vector<8x64xf32>
    %190 = arith.subf %189, %188 : vector<8x64xf32>
    %cst_74 = arith.constant 0.000000e+00 : f32
    %191 = vector.broadcast %cst_74 : f32 to vector<8x64xf32>
    %192 = arith.cmpf oge, %162, %191 : vector<8x64xf32>
    %cst_75 = arith.constant 0.000000e+00 : f32
    %193 = vector.broadcast %cst_75 : f32 to vector<8x64xf32>
    %194 = arith.subf %193, %190 : vector<8x64xf32>
    %195 = arith.select %192, %190, %194 : vector<8x64xi1>, vector<8x64xf32>
    %cst_76 = arith.constant 1.000000e+00 : f32
    %196 = vector.broadcast %cst_76 : f32 to vector<8x64xf32>
    %197 = arith.addf %196, %195 : vector<8x64xf32>
    %198 = arith.mulf %160, %197 : vector<8x64xf32>
    %c0_77 = arith.constant 0 : index
    %c0_78 = arith.constant 0 : index
    %199 = vector.load %arg15[%c0_77, %c0_78] : memref<64x32xf32, #tpu.memory_space<vmem>>, vector<64x32xf32>
    %cst_79 = arith.constant dense<0.000000e+00> : vector<8x32xf32>
    %200 = tpu.matmul %198, %199, %cst_79 {dimension_numbers = #tpu.dot_dimension_numbers<[1], [0], [0], [1], [0, 0, 1, 1], [], []>, precision = #tpu.contract_precision<fp32>} : vector<8x64xf32>, vector<64x32xf32>, vector<8x32xf32> -> vector<8x32xf32>
    %201 = vector.broadcast %58 : vector<1x32xf32> to vector<8x32xf32>
    %202 = arith.addf %200, %201 : vector<8x32xf32>
    %203 = arith.addf %154, %202 : vector<8x32xf32>
    %cst_80 = arith.constant dense<0.000000e+00> : vector<8xf32>
    %204 = vector.multi_reduction <add>, %203, %cst_80 [1] : vector<8x32xf32> to vector<8xf32>
    %205 = vector.shape_cast %204 : vector<8xf32> to vector<8x1xf32>
    %cst_81 = arith.constant 3.200000e+01 : f32
    %206 = vector.broadcast %cst_81 : f32 to vector<8x1xf32>
    %207 = arith.divf %205, %206 : vector<8x1xf32>
    %208 = vector.broadcast %207 : vector<8x1xf32> to vector<8x32xf32>
    %209 = arith.subf %203, %208 : vector<8x32xf32>
    %210 = arith.mulf %209, %209 : vector<8x32xf32>
    %cst_82 = arith.constant dense<0.000000e+00> : vector<8xf32>
    %211 = vector.multi_reduction <add>, %210, %cst_82 [1] : vector<8x32xf32> to vector<8xf32>
    %212 = vector.shape_cast %211 : vector<8xf32> to vector<8x1xf32>
    %cst_83 = arith.constant 3.200000e+01 : f32
    %213 = vector.broadcast %cst_83 : f32 to vector<8x1xf32>
    %214 = arith.divf %212, %213 : vector<8x1xf32>
    %cst_84 = arith.constant 9.99999996E-13 : f32
    %215 = vector.broadcast %cst_84 : f32 to vector<8x1xf32>
    %216 = arith.addf %214, %215 : vector<8x1xf32>
    %217 = math.rsqrt %216 : vector<8x1xf32>
    %218 = vector.broadcast %217 : vector<8x1xf32> to vector<8x32xf32>
    %219 = arith.mulf %209, %218 : vector<8x32xf32>
    %220 = vector.broadcast %59 : vector<1x32xf32> to vector<8x32xf32>
    %221 = arith.mulf %220, %219 : vector<8x32xf32>
    %222 = vector.broadcast %60 : vector<1x32xf32> to vector<8x32xf32>
    %223 = arith.addf %221, %222 : vector<8x32xf32>
    %c0_85 = arith.constant 0 : index
    %c0_86 = arith.constant 0 : index
    %224 = vector.load %arg7[%c0_85, %c0_86] : memref<32x96xf32, #tpu.memory_space<vmem>>, vector<32x96xf32>
    %cst_87 = arith.constant dense<0.000000e+00> : vector<8x96xf32>
    %225 = tpu.matmul %223, %224, %cst_87 {dimension_numbers = #tpu.dot_dimension_numbers<[1], [0], [0], [1], [0, 0, 1, 1], [], []>, precision = #tpu.contract_precision<fp32>} : vector<8x32xf32>, vector<32x96xf32>, vector<8x96xf32> -> vector<8x96xf32>
    %226 = vector.broadcast %53 : vector<1x96xf32> to vector<8x96xf32>
    %227 = arith.addf %225, %226 : vector<8x96xf32>
    %228 = vector.extract_strided_slice %227 {offsets = [0, 0], sizes = [8, 32], strides = [1, 1]} : vector<8x96xf32> to vector<8x32xf32>
    %cst_88 = arith.constant 0.353553385 : f32
    %229 = vector.broadcast %cst_88 : f32 to vector<8x32xf32>
    %230 = arith.mulf %228, %229 : vector<8x32xf32>
    %231 = vector.extract_strided_slice %227 {offsets = [0, 32], sizes = [8, 32], strides = [1, 1]} : vector<8x96xf32> to vector<8x32xf32>
    %232 = vector.extract_strided_slice %227 {offsets = [0, 64], sizes = [8, 32], strides = [1, 1]} : vector<8x96xf32> to vector<8x32xf32>
    %233 = vector.shape_cast %230 : vector<8x32xf32> to vector<1x8x32xf32>
    %234 = vector.extract_strided_slice %233 {offsets = [0, 0, 0], sizes = [1, 8, 8], strides = [1, 1, 1]} : vector<1x8x32xf32> to vector<1x8x8xf32>
    %235 = vector.shape_cast %234 : vector<1x8x8xf32> to vector<1x1x8x8xf32>
    %236 = vector.extract_strided_slice %233 {offsets = [0, 0, 8], sizes = [1, 8, 8], strides = [1, 1, 1]} : vector<1x8x32xf32> to vector<1x8x8xf32>
    %237 = vector.shape_cast %236 : vector<1x8x8xf32> to vector<1x1x8x8xf32>
    %238 = vector.extract_strided_slice %233 {offsets = [0, 0, 16], sizes = [1, 8, 8], strides = [1, 1, 1]} : vector<1x8x32xf32> to vector<1x8x8xf32>
    %239 = vector.shape_cast %238 : vector<1x8x8xf32> to vector<1x1x8x8xf32>
    %240 = vector.extract_strided_slice %233 {offsets = [0, 0, 24], sizes = [1, 8, 8], strides = [1, 1, 1]} : vector<1x8x32xf32> to vector<1x8x8xf32>
    %241 = vector.shape_cast %240 : vector<1x8x8xf32> to vector<1x1x8x8xf32>
    %242 = tpu.concatenate %235, %237, %239, %241 in 1 : vector<1x1x8x8xf32>, vector<1x1x8x8xf32>, vector<1x1x8x8xf32>, vector<1x1x8x8xf32> -> vector<1x4x8x8xf32>
    %243 = vector.shape_cast %242 : vector<1x4x8x8xf32> to vector<4x8x8xf32>
    %244 = vector.shape_cast %231 : vector<8x32xf32> to vector<1x8x32xf32>
    %245 = vector.extract_strided_slice %244 {offsets = [0, 0, 0], sizes = [1, 8, 8], strides = [1, 1, 1]} : vector<1x8x32xf32> to vector<1x8x8xf32>
    %246 = vector.shape_cast %245 : vector<1x8x8xf32> to vector<1x1x8x8xf32>
    %247 = vector.extract_strided_slice %244 {offsets = [0, 0, 8], sizes = [1, 8, 8], strides = [1, 1, 1]} : vector<1x8x32xf32> to vector<1x8x8xf32>
    %248 = vector.shape_cast %247 : vector<1x8x8xf32> to vector<1x1x8x8xf32>
    %249 = vector.extract_strided_slice %244 {offsets = [0, 0, 16], sizes = [1, 8, 8], strides = [1, 1, 1]} : vector<1x8x32xf32> to vector<1x8x8xf32>
    %250 = vector.shape_cast %249 : vector<1x8x8xf32> to vector<1x1x8x8xf32>
    %251 = vector.extract_strided_slice %244 {offsets = [0, 0, 24], sizes = [1, 8, 8], strides = [1, 1, 1]} : vector<1x8x32xf32> to vector<1x8x8xf32>
    %252 = vector.shape_cast %251 : vector<1x8x8xf32> to vector<1x1x8x8xf32>
    %253 = tpu.concatenate %246, %248, %250, %252 in 1 : vector<1x1x8x8xf32>, vector<1x1x8x8xf32>, vector<1x1x8x8xf32>, vector<1x1x8x8xf32> -> vector<1x4x8x8xf32>
    %254 = vector.shape_cast %253 : vector<1x4x8x8xf32> to vector<4x8x8xf32>
    %255 = vector.shape_cast %232 : vector<8x32xf32> to vector<1x8x32xf32>
    %256 = vector.extract_strided_slice %255 {offsets = [0, 0, 0], sizes = [1, 8, 8], strides = [1, 1, 1]} : vector<1x8x32xf32> to vector<1x8x8xf32>
    %257 = vector.shape_cast %256 : vector<1x8x8xf32> to vector<1x1x8x8xf32>
    %258 = vector.extract_strided_slice %255 {offsets = [0, 0, 8], sizes = [1, 8, 8], strides = [1, 1, 1]} : vector<1x8x32xf32> to vector<1x8x8xf32>
    %259 = vector.shape_cast %258 : vector<1x8x8xf32> to vector<1x1x8x8xf32>
    %260 = vector.extract_strided_slice %255 {offsets = [0, 0, 16], sizes = [1, 8, 8], strides = [1, 1, 1]} : vector<1x8x32xf32> to vector<1x8x8xf32>
    %261 = vector.shape_cast %260 : vector<1x8x8xf32> to vector<1x1x8x8xf32>
    %262 = vector.extract_strided_slice %255 {offsets = [0, 0, 24], sizes = [1, 8, 8], strides = [1, 1, 1]} : vector<1x8x32xf32> to vector<1x8x8xf32>
    %263 = vector.shape_cast %262 : vector<1x8x8xf32> to vector<1x1x8x8xf32>
    %264 = tpu.concatenate %257, %259, %261, %263 in 1 : vector<1x1x8x8xf32>, vector<1x1x8x8xf32>, vector<1x1x8x8xf32>, vector<1x1x8x8xf32> -> vector<1x4x8x8xf32>
    %265 = vector.shape_cast %264 : vector<1x4x8x8xf32> to vector<4x8x8xf32>
    "tpu.trace_start"() <{level = 10 : i32, message = "bqw,bkw->bqk"}> : () -> ()
    %cst_89 = arith.constant dense<0.000000e+00> : vector<4x8x8xf32>
    %266 = tpu.matmul %243, %254, %cst_89 {dimension_numbers = #tpu.dot_dimension_numbers<[2], [2], [1], [1], [0, 0, 0, 1, 1, 1], [0], [0]>, precision = #tpu.contract_precision<fp32>} : vector<4x8x8xf32>, vector<4x8x8xf32>, vector<4x8x8xf32> -> vector<4x8x8xf32>
    "tpu.trace_stop"() : () -> ()
    %cst_90 = arith.constant dense<0xFF800000> : vector<4x8xf32>
    %267 = vector.multi_reduction <maximumf>, %266, %cst_90 [2] : vector<4x8x8xf32> to vector<4x8xf32>
    %268 = vector.shape_cast %267 : vector<4x8xf32> to vector<4x8x1xf32>
    %269 = vector.broadcast %268 : vector<4x8x1xf32> to vector<4x8x8xf32>
    %270 = arith.subf %266, %269 : vector<4x8x8xf32>
    %271 = math.exp %270 : vector<4x8x8xf32>
    %cst_91 = arith.constant dense<0.000000e+00> : vector<4x8xf32>
    %272 = vector.multi_reduction <add>, %271, %cst_91 [2] : vector<4x8x8xf32> to vector<4x8xf32>
    %273 = vector.shape_cast %272 : vector<4x8xf32> to vector<4x8x1xf32>
    %274 = tpu.reciprocal %273 {approx = true} : vector<4x8x1xf32> -> vector<4x8x1xf32>
    %275 = arith.mulf %273, %274 : vector<4x8x1xf32>
    %cst_92 = arith.constant 2.000000e+00 : f32
    %276 = vector.broadcast %cst_92 : f32 to vector<4x8x1xf32>
    %277 = arith.subf %276, %275 : vector<4x8x1xf32>
    %278 = arith.mulf %274, %277 : vector<4x8x1xf32>
    %279 = vector.broadcast %278 : vector<4x8x1xf32> to vector<4x8x8xf32>
    %280 = arith.mulf %271, %279 : vector<4x8x8xf32>
    "tpu.trace_start"() <{level = 10 : i32, message = "bqk,bkw->bqw"}> : () -> ()
    %cst_93 = arith.constant dense<0.000000e+00> : vector<4x8x8xf32>
    %281 = tpu.matmul %280, %265, %cst_93 {dimension_numbers = #tpu.dot_dimension_numbers<[2], [1], [1], [2], [0, 0, 0, 1, 1, 2], [0], [0]>, precision = #tpu.contract_precision<fp32>} : vector<4x8x8xf32>, vector<4x8x8xf32>, vector<4x8x8xf32> -> vector<4x8x8xf32>
    "tpu.trace_stop"() : () -> ()
    %282 = vector.shape_cast %281 : vector<4x8x8xf32> to vector<1x4x8x8xf32>
    %283 = vector.extract_strided_slice %282 {offsets = [0, 0, 0, 0], sizes = [1, 1, 8, 8], strides = [1, 1, 1, 1]} : vector<1x4x8x8xf32> to vector<1x1x8x8xf32>
    %284 = vector.shape_cast %283 : vector<1x1x8x8xf32> to vector<1x8x8xf32>
    %285 = vector.extract_strided_slice %282 {offsets = [0, 1, 0, 0], sizes = [1, 1, 8, 8], strides = [1, 1, 1, 1]} : vector<1x4x8x8xf32> to vector<1x1x8x8xf32>
    %286 = vector.shape_cast %285 : vector<1x1x8x8xf32> to vector<1x8x8xf32>
    %287 = vector.extract_strided_slice %282 {offsets = [0, 2, 0, 0], sizes = [1, 1, 8, 8], strides = [1, 1, 1, 1]} : vector<1x4x8x8xf32> to vector<1x1x8x8xf32>
    %288 = vector.shape_cast %287 : vector<1x1x8x8xf32> to vector<1x8x8xf32>
    %289 = vector.extract_strided_slice %282 {offsets = [0, 3, 0, 0], sizes = [1, 1, 8, 8], strides = [1, 1, 1, 1]} : vector<1x4x8x8xf32> to vector<1x1x8x8xf32>
    %290 = vector.shape_cast %289 : vector<1x1x8x8xf32> to vector<1x8x8xf32>
    %291 = tpu.concatenate %284, %286, %288, %290 in 2 : vector<1x8x8xf32>, vector<1x8x8xf32>, vector<1x8x8xf32>, vector<1x8x8xf32> -> vector<1x8x32xf32>
    %292 = vector.shape_cast %291 : vector<1x8x32xf32> to vector<8x32xf32>
    %c0_94 = arith.constant 0 : index
    %c0_95 = arith.constant 0 : index
    %293 = vector.load %arg9[%c0_94, %c0_95] : memref<32x32xf32, #tpu.memory_space<vmem>>, vector<32x32xf32>
    %cst_96 = arith.constant dense<0.000000e+00> : vector<8x32xf32>
    %294 = tpu.matmul %292, %293, %cst_96 {dimension_numbers = #tpu.dot_dimension_numbers<[1], [0], [0], [1], [0, 0, 1, 1], [], []>, precision = #tpu.contract_precision<fp32>} : vector<8x32xf32>, vector<32x32xf32>, vector<8x32xf32> -> vector<8x32xf32>
    %295 = vector.broadcast %54 : vector<1x32xf32> to vector<8x32xf32>
    %296 = arith.addf %294, %295 : vector<8x32xf32>
    %297 = arith.addf %292, %296 : vector<8x32xf32>
    %cst_97 = arith.constant dense<0.000000e+00> : vector<8xf32>
    %298 = vector.multi_reduction <add>, %297, %cst_97 [1] : vector<8x32xf32> to vector<8xf32>
    %299 = vector.shape_cast %298 : vector<8xf32> to vector<8x1xf32>
    %cst_98 = arith.constant 3.200000e+01 : f32
    %300 = vector.broadcast %cst_98 : f32 to vector<8x1xf32>
    %301 = arith.divf %299, %300 : vector<8x1xf32>
    %302 = vector.broadcast %301 : vector<8x1xf32> to vector<8x32xf32>
    %303 = arith.subf %297, %302 : vector<8x32xf32>
    %304 = arith.mulf %303, %303 : vector<8x32xf32>
    %cst_99 = arith.constant dense<0.000000e+00> : vector<8xf32>
    %305 = vector.multi_reduction <add>, %304, %cst_99 [1] : vector<8x32xf32> to vector<8xf32>
    %306 = vector.shape_cast %305 : vector<8xf32> to vector<8x1xf32>
    %cst_100 = arith.constant 3.200000e+01 : f32
    %307 = vector.broadcast %cst_100 : f32 to vector<8x1xf32>
    %308 = arith.divf %306, %307 : vector<8x1xf32>
    %cst_101 = arith.constant 9.99999996E-13 : f32
    %309 = vector.broadcast %cst_101 : f32 to vector<8x1xf32>
    %310 = arith.addf %308, %309 : vector<8x1xf32>
    %311 = math.rsqrt %310 : vector<8x1xf32>
    %312 = vector.broadcast %311 : vector<8x1xf32> to vector<8x32xf32>
    %313 = arith.mulf %303, %312 : vector<8x32xf32>
    %314 = vector.broadcast %55 : vector<1x32xf32> to vector<8x32xf32>
    %315 = arith.mulf %314, %313 : vector<8x32xf32>
    %316 = vector.broadcast %56 : vector<1x32xf32> to vector<8x32xf32>
    %317 = arith.addf %315, %316 : vector<8x32xf32>
    %c0_102 = arith.constant 0 : index
    %c0_103 = arith.constant 0 : index
    %318 = vector.load %arg13[%c0_102, %c0_103] : memref<32x64xf32, #tpu.memory_space<vmem>>, vector<32x64xf32>
    %cst_104 = arith.constant dense<0.000000e+00> : vector<8x64xf32>
    %319 = tpu.matmul %317, %318, %cst_104 {dimension_numbers = #tpu.dot_dimension_numbers<[1], [0], [0], [1], [0, 0, 1, 1], [], []>, precision = #tpu.contract_precision<fp32>} : vector<8x32xf32>, vector<32x64xf32>, vector<8x64xf32> -> vector<8x64xf32>
    %320 = vector.broadcast %57 : vector<1x64xf32> to vector<8x64xf32>
    %321 = arith.addf %319, %320 : vector<8x64xf32>
    %cst_105 = arith.constant 5.000000e-01 : f32
    %322 = vector.broadcast %cst_105 : f32 to vector<8x64xf32>
    %323 = arith.mulf %321, %322 : vector<8x64xf32>
    %cst_106 = arith.constant 0.707106769 : f32
    %324 = vector.broadcast %cst_106 : f32 to vector<8x64xf32>
    %325 = arith.mulf %321, %324 : vector<8x64xf32>
    %326 = math.absf %325 : vector<8x64xf32>
    %cst_107 = arith.constant 0.327591091 : f32
    %327 = vector.broadcast %cst_107 : f32 to vector<8x64xf32>
    %328 = arith.mulf %327, %326 : vector<8x64xf32>
    %cst_108 = arith.constant 1.000000e+00 : f32
    %329 = vector.broadcast %cst_108 : f32 to vector<8x64xf32>
    %330 = arith.addf %329, %328 : vector<8x64xf32>
    %cst_109 = arith.constant 1.000000e+00 : f32
    %331 = vector.broadcast %cst_109 : f32 to vector<8x64xf32>
    %332 = arith.divf %331, %330 : vector<8x64xf32>
    %cst_110 = arith.constant 1.06140542 : f32
    %333 = vector.broadcast %cst_110 : f32 to vector<8x64xf32>
    %334 = arith.mulf %333, %332 : vector<8x64xf32>
    %cst_111 = arith.constant -1.45315206 : f32
    %335 = vector.broadcast %cst_111 : f32 to vector<8x64xf32>
    %336 = arith.addf %334, %335 : vector<8x64xf32>
    %337 = arith.mulf %336, %332 : vector<8x64xf32>
    %cst_112 = arith.constant 1.42141378 : f32
    %338 = vector.broadcast %cst_112 : f32 to vector<8x64xf32>
    %339 = arith.addf %337, %338 : vector<8x64xf32>
    %340 = arith.mulf %339, %332 : vector<8x64xf32>
    %cst_113 = arith.constant -0.284496725 : f32
    %341 = vector.broadcast %cst_113 : f32 to vector<8x64xf32>
    %342 = arith.addf %340, %341 : vector<8x64xf32>
    %343 = arith.mulf %342, %332 : vector<8x64xf32>
    %cst_114 = arith.constant 0.254829586 : f32
    %344 = vector.broadcast %cst_114 : f32 to vector<8x64xf32>
    %345 = arith.addf %343, %344 : vector<8x64xf32>
    %346 = arith.mulf %345, %332 : vector<8x64xf32>
    %cst_115 = arith.constant 0.000000e+00 : f32
    %347 = vector.broadcast %cst_115 : f32 to vector<8x64xf32>
    %348 = arith.subf %347, %326 : vector<8x64xf32>
    %349 = arith.mulf %348, %326 : vector<8x64xf32>
    %350 = math.exp %349 : vector<8x64xf32>
    %351 = arith.mulf %346, %350 : vector<8x64xf32>
    %cst_116 = arith.constant 1.000000e+00 : f32
    %352 = vector.broadcast %cst_116 : f32 to vector<8x64xf32>
    %353 = arith.subf %352, %351 : vector<8x64xf32>
    %cst_117 = arith.constant 0.000000e+00 : f32
    %354 = vector.broadcast %cst_117 : f32 to vector<8x64xf32>
    %355 = arith.cmpf oge, %325, %354 : vector<8x64xf32>
    %cst_118 = arith.constant 0.000000e+00 : f32
    %356 = vector.broadcast %cst_118 : f32 to vector<8x64xf32>
    %357 = arith.subf %356, %353 : vector<8x64xf32>
    %358 = arith.select %355, %353, %357 : vector<8x64xi1>, vector<8x64xf32>
    %cst_119 = arith.constant 1.000000e+00 : f32
    %359 = vector.broadcast %cst_119 : f32 to vector<8x64xf32>
    %360 = arith.addf %359, %358 : vector<8x64xf32>
    %361 = arith.mulf %323, %360 : vector<8x64xf32>
    %c0_120 = arith.constant 0 : index
    %c0_121 = arith.constant 0 : index
    %362 = vector.load %arg15[%c0_120, %c0_121] : memref<64x32xf32, #tpu.memory_space<vmem>>, vector<64x32xf32>
    %cst_122 = arith.constant dense<0.000000e+00> : vector<8x32xf32>
    %363 = tpu.matmul %361, %362, %cst_122 {dimension_numbers = #tpu.dot_dimension_numbers<[1], [0], [0], [1], [0, 0, 1, 1], [], []>, precision = #tpu.contract_precision<fp32>} : vector<8x64xf32>, vector<64x32xf32>, vector<8x32xf32> -> vector<8x32xf32>
    %364 = vector.broadcast %58 : vector<1x32xf32> to vector<8x32xf32>
    %365 = arith.addf %363, %364 : vector<8x32xf32>
    %366 = arith.addf %317, %365 : vector<8x32xf32>
    %cst_123 = arith.constant dense<0.000000e+00> : vector<8xf32>
    %367 = vector.multi_reduction <add>, %366, %cst_123 [1] : vector<8x32xf32> to vector<8xf32>
    %368 = vector.shape_cast %367 : vector<8xf32> to vector<8x1xf32>
    %cst_124 = arith.constant 3.200000e+01 : f32
    %369 = vector.broadcast %cst_124 : f32 to vector<8x1xf32>
    %370 = arith.divf %368, %369 : vector<8x1xf32>
    %371 = vector.broadcast %370 : vector<8x1xf32> to vector<8x32xf32>
    %372 = arith.subf %366, %371 : vector<8x32xf32>
    %373 = arith.mulf %372, %372 : vector<8x32xf32>
    %cst_125 = arith.constant dense<0.000000e+00> : vector<8xf32>
    %374 = vector.multi_reduction <add>, %373, %cst_125 [1] : vector<8x32xf32> to vector<8xf32>
    %375 = vector.shape_cast %374 : vector<8xf32> to vector<8x1xf32>
    %cst_126 = arith.constant 3.200000e+01 : f32
    %376 = vector.broadcast %cst_126 : f32 to vector<8x1xf32>
    %377 = arith.divf %375, %376 : vector<8x1xf32>
    %cst_127 = arith.constant 9.99999996E-13 : f32
    %378 = vector.broadcast %cst_127 : f32 to vector<8x1xf32>
    %379 = arith.addf %377, %378 : vector<8x1xf32>
    %380 = math.rsqrt %379 : vector<8x1xf32>
    %381 = vector.broadcast %380 : vector<8x1xf32> to vector<8x32xf32>
    %382 = arith.mulf %372, %381 : vector<8x32xf32>
    %383 = vector.broadcast %59 : vector<1x32xf32> to vector<8x32xf32>
    %384 = arith.mulf %383, %382 : vector<8x32xf32>
    %385 = vector.broadcast %60 : vector<1x32xf32> to vector<8x32xf32>
    %386 = arith.addf %384, %385 : vector<8x32xf32>
    %387 = vector.shape_cast %386 : vector<8x32xf32> to vector<1x8x32xf32>
    %c0_128 = arith.constant 0 : index
    %c0_129 = arith.constant 0 : index
    %c0_130 = arith.constant 0 : index
    %388 = vector.load %arg19[%c0_128, %c0_129, %c0_130] : memref<1x8x32xf32, #tpu.memory_space<vmem>>, vector<1x8x32xf32>
    tpu.vector_store %arg19[%c0_128, %c0_129, %c0_130], %387 {strides = array<i32>} : memref<1x8x32xf32, #tpu.memory_space<vmem>>, vector<1x8x32xf32>,
    return
  }
  func.func @transform_0(%arg0: i32) -> (i32, i32, i32) {
    %c0_i32 = arith.constant 0 : i32
    %c0_i32_0 = arith.constant 0 : i32
    %c0_i32_1 = arith.constant 0 : i32
    return %arg0, %c0_i32, %c0_i32_0 : i32, i32, i32
  }
  func.func @transform_1(%arg0: i32) -> (i32, i32) {
    %c0_i32 = arith.constant 0 : i32
    %c0_i32_0 = arith.constant 0 : i32
    %c0_i32_1 = arith.constant 0 : i32
    return %c0_i32, %c0_i32_0 : i32, i32
  }
  func.func @transform_2(%arg0: i32) -> (i32, i32) {
    %c0_i32 = arith.constant 0 : i32
    %c0_i32_0 = arith.constant 0 : i32
    %c0_i32_1 = arith.constant 0 : i32
    return %c0_i32, %c0_i32_0 : i32, i32
  }
  func.func @transform_3(%arg0: i32) -> (i32, i32) {
    %c0_i32 = arith.constant 0 : i32
    %c0_i32_0 = arith.constant 0 : i32
    %c0_i32_1 = arith.constant 0 : i32
    return %c0_i32, %c0_i32_0 : i32, i32
  }
  func.func @transform_4(%arg0: i32) -> (i32, i32) {
    %c0_i32 = arith.constant 0 : i32
    %c0_i32_0 = arith.constant 0 : i32
    %c0_i32_1 = arith.constant 0 : i32
    return %c0_i32, %c0_i32_0 : i32, i32
  }
  func.func @transform_5(%arg0: i32) -> (i32, i32) {
    %c0_i32 = arith.constant 0 : i32
    %c0_i32_0 = arith.constant 0 : i32
    %c0_i32_1 = arith.constant 0 : i32
    return %c0_i32, %c0_i32_0 : i32, i32
  }
  func.func @transform_6(%arg0: i32) -> (i32, i32) {
    %c0_i32 = arith.constant 0 : i32
    %c0_i32_0 = arith.constant 0 : i32
    %c0_i32_1 = arith.constant 0 : i32
    return %c0_i32, %c0_i32_0 : i32, i32
  }
  func.func @transform_7(%arg0: i32) -> (i32, i32) {
    %c0_i32 = arith.constant 0 : i32
    %c0_i32_0 = arith.constant 0 : i32
    %c0_i32_1 = arith.constant 0 : i32
    return %c0_i32, %c0_i32_0 : i32, i32
  }
  func.func @transform_8(%arg0: i32) -> (i32, i32) {
    %c0_i32 = arith.constant 0 : i32
    %c0_i32_0 = arith.constant 0 : i32
    %c0_i32_1 = arith.constant 0 : i32
    return %c0_i32, %c0_i32_0 : i32, i32
  }
  func.func @transform_9(%arg0: i32) -> (i32, i32) {
    %c0_i32 = arith.constant 0 : i32
    %c0_i32_0 = arith.constant 0 : i32
    %c0_i32_1 = arith.constant 0 : i32
    return %c0_i32, %c0_i32_0 : i32, i32
  }
  func.func @transform_10(%arg0: i32) -> (i32, i32) {
    %c0_i32 = arith.constant 0 : i32
    %c0_i32_0 = arith.constant 0 : i32
    %c0_i32_1 = arith.constant 0 : i32
    return %c0_i32, %c0_i32_0 : i32, i32
  }
  func.func @transform_11(%arg0: i32) -> (i32, i32) {
    %c0_i32 = arith.constant 0 : i32
    %c0_i32_0 = arith.constant 0 : i32
    %c0_i32_1 = arith.constant 0 : i32
    return %c0_i32, %c0_i32_0 : i32, i32
  }
  func.func @transform_12(%arg0: i32) -> (i32, i32) {
    %c0_i32 = arith.constant 0 : i32
    %c0_i32_0 = arith.constant 0 : i32
    %c0_i32_1 = arith.constant 0 : i32
    return %c0_i32, %c0_i32_0 : i32, i32
  }
  func.func @transform_13(%arg0: i32) -> (i32, i32) {
    %c0_i32 = arith.constant 0 : i32
    %c0_i32_0 = arith.constant 0 : i32
    %c0_i32_1 = arith.constant 0 : i32
    return %c0_i32, %c0_i32_0 : i32, i32
  }
  func.func @transform_14(%arg0: i32) -> (i32, i32) {
    %c0_i32 = arith.constant 0 : i32
    %c0_i32_0 = arith.constant 0 : i32
    %c0_i32_1 = arith.constant 0 : i32
    return %c0_i32, %c0_i32_0 : i32, i32
  }
  func.func @transform_15(%arg0: i32) -> (i32, i32) {
    %c0_i32 = arith.constant 0 : i32
    %c0_i32_0 = arith.constant 0 : i32
    %c0_i32_1 = arith.constant 0 : i32
    return %c0_i32, %c0_i32_0 : i32, i32
  }
  func.func @transform_16(%arg0: i32) -> (i32, i32) {
    %c0_i32 = arith.constant 0 : i32
    %c0_i32_0 = arith.constant 0 : i32
    %c0_i32_1 = arith.constant 0 : i32
    return %c0_i32, %c0_i32_0 : i32, i32
  }
  func.func @transform_17(%arg0: i32) -> (i32, i32) {
    %c0_i32 = arith.constant 0 : i32
    %c0_i32_0 = arith.constant 0 : i32
    %c0_i32_1 = arith.constant 0 : i32
    return %c0_i32, %c0_i32_0 : i32, i32
  }
  func.func @transform_18(%arg0: i32) -> (i32, i32, i32) {
    %c0_i32 = arith.constant 0 : i32
    %c0_i32_0 = arith.constant 0 : i32
    %c0_i32_1 = arith.constant 0 : i32
    return %arg0, %c0_i32, %c0_i32_0 : i32, i32, i32
  }
}

</mosaic_0001>

<bundles_post_ra>
// kernel: tpu_custom_call.1
= control target key start
LH: loop header
LB: loop body
LE: loop exit
PB: predicated region body
PF: predicated region fallthrough
CT: control target
= control target key end

     0   :  { %s16861_s0 = inlined_call_operand.hbm [shape: f32[2,8,16], index: 0, kind: input, shape index: {}]   ;;  %s16862_s1 = inlined_call_operand.hbm [shape: f32[16,32], index: 1, kind: input, shape index: {}]   ;;  %s16863_s2 = inlined_call_operand.vmem [shape: f32[1,32], index: 2, kind: input, shape index: {}]   ;;  %s16864_s3 = inlined_call_operand.vmem [shape: f32[8,32], index: 3, kind: input, shape index: {}]   ;;  %s16865_s4 = inlined_call_operand.vmem [shape: f32[1,32], index: 4, kind: input, shape index: {}]   ;;  %s16866_s5 = inlined_call_operand.vmem [shape: f32[1,32], index: 5, kind: input, shape index: {}]   ;;  %s16867_s6 = inlined_call_operand.vmem [shape: f32[32,96], index: 6, kind: input, shape index: {}]   ;;  %s16868_s7 = inlined_call_operand.vmem [shape: f32[1,96], index: 7, kind: input, shape index: {}]   ;;  %s16869_s8 = inlined_call_operand.vmem [shape: f32[32,32], index: 8, kind: input, shape index: {}]   ;;  %s16870_s9 = inlined_call_operand.vmem [shape: f32[1,32], index: 9, kind: input, shape index: {}]   ;;  %s16871_s10 = inlined_call_operand.vmem [shape: f32[1,32], index: 10, kind: input, shape index: {}]   ;;  %s16872_s11 = inlined_call_operand.vmem [shape: f32[1,32], index: 11, kind: input, shape index: {}]   ;;  %s16873_s12 = inlined_call_operand.vmem [shape: f32[32,64], index: 12, kind: input, shape index: {}]   ;;  %s16874_s13 = inlined_call_operand.vmem [shape: f32[1,64], index: 13, kind: input, shape index: {}]   ;;  %s16875_s14 = inlined_call_operand.vmem [shape: f32[64,32], index: 14, kind: input, shape index: {}]   ;;  %s16876_s15 = inlined_call_operand.vmem [shape: f32[1,32], index: 15, kind: input, shape index: {}]   ;;  %s16877_s16 = inlined_call_operand.vmem [shape: f32[1,32], index: 16, kind: input, shape index: {}]   ;;  %s16878_s17 = inlined_call_operand.vmem [shape: f32[1,32], index: 17, kind: input, shape index: {}]   ;;  %s16879_s18 = inlined_call_operand.hbm [shape: f32[2,8,32], index: 18, kind: output, shape index: {}]  }
   0x1   :  { %16909 = sst [smem:[#allocation14_spill]] %s16861_s0 }
   0x2   :  { %16910 = sst [smem:[#allocation15_spill]] %s16862_s1 }
   0x3   :  { %16911 = sst [smem:[#allocation16_spill]] %s16863_s2 }
   0x4   :  { %16912 = sst [smem:[#allocation17_spill]] %s16864_s3 }
   0x5   :  { %16913 = sst [smem:[#allocation18_spill]] %s16865_s4 }
   0x6   :  { %16914 = sst [smem:[#allocation19_spill]] %s16866_s5 }
   0x7   :  { %16915 = sst [smem:[#allocation20_spill]] %s16867_s6 }
   0x8   :  { %16916 = sst [smem:[#allocation21_spill]] %s16872_s11 }
   0x9   :  { %16917 = sst [smem:[#allocation22_spill]] %s16874_s13 }
   0xa   :  { %16918 = sst [smem:[#allocation23_spill]] %s16875_s14 }
   0xb   :  { %16919 = sst [smem:[#allocation24_spill]] %s16876_s15 }
   0xc   :  { %16920 = sst [smem:[#allocation25_spill]] %s16877_s16 }
   0xd   :  { %16921 = sst [smem:[#allocation26_spill]] %s16878_s17 }
   0xe   :  { %16922 = sst [smem:[#allocation27_spill]] %s16879_s18 }
   0xf   :  { %23 = vsyncpa [#allocation3], 0 }
  0x10   :  { %25 = vsyncpa [#allocation3 + $0x1], 0 }
  0x11   :  { %26 = vsyncpa [#allocation6], 0 }
  0x12   :  { %27 = vsyncpa [#allocation4], 0 }
  0x13   :  { %29 = vsyncpa [#allocation4 + $0x1], 0  ;;  %s15483_s27 = smov 0   ;;  %s15485_s28 = smov 0  }
  0x14   :  { %s15487_s29 = smov 0   ;;  %s15489_s30 = smov 0  }
  0x15 LB: > { %16923 = sst [smem:[#allocation11_spill]] %s15358_s27  ;;  %s15504_s0 = sadd.s32 4294967295, %s15370_s30   ;;  %s15370_s30 = sphi %s15489_s30, %s16964_s30   ;;  %s15366_s29 = sphi %s15487_s29, %s16968_s29   ;;  %s15362_s28 = sphi %s15485_s28, %s16967_s28   ;;  %s15358_s27 = sphi %s15483_s27, %s16966_s27  }
  0x16   : > { %s12851_s19 = sadd.s32 4294967294, %s15370_s30   ;;  %p55_p0 = scmp.ne.s32.totalorder %s15362_s28, %s15358_s27 }
  0x17   : > { %p16891_p1 = scmp.eq.s32.totalorder %s15504_s0, 0  ;;  %p442_p3 = scmp.eq.s32.totalorder %s12851_s19, 1 }
  0x18   : > { %p12852_p5 = scmp.ge.s32.totalorder %s15370_s30, 1  ;;  %p449_p7 = scmp.lt.s32.totalorder %s15370_s30, 3 }
  0x19   : > { %p15513_p4 = por %p16891_p1, %p55_p0  ;;  %p15518_p6 = por %p442_p3, %p55_p0 }
  0x1a   : > { %p15523_p8 = pnand %p12852_p5, %p449_p7  ;;  %s15372_s22 = smov [#allocation5]  }
  0x1b   : > { %s16924_s1 = scalar_select %p15513_p4, 1, 0 }
  0x1c   : > { %s16925_s20 = scalar_select %p15518_p6, 1, 0 }
  0x1d   : > { %s16927_s21 = scalar_select %p15523_p8, 1, 0 }
  0x1e   : > { %16926 = sst [smem:[#allocation12_spill]] %s16925_s20  ;;  %s461_s2 = sshll.u32 %s15372_s22, 4  ;;  %s15527_s2 = int_to_ptr.vmem [resolvable:$true] %s461_s2 }
  0x1f   : > { %p15120_p9 = pneg %p15523_p8  ;;  %s15539_s24 = sadd.s32 1, %s15370_s30  }
  0x20   : > { %16929 = sst [smem:[#allocation13_spill]] %s15539_s24  ;;  %s42_s25 = sadd.s32 1, %s15366_s29 }
  0x21   : > { %p15534_p11 = pnand %p15120_p9, %p16891_p1  ;;  %s39_s26 = ssub.s32 %s15370_s30, %s15539_s24 }
  0x22   : > { %s16930_s27 = sld [smem:[#allocation15_spill]] }
  0x23   : > { %p15244_p13 = pneg %p15534_p11 }
  0x28   : > { %s16931_s18 = smov %s16930_s27  ;;  %s15242_s22 = scalar_lea.hbm %s16930_s27, 256 }
  0x29   : > { %p15243_p12 = scmp.ne.s32.totalorder %s16931_s18, %s15242_s22  ;;  %p15249_p5 = scmp.lt.u32.totalorder %s15242_s22, %s16931_s18 }
  0x2b   : > { %p15245_p0 = pnand %p15244_p13, %p15243_p12 }
  0x2d   : > { %p15246_p3 = pneg %p15245_p0 }
  0x2f   : > { %p15251_p7 = pnand %p15249_p5, %p15246_p3 }
  0x31   : > { %15254 = shalt.err (!%p15251_p7)
}
  0x32   : > { %s15255_s24 = scalar_lea.vmem %s15527_s2, 256  ;;  %p15263_p2 = scmp.lt.s32.totalorder %s15527_s2, %s15527_s2 }
  0x33   : > { %p15256_p9 = scmp.ne.s32.totalorder %s15527_s2, %s15255_s24  ;;  %p15264_p6 = scmp.lt.s32.totalorder %s15255_s24, %s15255_s24 }
  0x35   : > { %p15258_p10 = pnand %p15256_p9, %p15244_p13  ;;  %p15265_p4 = por %p15264_p6, %p15263_p2 }
  0x37   : > { %p15259_p1 = pneg %p15258_p10 }
  0x39   : > { %p15266_p8 = pnand %p15265_p4, %p15259_p1 }
  0x3b   : > { %15269 = shalt.err (!%p15266_p8)
}
  0x3c   : > { %s15373_s16 = smov 128   ;;  %s15374_s13 = smov 8  }
  0x3d   : > { %15123 = dma.hbm_to_vmem [thread:$0]  (!%p15534_p11), %s16931_s18, 256, %s15527_s2, [#allocation6], %s15373_s16, %s15373_s16, %s15374_s13  }
  0x3e   : > { %p40_p2 = scmp.eq.s32.totalorder %s39_s26, 0  ;;  %p49_p1 = scmp.ne.s32.totalorder %s15366_s29, %s15362_s28 }
  0x3f   : > { %p50_p4 = scmp.eq.s32.totalorder %s15370_s30, 0  ;;  %p15133_p6 = scmp.lt.s32.totalorder %s15370_s30, 2 }
  0x40   : > { %s15570_s27 = scalar_select %p40_p2, %s15366_s29, %s42_s25  }
  0x41   : > { %p51_p8 = por %p50_p4, %p49_p1  ;;  %p16932_p10 = scmp.eq.s32.totalorder %s15504_s0, 1 }
  0x42   : > { %s523_s24 = sand.u32 1, %s15366_s29   ;;  %s12856_s19 = sshll.u32 %s15370_s30, 7 }
  0x43   : > { %p15574_p12 = por %p16932_p10, %p49_p1  ;;  %s12855_s22 = sshll.u32 %s523_s24, 3 }
  0x44   : > { %s16934_s11 = sld [smem:[#allocation14_spill]]  ;;  %s527_s2 = scalar_lea.vmem [#allocation2], %s12855_s22 }
  0x45   : > { %s534_s25 = sshll.u32 %s527_s2, 4  ;;  %p15585_p11 = pnand %p15133_p6, %p51_p8  ;;  %s15589_s25 = int_to_ptr.vmem [resolvable:$true] %s534_s25 }
  0x46   : > { %s524_s16 = scalar_lea.sflag [#allocation3], %s523_s24 }
  0x47   : > { %p15272_p0 = pneg %p15585_p11 }
  0x4a   : > { %s15583_s15 = scalar_lea.hbm %s16934_s11, %s12856_s19  ;;  %s15275_s19 = scalar_lea.hbm %s16934_s11, 256 }
  0x4b   : > { %s15270_s13 = scalar_lea.hbm %s15583_s15, 128  ;;  %p15276_p7 = scmp.lt.u32.totalorder %s15583_s15, %s16934_s11 }
  0x4c   : > { %p15271_p13 = scmp.ne.s32.totalorder %s15583_s15, %s15270_s13  ;;  %p15277_p9 = scmp.lt.u32.totalorder %s15275_s19, %s15270_s13 }
  0x4d   : > { %p15279_p1 = scmp.lt.u32.totalorder %s15270_s13, %s15583_s15 }
  0x4e   : > { %p15273_p3 = pnand %p15272_p0, %p15271_p13  ;;  %p15278_p2 = por %p15277_p9, %p15276_p7 }
  0x50   : > { %p15274_p5 = pneg %p15273_p3  ;;  %p15280_p4 = por %p15279_p1, %p15278_p2 }
  0x52   : > { %p15281_p6 = pnand %p15280_p4, %p15274_p5 }
  0x54   : > { %15284 = shalt.err (!%p15281_p6)
}
  0x55   : > { %s15285_s24 = scalar_lea.vmem %s15589_s25, 128  ;;  %s15375_s2 = smov [#allocation2]  }
  0x56   : > { %p15286_p8 = scmp.ne.s32.totalorder %s15589_s25, %s15285_s24  ;;  %s15290_s14 = sshll.u32 %s15375_s2, 4  ;;  %s15291_s14 = int_to_ptr.vmem [resolvable:$false] %s15290_s14 }
  0x57   : > { %s15292_s17 = scalar_lea.vmem %s15291_s14, 256  ;;  %p15293_p3 = scmp.lt.s32.totalorder %s15589_s25, %s15291_s14 }
  0x58   : > { %p15288_p10 = pnand %p15286_p8, %p15272_p0  ;;  %p15294_p7 = scmp.lt.s32.totalorder %s15292_s17, %s15285_s24 }
  0x5a   : > { %p15289_p13 = pneg %p15288_p10  ;;  %p15295_p9 = por %p15294_p7, %p15293_p3 }
  0x5c   : > { %p15296_p2 = pnand %p15295_p9, %p15289_p13 }
  0x5e   : > { %15299 = shalt.err (!%p15296_p2)
}
  0x5f   : > { %15127 = dma.hbm_to_vmem [thread:$0]  (!%p15585_p11), %s15583_s15, 128, %s15589_s25, %s524_s16  }
  0x60   : > { %p16936_p5 = scmp.ne.s32.totalorder %s16927_s21, 0 }
  0x61   : > { %s15619_s13 = sand.u32 (!%p16936_p5), 1, %s15362_s28   ;;  %p16937_p0 = scmp.ne.s32.totalorder (!%p16936_p5), %s16924_s1, 0 }
  0x62   : > { %543 = sbr.rel (%p16936_p5) target bundleno = 6965 (0x1b35), region = 92  ;;  %s16896_s19 = sshll.u32 (!%p16936_p5), %s15619_s13, 3 }
  0x63   : > { %s546_s22 = scalar_lea.sflag (!%p16936_p5), [#allocation3], %s15619_s13  ;;  %s549_s23 = scalar_lea.vmem (!%p16936_p5), [#allocation2], %s16896_s19 }
  0x69   : > { %15345 = dma.done.wait (%p16937_p0), %s546_s22, 128  }
  0x6a   : > { %15347 = vsyncadd (%p16937_p0), %s546_s22, 4294967168  ;;  %p16938_p11 = scmp.eq.s32.totalorder %s15504_s0, 0 }
  0x6c   : > { %15349 = dma.done.wait (%p16938_p11), [#allocation6], 256   ;;  %p16939_p1 = pmov %p16938_p11 }
  0x6d   : > { %v15376_v0 = vmov 0.0|0.0   ;;  %vm15377_vm0 = vmmov 0   ;;  %v15378_v1 = vmov 0.0   ;;  %vm616_vm1 = vcmask 130048   ;;  %v607_v2 = vld [vmem:[#allocation5] sm:$0xff]  ;;  %v608_v3 = vld [vmem:[#allocation5 + $0x8] sm:$0xff] }
  0x6e   : > { %15351 = vsyncadd (%p16939_p1), [#allocation6], 4294967040  ;;  %14520 = vmatprep.subr.bf16.mxu0 %v15376_v0  ;;  %13378 = vmatprep.mubr.msk.f32.mxu0 %vm15377_vm0, %v15378_v1  ;;  %v606_v4 = vld [vmem:[%s549_s23] sm:$0xff]  ;;  %v621_v5 = vand.u32 4294901760, %v607_v2  ;;  %v624_v6 = vand.u32 4294901760, %v608_v3  ;;  %s16940_s15 = sld [smem:[#allocation16_spill]] }
  0x6f   : > { %14538 = vmatprep.subr.bf16.mxu1 %v15376_v0  ;;  %13424 = vmatprep.mubr.msk.f32.mxu1 %vm15377_vm0, %v15378_v1  ;;  %v618_v7 = vsel %vm616_vm1, %v606_v4, 0  ;;  %vm1081_vm2 = vcmask 261120   ;;  %s16941_s4 = sld [smem:[#allocation18_spill]]  ;;  %s16942_s5 = sld [smem:[#allocation19_spill]]  ;;  %vm1650_vm3 = vcmask 64512   ;;  %vm5335_vm4 = vcmask 195584  }
  0x70   : > { %v687_v8 = vand.u32 4294901760, %v618_v7  ;;  %v14521_v9 = vpack.c.bf16 %v624_v6, %v621_v5  ;;  %v699_v10 = vsub.f32 %v607_v2, %v621_v5  ;;  %v706_v11 = vsub.f32 %v608_v3, %v624_v6  ;;  %s16943_s3 = sld [smem:[#allocation17_spill]]  ;;  %s16944_s6 = sld [smem:[#allocation20_spill]] }
  0x71   : > { %s15379_s2 = smov 96   ;;  %s16906_s14 = smov 120   ;;  %vm6402_vm6 = vcmask 523264  }
  0x72   : > { %v688_v12 = vsub.f32 %v618_v7, %v687_v8  ;;  %14522 = vmatpush3.bf16.msra.mxu0 %v14521_v9  ;;  %v700_v13 = vand.u32 4294901760, %v699_v10  ;;  %v707_v14 = vand.u32 4294901760, %v706_v11  ;;  %v14527_v23 = vpack.c.bf16 %v706_v11, %v699_v10  ;;  %s16904_s17 = smov 112   ;;  %s16902_s22 = smov 104  }
  0x73   : > { %14523 = vmatprep.subr.bf16.mxu0 %v15376_v0  ;;  %s16897_s23 = smov 64   ;;  %s16901_s1 = smov 8  }
  0x74   : > { %v689_v15 = vand.u32 4294901760, %v688_v12  ;;  %v701_v16 = vsub.f32 %v699_v10, %v700_v13  ;;  %v708_v17 = vsub.f32 %v706_v11, %v707_v14  ;;  %v14533_v24 = vpack.c.bf16 %v707_v14, %v700_v13  ;;  %v12861_v25 = vld [vmem:[%s16940_s15] ss:$0 sm:$0xff]  ;;  %s16899_s19 = smov 24   ;;  %s16945_s16 = sld [smem:[#allocation21_spill]] }
  0x75   : > { %v12862_v39 = vld [vmem:[%s16941_s4] ss:$0 sm:$0xff]  ;;  %s16946_s15 = sld [smem:[#allocation23_spill]]  ;;  %s16949_s25 = sld [smem:[#allocation25_spill]] }
  0x76   : > { %v690_v18 = vsub.f32 %v688_v12, %v689_v15  ;;  %v702_v19 = vand.u32 4294901760, %v701_v16  ;;  %v709_v20 = vand.u32 4294901760, %v708_v17  ;;  %v12863_v41 = vld [vmem:[%s16942_s5] ss:$0 sm:$0xff]  ;;  %v1136_v53 = vld [vmem:[%s16944_s6 + $0x8] sm:$0xff]  ;;  %v1137_v54 = vld [vmem:[%s16944_s6 + $0x10] sm:$0xff] }
  0x77   : > { %v1110_v43 = vld [vmem:[%s16943_s3] sm:$0xff]  ;;  %v1152_v56 = vand.u32 4294901760, %v1136_v53  ;;  %v1138_v57 = vld [vmem:[%s16944_s6 + $0x18] sm:$0xff]  ;;  %v1155_v58 = vand.u32 4294901760, %v1137_v54  ;;  %s16950_s21 = sld [smem:[#allocation26_spill]]  ;;  %s16953_s26 = smov 104  }
  0x78   : > { %v691_v21 = vand.u32 4294901760, %v690_v18  ;;  %v14524_v22 = vpack.c.bf16 %v709_v20, %v702_v19  ;;  %v1135_v52 = vld [vmem:[%s16944_s6] sm:$0xff]  ;;  %v1158_v59 = vand.u32 4294901760, %v1138_v57  ;;  %s12873_s3 = sshll.u32 %s15504_s0, 7  ;;  %s16959_s5 = sld [smem:[#allocation27_spill]] }
  0x79   : > { %v1149_v55 = vand.u32 4294901760, %v1135_v52  ;;  %v1236_v62 = vsub.f32 %v1136_v53, %v1152_v56  ;;  %v1243_v63 = vsub.f32 %v1137_v54, %v1155_v58  ;;  %s12758_s0 = scalar_lea.sflag [#allocation4], %s15619_s13 }
  0x7a   : > { %13379 = vmatmul.mubr.f32.vlgmr.msra.gmra.mrb[0].mxu0 %v691_v21  ;;  %v1250_v2 = vsub.f32 %v1138_v57, %v1158_v59  ;;  %v15689_v3 = vpack.c.bf16 %v1158_v59, %v1155_v58 }
  0x7b   : > { %14525 = vmatpush3.bf16.msra.mxu0 %v14524_v22  ;;  %13385 = vmatprep.mubr.msk.f32.mxu0 %vm15377_vm0, %v15378_v1  ;;  %v15686_v60 = vpack.c.bf16 %v1152_v56, %v1149_v55  ;;  %v1229_v61 = vsub.f32 %v1135_v52, %v1149_v55  ;;  %v1237_v5 = vand.u32 4294901760, %v1236_v62  ;;  %v1244_v10 = vand.u32 4294901760, %v1243_v63 }
  0x7c   : > { %14526 = vmatprep.subr.bf16.mxu0 %v15376_v0  ;;  %v1251_v11 = vand.u32 4294901760, %v1250_v2  ;;  %v14554_v19 = vpack.c.bf16 %v1250_v2, %v1243_v63 }
  0x7d   : > { %14540 = vmatpush3.bf16.msra.mxu1 %v15686_v60  ;;  %v1230_v4 = vand.u32 4294901760, %v1229_v61  ;;  %v1238_v7 = vsub.f32 %v1236_v62, %v1237_v5  ;;  %v1245_v13 = vsub.f32 %v1243_v63, %v1244_v10  ;;  %v14551_v18 = vpack.c.bf16 %v1236_v62, %v1229_v61 }
  0x7e   : > { %14541 = vmatprep.subr.bf16.mxu1 %v15376_v0  ;;  %v1252_v14 = vsub.f32 %v1250_v2, %v1251_v11  ;;  %v14566_v21 = vpack.c.bf16 %v1251_v11, %v1244_v10 }
  0x7f   : > { %v1231_v6 = vsub.f32 %v1229_v61, %v1230_v4  ;;  %v14563_v20 = vpack.c.bf16 %v1237_v5, %v1230_v4 }
  0x80   : > { %v1253_v16 = vand.u32 4294901760, %v1252_v14 }
  0x81   : > { %14543 = vmatpush3.bf16.msra.mxu1 %v15689_v3 }
  0x82   : > { %13386 = vmatmul.mubr.f32.vlgmr.msra.gmra.mrb[0].mxu0 %v687_v8  ;;  %14544 = vmatprep.subr.bf16.mxu1 %v15376_v0 }
  0x83   : > { %14528 = vmatpush3.bf16.msra.mxu0 %v14527_v23  ;;  %13392 = vmatprep.mubr.msk.f32.mxu0 %vm15377_vm0, %v15378_v1 }
  0x84   : > { %14529 = vmatprep.subr.bf16.mxu0 %v15376_v0 }
  0x8a   : > { %13393 = vmatmul.mubr.f32.vlgmr.msra.gmra.mrb[0].mxu0 %v688_v12 }
  0x8b   : > { %14531 = vmatpush3.bf16.msra.mxu0 %v14521_v9  ;;  %13399 = vmatprep.mubr.msk.f32.mxu0 %vm15377_vm0, %v15378_v1 }
  0x8c   : > { %14532 = vmatprep.subr.bf16.mxu0 %v15376_v0 }
  0x92   : > { %13400 = vmatmul.mubr.f32.vlgmr.msra.gmra.mrb[0].mxu0 %v689_v15  ;;  %v1246_v15 = vand.u32 4294901760, %v1245_v13 }
  0x93   : > { %14534 = vmatpush3.bf16.msra.mxu0 %v14533_v24  ;;  %13406 = vmatprep.mubr.msk.f32.mxu0 %vm15377_vm0, %v15378_v1 }
  0x94   : > { %14535 = vmatprep.subr.bf16.mxu0 %v15376_v0  ;;  %v14548_v17 = vpack.c.bf16 %v1253_v16, %v1246_v15 }
  0x9a   : > { %13407 = vmatmul.mubr.f32.vlgmr.msra.gmra.mrb[0].mxu0 %v687_v8 }
  0x9b   : > { %14537 = vmatpush3.bf16.msra.mxu0 %v14521_v9  ;;  %13413 = vmatprep.mubr.msk.f32.mxu0 %vm15377_vm0, %v15378_v1  ;;  %v1239_v9 = vand.u32 4294901760, %v1238_v7 }
  0x9c   : > { %13482 = vmatprep.subr.mxu0 %v15378_v1 }
  0xa2   : > { %13414 = vmatmul.mubr.f32.vlgmr.msra.gmra.mrb[0].mxu0 %v687_v8  ;;  %v1232_v8 = vand.u32 4294901760, %v1231_v6 }
  0xa3   : > { %13484 = vmatprep.mubr.msk.f32.mxu0 %vm15377_vm0, %v15378_v1 }
  0xa4   : > { %v14545_v12 = vpack.c.bf16 %v1239_v9, %v1232_v8 }
 0x175   : > { %v1075_v26 = vpop.f32.mrb[0].mxu0 }
 0x176   : > { %v14898_v27 = vadd.f32 %v12861_v25, %v1075_v26  ;;  %v13415_v28 = vpop.f32.mrb[1].mxu0 }
 0x178   : > { %v1082_v29 = vsel %vm1081_vm2, %v14898_v27, 0.0 }
 0x179   : > { %1083 = vadd.xlane.f32.xlu0 %v1082_v29 }
 0x206   : > { %v1084_v30 = vpop.xlane.xlu0 %1083 }
 0x207   : > { %v1086_v31 = vmul.f32 0.03125, %v1084_v30 }
 0x209   : > { %v1087_v32 = vsub.f32 %v14898_v27, %v1086_v31 }
 0x20b   : > { %v1088_v33 = vmul.f32 %v1087_v32, %v1087_v32 }
 0x20d   : > { %v1089_v34 = vsel %vm1081_vm2, %v1088_v33, 0.0 }
 0x20e   : > { %1090 = vadd.xlane.f32.xlu0 %v1089_v34 }
 0x29b   : > { %v1091_v35 = vpop.xlane.xlu0 %1090 }
 0x29c   : > { %v1092_v36 = vmul.f32 0.03125, %v1091_v35  ;;  %v12864_v35 = vld [vmem:[%s16868_s7] ss:$0 sm:$0xff] }
 0x29e   : > { %v1093_v37 = vadd.f32 1e-12, %v1092_v36 }
 0x2a0   : > { %15182 = vrsqrt.f32 %v1093_v37 }
 0x2aa   : > { %v15183_v38 = vpop.eup %15182 }
 0x2ab   : > { %v1095_v40 = vmul.f32 %v15183_v38, %v1087_v32 }
 0x2ad   : > { %v1102_v42 = vmul.f32 %v12862_v39, %v1095_v40 }
 0x2af   : > { %v1109_v44 = vadd.f32 %v12863_v41, %v1102_v42 }
 0x2b1   : > { %v1111_v45 = vadd.f32 %v1110_v43, %v1109_v44 }
 0x2b3   : > { %v1112_v46 = vsel %vm1081_vm2, %v1111_v45, 0.0 }
 0x2b4   : > { %1113 = vadd.xlane.f32.xlu1 %v1112_v46 }
 0x341   : > { %v1114_v47 = vpop.xlane.xlu1 %1113 }
 0x342   : > { %v1115_v48 = vmul.f32 0.03125, %v1114_v47 }
 0x344   : > { %v1116_v49 = vsub.f32 %v1111_v45, %v1115_v48 }
 0x346   : > { %v1117_v50 = vmul.f32 %v1116_v49, %v1116_v49 }
 0x348   : > { %v1118_v51 = vsel %vm1081_vm2, %v1117_v50, 0.0 }
 0x349   : > { %1119 = vadd.xlane.f32.xlu1 %v1118_v51 }
 0x3d6   : > { %v1120_v22 = vpop.xlane.xlu1 %1119 }
 0x3d7   : > { %v1121_v23 = vmul.f32 0.03125, %v1120_v22 }
 0x3d9   : > { %v1122_v24 = vadd.f32 1e-12, %v1121_v23 }
 0x3db   : > { %15184 = vrsqrt.f32 %v1122_v24 }
 0x3e5   : > { %v15185_v25 = vpop.eup %15184 }
 0x3e6   : > { %v1124_v26 = vmul.f32 %v15185_v25, %v1116_v49 }
 0x3e8   : > { %v1125_v27 = vmul.f32 %v12862_v39, %v1124_v26 }
 0x3ea   : > { %v1126_v28 = vadd.f32 %v12863_v41, %v1125_v27 }
 0x3ec   : > { %v1146_v29 = vsel %vm1081_vm2, %v1126_v28, 0 }
 0x3ed   : > { %v1217_v30 = vand.u32 4294901760, %v1146_v29 }
 0x3ef   : > { %v1218_v31 = vsub.f32 %v1146_v29, %v1217_v30 }
 0x3f1   : > { %v1219_v32 = vand.u32 4294901760, %v1218_v31 }
 0x3f3   : > { %v1220_v33 = vsub.f32 %v1218_v31, %v1219_v32 }
 0x3f5   : > { %v1221_v34 = vand.u32 4294901760, %v1220_v33 }
 0x3f7   : > { %13425 = vmatmul.mubr.f32.vlgmr.msra.gmra.mrb[0].mxu1 %v1221_v34 }
 0x3f8   : > { %14546 = vmatpush3.bf16.msra.mxu1 %v14545_v12  ;;  %13435 = vmatprep.mubr.msk.f32.mxu1 %vm15377_vm0, %v15378_v1 }
 0x3f9   : > { %14547 = vmatprep.subr.bf16.mxu1 %v15376_v0 }
 0x3fc   : > { %14549 = vmatpush3.bf16.msra.mxu1 %v14548_v17 }
 0x3fd   : > { %14550 = vmatprep.subr.bf16.mxu1 %v15376_v0 }
 0x3ff   : > { %13436 = vmatmul.mubr.f32.vlgmr.msra.gmra.mrb[0].mxu1 %v1217_v30 }
 0x400   : > { %14552 = vmatpush3.bf16.msra.mxu1 %v14551_v18  ;;  %13446 = vmatprep.mubr.msk.f32.mxu1 %vm15377_vm0, %v15378_v1 }
 0x401   : > { %14553 = vmatprep.subr.bf16.mxu1 %v15376_v0 }
 0x404   : > { %14555 = vmatpush3.bf16.msra.mxu1 %v14554_v19 }
 0x405   : > { %14556 = vmatprep.subr.bf16.mxu1 %v15376_v0 }
 0x407   : > { %13447 = vmatmul.mubr.f32.vlgmr.msra.gmra.mrb[0].mxu1 %v1218_v31 }
 0x408   : > { %14558 = vmatpush3.bf16.msra.mxu1 %v15686_v60  ;;  %13457 = vmatprep.mubr.msk.f32.mxu1 %vm15377_vm0, %v15378_v1 }
 0x409   : > { %14559 = vmatprep.subr.bf16.mxu1 %v15376_v0 }
 0x40c   : > { %14561 = vmatpush3.bf16.msra.mxu1 %v15689_v3 }
 0x40d   : > { %14562 = vmatprep.subr.bf16.mxu1 %v15376_v0 }
 0x40f   : > { %13458 = vmatmul.mubr.f32.vlgmr.msra.gmra.mrb[0].mxu1 %v1219_v32 }
 0x410   : > { %14564 = vmatpush3.bf16.msra.mxu1 %v14563_v20  ;;  %13468 = vmatprep.mubr.msk.f32.mxu1 %vm15377_vm0, %v15378_v1 }
 0x411   : > { %14565 = vmatprep.subr.bf16.mxu1 %v15376_v0 }
 0x414   : > { %14567 = vmatpush3.bf16.msra.mxu1 %v14566_v21 }
 0x415   : > { %14568 = vmatprep.subr.bf16.mxu1 %v15376_v0 }
 0x417   : > { %13469 = vmatmul.mubr.f32.vlgmr.msra.gmra.mrb[0].mxu1 %v1217_v30 }
 0x418   : > { %14570 = vmatpush3.bf16.msra.mxu1 %v15686_v60  ;;  %13479 = vmatprep.mubr.msk.f32.mxu1 %vm15377_vm0, %v15378_v1 }
 0x419   : > { %14571 = vmatprep.subr.bf16.mxu1 %v15376_v0 }
 0x41c   : > { %14573 = vmatpush3.bf16.msra.mxu1 %v15689_v3 }
 0x41d   : > { %13547 = vmatprep.subr.mxu1 %v15378_v1 }
 0x41f   : > { %13480 = vmatmul.mubr.f32.vlgmr.msra.gmra.mrb[0].mxu1 %v1217_v30 }
 0x420   : > { %13549 = vmatprep.mubr.msk.f32.mxu1 %vm15377_vm0, %v15378_v1 }
 0x4f2   : > { %v1629_v36 = vpop.f32.mrb[0].mxu1 }
 0x4f3   : > { %v15724_v37 = vadd.f32 %v12864_v35, %v1629_v36  ;;  %v13481_v38 = vpop.f32.mrb[1].mxu1 }
 0x4f5   : > { %1648 = vrot.lane.b32.xlu1 %v15724_v37, %s15379_s2  ;;  %1642 = vrot.lane.b32.xlu0 %v15724_v37, %s16906_s14  ;;  %v1633_v39 = vmul.f32 0.35355338, %v15724_v37 }
 0x4f7   : > { %v1651_v40 = vsel %vm1650_vm3, %v1633_v39, 0 }
 0x4f8   : > { %v1721_v41 = vand.u32 4294901760, %v1651_v40 }
 0x4f9   : > { %1644 = vrot.lane.b32.xlu1 %v15724_v37, %s16904_s17  ;;  %1635 = vrot.lane.b32.xlu0 %v1633_v39, %s16906_s14  ;;  %s16951_s14 = smov 120  }
 0x4fa   : > { %v1722_v42 = vsub.f32 %v1651_v40, %v1721_v41 }
 0x4fc   : > { %v1723_v43 = vand.u32 4294901760, %v1722_v42 }
 0x4fd   : > { %1646 = vrot.lane.b32.xlu1 %v15724_v37, %s16902_s22  ;;  %1637 = vrot.lane.b32.xlu0 %v1633_v39, %s16904_s17  ;;  %s16952_s17 = smov 112  }
 0x4fe   : > { %v1724_v47 = vsub.f32 %v1722_v42, %v1723_v43 }
 0x500   : > { %v1725_v51 = vand.u32 4294901760, %v1724_v47 }
 0x567   : > { %v1649_v44 = vpop.permute.xlu1 %1648  ;;  %v15738_v45 = vpop.permute.xlu0 %1642 }
 0x568   : > { %v1653_v46 = vsel %vm1650_vm3, %v1649_v44, 0  ;;  %2101 = vrot.lane.b32.xlu1 %v15738_v45, %s15379_s2 }
 0x569   : > { %v1656_v48 = vand.u32 4294901760, %v1653_v46 }
 0x56b   : > { %v1733_v49 = vsub.f32 %v1653_v46, %v1656_v48  ;;  %13483 = vmatpush3.xpose.msra.mxu0 %v1656_v48  ;;  %v15743_v50 = vpop.permute.xlu1 %1644  ;;  %v1636_v56 = vpop.permute.xlu0 %1635 }
 0x56c   : > { %1639 = vrot.lane.b32.xlu1 %v1633_v39, %s16902_s22  ;;  %2553 = vrot.lane.b32.xlu0 %v15743_v50, %s15379_s2  ;;  %v2103_v57 = vsel %vm1650_vm3, %v1636_v56, 0  ;;  %s15387_s22 = smov [#allocation7]  }
 0x56d   : > { %v1734_v52 = vand.u32 4294901760, %v1733_v49  ;;  %13487 = vmatprep.subr.mxu0 %v15378_v1  ;;  %v15771_v58 = vand.u32 4294901760, %v2103_v57 }
 0x56e   : > { %13485 = vmatmul.mubr.f32.vlgmr.msra.gmra.mrb[2].mxu0 %v1725_v51 }
 0x56f   : > { %v1735_v53 = vsub.f32 %v1733_v49, %v1734_v52  ;;  %v15749_v54 = vpop.permute.xlu1 %1646  ;;  %13489 = vmatprep.mubr.msk.f32.mxu0 %vm15377_vm0, %v15378_v1  ;;  %v2174_v59 = vsub.f32 %v2103_v57, %v15771_v58  ;;  %v1638_v61 = vpop.permute.xlu0 %1637 }
 0x570   : > { %3005 = vrot.lane.b32.xlu1 %v15749_v54, %s15379_s2  ;;  %v2555_v15 = vsel %vm1650_vm3, %v1638_v61, 0 }
 0x571   : > { %v1736_v55 = vand.u32 4294901760, %v1735_v53  ;;  %v2175_v60 = vand.u32 4294901760, %v2174_v59  ;;  %v2625_v17 = vand.u32 4294901760, %v2555_v15 }
 0x573   : > { %13488 = vmatpush3.xpose.msra.mxu0 %v1736_v55  ;;  %v2176_v63 = vsub.f32 %v2174_v59, %v2175_v60  ;;  %v2626_v18 = vsub.f32 %v2555_v15, %v2625_v17 }
 0x574   : > { %13492 = vmatprep.subr.mxu0 %v15378_v1 }
 0x575   : > { %v2177_v6 = vand.u32 4294901760, %v2176_v63  ;;  %v2627_v21 = vand.u32 4294901760, %v2626_v18 }
 0x576   : > { %13490 = vmatmul.mubr.f32.vlgmr.msra.gmra.mrb[2].mxu0 %v1721_v41 }
 0x577   : > { %13493 = vmatpush3.xpose.msra.mxu0 %v1733_v49  ;;  %13494 = vmatprep.mubr.msk.f32.mxu0 %vm15377_vm0, %v15378_v1  ;;  %v2628_v28 = vsub.f32 %v2626_v18, %v2627_v21 }
 0x578   : > { %13497 = vmatprep.subr.mxu0 %v15378_v1 }
 0x579   : > { %v2629_v31 = vand.u32 4294901760, %v2628_v28 }
 0x57e   : > { %13495 = vmatmul.mubr.f32.vlgmr.msra.gmra.mrb[2].mxu0 %v1722_v42 }
 0x57f   : > { %13498 = vmatpush3.xpose.msra.mxu0 %v1656_v48  ;;  %13499 = vmatprep.mubr.msk.f32.mxu0 %vm15377_vm0, %v15378_v1 }
 0x580   : > { %13502 = vmatprep.subr.mxu0 %v15378_v1 }
 0x586   : > { %13500 = vmatmul.mubr.f32.vlgmr.msra.gmra.mrb[2].mxu0 %v1723_v43 }
 0x587   : > { %13503 = vmatpush3.xpose.msra.mxu0 %v1734_v52  ;;  %13504 = vmatprep.mubr.msk.f32.mxu0 %vm15377_vm0, %v15378_v1 }
 0x588   : > { %13507 = vmatprep.subr.mxu0 %v15378_v1 }
 0x58e   : > { %13505 = vmatmul.mubr.f32.vlgmr.msra.gmra.mrb[2].mxu0 %v1721_v41 }
 0x58f   : > { %13508 = vmatpush3.xpose.msra.mxu0 %v1656_v48  ;;  %13509 = vmatprep.mubr.msk.f32.mxu0 %vm15377_vm0, %v15378_v1 }
 0x590   : > { %13512 = vmatprep.subr.mxu0 %v15378_v1 }
 0x596   : > { %13510 = vmatmul.mubr.f32.vlgmr.msra.gmra.mrb[2].mxu0 %v1721_v41 }
 0x597   : > { %13514 = vmatprep.mubr.msk.f32.mxu0 %vm15377_vm0, %v15378_v1 }
 0x5da   : > { %v2102_v62 = vpop.permute.xlu1 %2101 }
 0x5db   : > { %v2105_v2 = vsel %vm1650_vm3, %v2102_v62, 0 }
 0x5dc   : > { %v2108_v3 = vand.u32 4294901760, %v2105_v2 }
 0x5de   : > { %v2185_v4 = vsub.f32 %v2105_v2, %v2108_v3  ;;  %v2554_v5 = vpop.permute.xlu0 %2553  ;;  %13513 = vmatpush3.xpose.msra.mxu0 %v2108_v3  ;;  %v1640_v19 = vpop.permute.xlu1 %1639 }
 0x5df   : > { %v2557_v7 = vsel %vm1650_vm3, %v2554_v5, 0  ;;  %13517 = vmatprep.subr.mxu0 %v15378_v1  ;;  %v3007_v22 = vsel %vm1650_vm3, %v1640_v19, 0 }
 0x5e0   : > { %v2186_v8 = vand.u32 4294901760, %v2185_v4  ;;  %v2560_v9 = vand.u32 4294901760, %v2557_v7  ;;  %v3077_v24 = vand.u32 4294901760, %v3007_v22 }
 0x5e1   : > { %13515 = vmatmul.mubr.f32.vlgmr.msra.gmra.mrb[4].mxu0 %v2177_v6 }
 0x5e2   : > { %v2187_v10 = vsub.f32 %v2185_v4, %v2186_v8  ;;  %v2637_v11 = vsub.f32 %v2557_v7, %v2560_v9  ;;  %13519 = vmatprep.mubr.msk.f32.mxu0 %vm15377_vm0, %v15378_v1  ;;  %v3006_v20 = vpop.permute.xlu1 %3005  ;;  %v3078_v26 = vsub.f32 %v3007_v22, %v3077_v24 }
 0x5e3   : > { %v3009_v23 = vsel %vm1650_vm3, %v3006_v20, 0 }
 0x5e4   : > { %v2188_v12 = vand.u32 4294901760, %v2187_v10  ;;  %v2638_v13 = vand.u32 4294901760, %v2637_v11  ;;  %v3012_v25 = vand.u32 4294901760, %v3009_v23  ;;  %v3079_v29 = vand.u32 4294901760, %v3078_v26 }
 0x5e6   : > { %v2639_v14 = vsub.f32 %v2637_v11, %v2638_v13  ;;  %13518 = vmatpush3.xpose.msra.mxu0 %v2188_v12  ;;  %v3089_v27 = vsub.f32 %v3009_v23, %v3012_v25  ;;  %v3080_v32 = vsub.f32 %v3078_v26, %v3079_v29 }
 0x5e7   : > { %13522 = vmatprep.subr.mxu0 %v15378_v1 }
 0x5e8   : > { %v2640_v16 = vand.u32 4294901760, %v2639_v14  ;;  %v3090_v30 = vand.u32 4294901760, %v3089_v27  ;;  %v3081_v34 = vand.u32 4294901760, %v3080_v32 }
 0x5e9   : > { %13520 = vmatmul.mubr.f32.vlgmr.msra.gmra.mrb[4].mxu0 %v15771_v58 }
 0x5ea   : > { %13523 = vmatpush3.xpose.msra.mxu0 %v2185_v4  ;;  %13548 = vmatpush3.xpose.msra.mxu1 %v2640_v16  ;;  %v3091_v33 = vsub.f32 %v3089_v27, %v3090_v30 }
 0x5eb   : > { %13552 = vmatprep.subr.mxu1 %v15378_v1  ;;  %13524 = vmatprep.mubr.msk.f32.mxu0 %vm15377_vm0, %v15378_v1 }
 0x5ec   : > { %13527 = vmatprep.subr.mxu0 %v15378_v1  ;;  %v3092_v35 = vand.u32 4294901760, %v3091_v33 }
 0x5ed   : > { %13550 = vmatmul.mubr.f32.vlgmr.msra.gmra.mrb[2].mxu1 %v2625_v17 }
 0x5ee   : > { %13553 = vmatpush3.xpose.msra.mxu1 %v2637_v11  ;;  %13554 = vmatprep.mubr.msk.f32.mxu1 %vm15377_vm0, %v15378_v1 }
 0x5ef   : > { %13557 = vmatprep.subr.mxu1 %v15378_v1 }
 0x5f1   : > { %13525 = vmatmul.mubr.f32.vlgmr.msra.gmra.mrb[4].mxu0 %v2174_v59 }
 0x5f2   : > { %13528 = vmatpush3.xpose.msra.mxu0 %v2108_v3  ;;  %13529 = vmatprep.mubr.msk.f32.mxu0 %vm15377_vm0, %v15378_v1 }
 0x5f3   : > { %13532 = vmatprep.subr.mxu0 %v15378_v1 }
 0x5f5   : > { %13555 = vmatmul.mubr.f32.vlgmr.msra.gmra.mrb[2].mxu1 %v2626_v18 }
 0x5f6   : > { %13558 = vmatpush3.xpose.msra.mxu1 %v2560_v9  ;;  %13559 = vmatprep.mubr.msk.f32.mxu1 %vm15377_vm0, %v15378_v1 }
 0x5f7   : > { %13562 = vmatprep.subr.mxu1 %v15378_v1 }
 0x5f9   : > { %13530 = vmatmul.mubr.f32.vlgmr.msra.gmra.mrb[4].mxu0 %v2175_v60 }
 0x5fa   : > { %13533 = vmatpush3.xpose.msra.mxu0 %v2186_v8  ;;  %13534 = vmatprep.mubr.msk.f32.mxu0 %vm15377_vm0, %v15378_v1 }
 0x5fb   : > { %13537 = vmatprep.subr.mxu0 %v15378_v1 }
 0x5fd   : > { %13560 = vmatmul.mubr.f32.vlgmr.msra.gmra.mrb[2].mxu1 %v2627_v21 }
 0x5fe   : > { %13563 = vmatpush3.xpose.msra.mxu1 %v2638_v13  ;;  %13564 = vmatprep.mubr.msk.f32.mxu1 %vm15377_vm0, %v15378_v1 }
 0x5ff   : > { %13567 = vmatprep.subr.mxu1 %v15378_v1 }
 0x601   : > { %13535 = vmatmul.mubr.f32.vlgmr.msra.gmra.mrb[4].mxu0 %v15771_v58 }
 0x602   : > { %13538 = vmatpush3.xpose.msra.mxu0 %v2108_v3  ;;  %13539 = vmatprep.mubr.msk.f32.mxu0 %vm15377_vm0, %v15378_v1 }
 0x603   : > { %13542 = vmatprep.subr.mxu0 %v15378_v1 }
 0x605   : > { %13565 = vmatmul.mubr.f32.vlgmr.msra.gmra.mrb[2].mxu1 %v2625_v17 }
 0x606   : > { %13568 = vmatpush3.xpose.msra.mxu1 %v2560_v9  ;;  %13569 = vmatprep.mubr.msk.f32.mxu1 %vm15377_vm0, %v15378_v1 }
 0x607   : > { %13602 = vmatprep.subr.mxu1 %v15378_v1 }
 0x609   : > { %13540 = vmatmul.mubr.f32.vlgmr.msra.gmra.mrb[4].mxu0 %v15771_v58 }
 0x60a   : > { %13543 = vmatpush3.xpose.msra.mxu0 %v2560_v9  ;;  %13544 = vmatprep.mubr.msk.f32.mxu0 %vm15377_vm0, %v15378_v1 }
 0x60b   : > { %13572 = vmatprep.subr.mxu0 %v15378_v1 }
 0x60d   : > { %13545 = vmatmul.mubr.f32.vlgmr.msra.gmra.mrb[6].mxu0 %v2629_v31  ;;  %13570 = vmatmul.mubr.f32.vlgmr.msra.gmra.mrb[2].mxu1 %v2625_v17 }
 0x60e   : > { %13573 = vmatpush3.xpose.msra.mxu0 %v3012_v25  ;;  %13574 = vmatprep.mubr.msk.f32.mxu0 %vm15377_vm0, %v15378_v1 }
 0x60f   : > { %13577 = vmatprep.subr.mxu0 %v15378_v1  ;;  %13604 = vmatprep.mubr.msk.f32.mxu1 %vm15377_vm0, %v15378_v1 }
 0x611   : > { %13575 = vmatmul.mubr.f32.vlgmr.msra.gmra.mrb[8].mxu0 %v3081_v34 }
 0x612   : > { %13578 = vmatpush3.xpose.msra.mxu0 %v3092_v35  ;;  %13579 = vmatprep.mubr.msk.f32.mxu0 %vm15377_vm0, %v15378_v1 }
 0x613   : > { %13582 = vmatprep.subr.mxu0 %v15378_v1 }
 0x619   : > { %13580 = vmatmul.mubr.f32.vlgmr.msra.gmra.mrb[8].mxu0 %v3077_v24 }
 0x61a   : > { %13583 = vmatpush3.xpose.msra.mxu0 %v3089_v27  ;;  %13584 = vmatprep.mubr.msk.f32.mxu0 %vm15377_vm0, %v15378_v1 }
 0x61b   : > { %13587 = vmatprep.subr.mxu0 %v15378_v1 }
 0x621   : > { %13585 = vmatmul.mubr.f32.vlgmr.msra.gmra.mrb[8].mxu0 %v3078_v26 }
 0x622   : > { %13588 = vmatpush3.xpose.msra.mxu0 %v3012_v25  ;;  %13589 = vmatprep.mubr.msk.f32.mxu0 %vm15377_vm0, %v15378_v1 }
 0x623   : > { %13592 = vmatprep.subr.mxu0 %v15378_v1 }
 0x629   : > { %13590 = vmatmul.mubr.f32.vlgmr.msra.gmra.mrb[8].mxu0 %v3079_v29 }
 0x62a   : > { %13593 = vmatpush3.xpose.msra.mxu0 %v3090_v30  ;;  %13594 = vmatprep.mubr.msk.f32.mxu0 %vm15377_vm0, %v15378_v1 }
 0x62b   : > { %13597 = vmatprep.subr.mxu0 %v15378_v1 }
 0x631   : > { %13595 = vmatmul.mubr.f32.vlgmr.msra.gmra.mrb[8].mxu0 %v3077_v24 }
 0x632   : > { %13598 = vmatpush3.xpose.msra.mxu0 %v3012_v25  ;;  %13599 = vmatprep.mubr.msk.f32.mxu0 %vm15377_vm0, %v15378_v1 }
 0x633   : > { %13632 = vmatprep.subr.mxu0 %v15378_v1 }
 0x639   : > { %13600 = vmatmul.mubr.f32.vlgmr.msra.gmra.mrb[8].mxu0 %v3077_v24 }
 0x63a   : > { %13634 = vmatprep.mubr.msk.f32.mxu0 %vm15377_vm0, %v15378_v1 }
 0x669   : > { %v2097_v36 = vpop.f32.mrb[2].mxu0 }
 0x66a   : > { %v13511_v38 = vpop.f32.mrb[3].mxu0  ;;  %v3457_v39 = vsel %vm1650_vm3, %v2097_v36, -inf }
 0x66b   : > { %3458 = vmax.xlane.f32.xlu0 %v3457_v39 }
 0x6dc   : > { %v2549_v40 = vpop.f32.mrb[4].mxu0 }
 0x6dd   : > { %v13541_v41 = vpop.f32.mrb[5].mxu0  ;;  %v3460_v42 = vsel %vm1650_vm3, %v2549_v40, -inf }
 0x6de   : > { %3461 = vmax.xlane.f32.xlu1 %v3460_v42 }
 0x6e0   : > { %v2631_v43 = vpop.f32.mrb[6].mxu0  ;;  %v3001_v44 = vpop.f32.mrb[2].mxu1 }
 0x6e1   : > { %v14900_v46 = vadd.f32 %v3001_v44, %v2631_v43  ;;  %v13546_v47 = vpop.f32.mrb[7].mxu0  ;;  %v13571_v48 = vpop.f32.mrb[3].mxu1 }
 0x6e3   : > { %v3463_v49 = vsel %vm1650_vm3, %v14900_v46, -inf }
 0x6e4   : > { %3464 = vmax.xlane.f32.xlu0 %v3463_v49 }
 0x6f8   : > { %v3459_v51 = vpop.xlane.xlu0 %3458 }
 0x6f9   : > { %v3469_v52 = vsub.f32 %v2097_v36, %v3459_v51 }
 0x6fb   : > { %v3473_v53 = vmul.f32 1.442695, %v3469_v52 }
 0x6fd   : > { %15186 = vpow2.f32 %v3473_v53 }
 0x707   : > { %v15187_v58 = vpop.eup %15186 }
 0x708   : > { %v3481_v59 = vsel %vm1650_vm3, %v15187_v58, 0.0 }
 0x70c   : > { %v3453_v55 = vpop.f32.mrb[8].mxu0 }
 0x70d   : > { %v13601_v56 = vpop.f32.mrb[9].mxu0  ;;  %v3466_v57 = vsel %vm1650_vm3, %v3453_v55, -inf }
 0x70e   : > { %3467 = vmax.xlane.f32.xlu0 %v3466_v57 }
 0x712   : > { %3482 = vadd.xlane.f32.xlu0 %v3481_v59 }
 0x728   : > { %3513 = vrot.lane.b32.xlu0 %v15724_v37, %s16897_s23 }
 0x76b   : > { %v3462_v60 = vpop.xlane.xlu1 %3461 }
 0x76c   : > { %v3470_v61 = vsub.f32 %v2549_v40, %v3462_v60 }
 0x76e   : > { %v3475_v62 = vmul.f32 1.442695, %v3470_v61 }
 0x770   : > { %15188 = vpow2.f32 %v3475_v62 }
 0x771   : > { %v3465_v3 = vpop.xlane.xlu0 %3464 }
 0x772   : > { %v3471_v4 = vsub.f32 %v14900_v46, %v3465_v3 }
 0x774   : > { %v3477_v8 = vmul.f32 1.442695, %v3471_v4 }
 0x77a   : > { %v15843_v63 = vpop.eup %15188 }
 0x77b   : > { %v3484_v2 = vsel %vm1650_vm3, %v15843_v63, 0.0 }
 0x77c   : > { %3485 = vadd.xlane.f32.xlu1 %v3484_v2 }
 0x78d   : > { %3965 = vrot.lane.b32.xlu1 %v15738_v45, %s16897_s23 }
 0x79b   : > { %v3468_v5 = vpop.xlane.xlu0 %3467 }
 0x79c   : > { %v3472_v6 = vsub.f32 %v3453_v55, %v3468_v5 }
 0x79e   : > { %v3479_v7 = vmul.f32 1.442695, %v3472_v6 }
 0x79f   : > { %v3483_v37 = vpop.xlane.xlu0 %3482 }
 0x7a0   : > { %15190 = vpow2.f32 %v3479_v7 }
 0x7a1   : > { %15192 = vrcp.f32 %v3483_v37 }
 0x7a2   : > { %15194 = vpow2.f32 %v3477_v8 }
 0x7a3   : > { %v3514_v9 = vpop.permute.xlu0 %3513 }
 0x7a4   : > { %v3520_v10 = vand.u32 4294901760, %v3514_v9 }
 0x7a6   : > { %13603 = vmatpush3.msra.mxu1 %v3520_v10  ;;  %v3597_v19 = vsub.f32 %v3514_v9, %v3520_v10 }
 0x7a7   : > { %13607 = vmatprep.subr.mxu1 %v15378_v1 }
 0x7a8   : > { %v3598_v22 = vand.u32 4294901760, %v3597_v19 }
 0x7aa   : > { %v15850_v11 = vpop.eup %15190  ;;  %v3599_v25 = vsub.f32 %v3597_v19, %v3598_v22 }
 0x7ab   : > { %v15193_v12 = vpop.eup %15192  ;;  %v3490_v45 = vsel %vm1650_vm3, %v15850_v11, 0.0 }
 0x7ac   : > { %v3497_v13 = vmul.f32 %v15193_v12, %v3483_v37  ;;  %3491 = vadd.xlane.f32.xlu0 %v3490_v45  ;;  %v15854_v14 = vpop.eup %15194  ;;  %v3600_v28 = vand.u32 4294901760, %v3599_v25  ;;  %v5337_v25 = vld [vmem:[%s16869_s8] sm:$0xff] }
 0x7ad   : > { %v3487_v17 = vsel %vm1650_vm3, %v15854_v14, 0.0 }
 0x7ae   : > { %v3501_v15 = vsub.f32 2.0, %v3497_v13 }
 0x7b0   : > { %v3505_v16 = vmul.f32 %v15193_v12, %v3501_v15 }
 0x7b1   : > { %3488 = vadd.xlane.f32.xlu1 %v3487_v17 }
 0x7b2   : > { %v3509_v18 = vmul.f32 %v15187_v58, %v3505_v16 }
 0x7b4   : > { %v3517_v20 = vsel %vm1650_vm3, %v3509_v18, 0 }
 0x7b5   : > { %v3585_v21 = vand.u32 4294901760, %v3517_v20 }
 0x7b7   : > { %v3586_v23 = vsub.f32 %v3517_v20, %v3585_v21 }
 0x7b9   : > { %v3587_v24 = vand.u32 4294901760, %v3586_v23 }
 0x7bb   : > { %v3588_v26 = vsub.f32 %v3586_v23, %v3587_v24 }
 0x7bd   : > { %v3589_v27 = vand.u32 4294901760, %v3588_v26  ;;  %v5338_v26 = vld [vmem:[%s16869_s8 + $0x8] sm:$0xff] }
 0x7bf   : > { %13605 = vmatmul.mubr.f32.vlgmr.msra.gmra.mrb[4].mxu1 %v3589_v27  ;;  %v5351_v27 = vand.u32 4294901760, %v5337_v25 }
 0x7c0   : > { %13608 = vmatpush3.msra.mxu1 %v3600_v28  ;;  %13609 = vmatprep.mubr.msk.f32.mxu1 %vm15377_vm0, %v15378_v1  ;;  %v5354_v28 = vand.u32 4294901760, %v5338_v26 }
 0x7c1   : > { %13612 = vmatprep.subr.mxu1 %v15378_v1 }
 0x7c2   : > { %4869 = vrot.lane.b32.xlu1 %v15749_v54, %s16897_s23  ;;  %4417 = vrot.lane.b32.xlu0 %v15743_v50, %s16897_s23  ;;  %s16900_s23 = smov 16  }
 0x7c7   : > { %13610 = vmatmul.mubr.f32.vlgmr.msra.gmra.mrb[4].mxu1 %v3585_v21 }
 0x7c8   : > { %13613 = vmatpush3.msra.mxu1 %v3597_v19  ;;  %13614 = vmatprep.mubr.msk.f32.mxu1 %vm15377_vm0, %v15378_v1 }
 0x7c9   : > { %13617 = vmatprep.subr.mxu1 %v15378_v1 }
 0x7cf   : > { %13615 = vmatmul.mubr.f32.vlgmr.msra.gmra.mrb[4].mxu1 %v3586_v23 }
 0x7d0   : > { %13618 = vmatpush3.msra.mxu1 %v3520_v10  ;;  %13619 = vmatprep.mubr.msk.f32.mxu1 %vm15377_vm0, %v15378_v1 }
 0x7d1   : > { %13622 = vmatprep.subr.mxu1 %v15378_v1 }
 0x7d7   : > { %13620 = vmatmul.mubr.f32.vlgmr.msra.gmra.mrb[4].mxu1 %v3587_v24 }
 0x7d8   : > { %13623 = vmatpush3.msra.mxu1 %v3598_v22  ;;  %13624 = vmatprep.mubr.msk.f32.mxu1 %vm15377_vm0, %v15378_v1 }
 0x7d9   : > { %13627 = vmatprep.subr.mxu1 %v15378_v1 }
 0x7df   : > { %13625 = vmatmul.mubr.f32.vlgmr.msra.gmra.mrb[4].mxu1 %v3585_v21 }
 0x7e0   : > { %13628 = vmatpush3.msra.mxu1 %v3520_v10  ;;  %13629 = vmatprep.mubr.msk.f32.mxu1 %vm15377_vm0, %v15378_v1 }
 0x7e1   : > { %13662 = vmatprep.subr.mxu1 %v15378_v1 }
 0x7e7   : > { %13630 = vmatmul.mubr.f32.vlgmr.msra.gmra.mrb[4].mxu1 %v3585_v21 }
 0x7e8   : > { %13664 = vmatprep.mubr.msk.f32.mxu1 %vm15377_vm0, %v15378_v1 }
 0x809   : > { %v3486_v50 = vpop.xlane.xlu1 %3485 }
 0x80a   : > { %15196 = vrcp.f32 %v3486_v50 }
 0x80d   : > { %v3966_v54 = vpop.permute.xlu1 %3965 }
 0x80e   : > { %v3972_v29 = vand.u32 4294901760, %v3966_v54 }
 0x810   : > { %13633 = vmatpush3.msra.mxu0 %v3972_v29  ;;  %v4049_v35 = vsub.f32 %v3966_v54, %v3972_v29  ;;  %v5339_v54 = vld [vmem:[%s16869_s8 + $0x10] sm:$0xff] }
 0x811   : > { %13637 = vmatprep.subr.mxu0 %v15378_v1 }
 0x812   : > { %v4050_v39 = vand.u32 4294901760, %v4049_v35 }
 0x814   : > { %v15197_v30 = vpop.eup %15196  ;;  %v4051_v42 = vsub.f32 %v4049_v35, %v4050_v39 }
 0x815   : > { %v3498_v31 = vmul.f32 %v15197_v30, %v3486_v50  ;;  %v14575_v50 = vpack.c.bf16 %v5354_v28, %v5351_v27 }
 0x816   : > { %v4052_v46 = vand.u32 4294901760, %v4051_v42 }
 0x817   : > { %v3502_v32 = vsub.f32 2.0, %v3498_v31 }
 0x819   : > { %v3506_v33 = vmul.f32 %v15197_v30, %v3502_v32  ;;  %v5357_v30 = vand.u32 4294901760, %v5339_v54  ;;  %v15973_v32 = vsub.f32 %v5337_v25, %v5351_v27 }
 0x81b   : > { %v3510_v34 = vmul.f32 %v15843_v63, %v3506_v33  ;;  %v5438_v33 = vsub.f32 %v5338_v26, %v5354_v28 }
 0x81d   : > { %v3969_v36 = vsel %vm1650_vm3, %v3510_v34, 0 }
 0x81e   : > { %v4037_v38 = vand.u32 4294901760, %v3969_v36 }
 0x820   : > { %v4038_v40 = vsub.f32 %v3969_v36, %v4037_v38 }
 0x822   : > { %v4039_v41 = vand.u32 4294901760, %v4038_v40 }
 0x824   : > { %v4040_v43 = vsub.f32 %v4038_v40, %v4039_v41 }
 0x826   : > { %v4041_v44 = vand.u32 4294901760, %v4040_v43 }
 0x828   : > { %13635 = vmatmul.mubr.f32.vlgmr.msra.gmra.mrb[10].mxu0 %v4041_v44 }
 0x829   : > { %13638 = vmatpush3.msra.mxu0 %v4052_v46  ;;  %13639 = vmatprep.mubr.msk.f32.mxu0 %vm15377_vm0, %v15378_v1 }
 0x82a   : > { %13642 = vmatprep.subr.mxu0 %v15378_v1 }
 0x830   : > { %13640 = vmatmul.mubr.f32.vlgmr.msra.gmra.mrb[10].mxu0 %v4037_v38 }
 0x831   : > { %13643 = vmatpush3.msra.mxu0 %v4049_v35  ;;  %13644 = vmatprep.mubr.msk.f32.mxu0 %vm15377_vm0, %v15378_v1  ;;  %v15975_v35 = vsub.f32 %v5339_v54, %v5357_v30 }
 0x832   : > { %13647 = vmatprep.subr.mxu0 %v15378_v1 }
 0x838   : > { %13645 = vmatmul.mubr.f32.vlgmr.msra.gmra.mrb[10].mxu0 %v4038_v40  ;;  %v5439_v40 = vand.u32 4294901760, %v5438_v33 }
 0x839   : > { %13648 = vmatpush3.msra.mxu0 %v3972_v29  ;;  %v3492_v47 = vpop.xlane.xlu0 %3491  ;;  %13649 = vmatprep.mubr.msk.f32.mxu0 %vm15377_vm0, %v15378_v1 }
 0x83a   : > { %15198 = vrcp.f32 %v3492_v47  ;;  %13652 = vmatprep.subr.mxu0 %v15378_v1  ;;  %v5440_v43 = vsub.f32 %v5438_v33, %v5439_v40 }
 0x83c   : > { %v5441_v46 = vand.u32 4294901760, %v5440_v43 }
 0x83d   : > { %v4418_v48 = vpop.permute.xlu0 %4417 }
 0x83e   : > { %v15892_v49 = vand.u32 4294901760, %v4418_v48  ;;  %v3489_v51 = vpop.xlane.xlu1 %3488 }
 0x83f   : > { %15200 = vrcp.f32 %v3489_v51 }
 0x840   : > { %13650 = vmatmul.mubr.f32.vlgmr.msra.gmra.mrb[10].mxu0 %v4039_v41  ;;  %13663 = vmatpush3.msra.mxu1 %v15892_v49  ;;  %v4501_v7 = vsub.f32 %v4418_v48, %v15892_v49 }
 0x841   : > { %13653 = vmatpush3.msra.mxu0 %v4050_v39  ;;  %13654 = vmatprep.mubr.msk.f32.mxu0 %vm15377_vm0, %v15378_v1  ;;  %v5432_v39 = vand.u32 4294901760, %v15973_v32 }
 0x842   : > { %13657 = vmatprep.subr.mxu0 %v15378_v1  ;;  %13667 = vmatprep.subr.mxu1 %v15378_v1  ;;  %v4870_v53 = vpop.permute.xlu1 %4869  ;;  %v4502_v12 = vand.u32 4294901760, %v4501_v7 }
 0x843   : > { %v15899_v57 = vand.u32 4294901760, %v4870_v53  ;;  %v5433_v42 = vsub.f32 %v15973_v32, %v5432_v39 }
 0x844   : > { %v15199_v52 = vpop.eup %15198 }
 0x845   : > { %v3500_v55 = vmul.f32 %v15199_v52, %v3492_v47  ;;  %v4953_v62 = vsub.f32 %v4870_v53, %v15899_v57  ;;  %v5434_v44 = vand.u32 4294901760, %v5433_v42  ;;  %v5446_v47 = vand.u32 4294901760, %v15975_v35 }
 0x847   : > { %v3504_v56 = vsub.f32 2.0, %v3500_v55  ;;  %v4954_v5 = vand.u32 4294901760, %v4953_v62  ;;  %v5447_v53 = vsub.f32 %v15975_v35, %v5446_v47 }
 0x848   : > { %13655 = vmatmul.mubr.f32.vlgmr.msra.gmra.mrb[10].mxu0 %v4037_v38 }
 0x849   : > { %v15201_v58 = vpop.eup %15200  ;;  %v3508_v59 = vmul.f32 %v15199_v52, %v3504_v56  ;;  %13658 = vmatpush3.msra.mxu0 %v3972_v29  ;;  %13659 = vmatprep.mubr.msk.f32.mxu0 %vm15377_vm0, %v15378_v1  ;;  %v5340_v29 = vld [vmem:[%s16869_s8 + $0x18] sm:$0xff]  ;;  %v14581_v52 = vpack.c.bf16 %v5441_v46, %v5434_v44  ;;  %v5448_v56 = vand.u32 4294901760, %v5447_v53 }
 0x84a   : > { %v3499_v60 = vmul.f32 %v15201_v58, %v3489_v51  ;;  %13692 = vmatprep.subr.mxu0 %v15378_v1  ;;  %v5360_v31 = vand.u32 4294901760, %v5340_v29 }
 0x84b   : > { %v3512_v61 = vmul.f32 %v15850_v11, %v3508_v59  ;;  %v4955_v11 = vsub.f32 %v4953_v62, %v4954_v5  ;;  %v14587_v59 = vpack.c.bf16 %v5438_v33, %v15973_v32 }
 0x84c   : > { %v3503_v63 = vsub.f32 2.0, %v3499_v60  ;;  %v14578_v34 = vpack.c.bf16 %v5360_v31, %v5357_v30  ;;  %v5452_v36 = vsub.f32 %v5340_v29, %v5360_v31 }
 0x84d   : > { %v4873_v2 = vsel %vm1650_vm3, %v3512_v61, 0  ;;  %v4956_v16 = vand.u32 4294901760, %v4955_v11  ;;  %v14599_v61 = vpack.c.bf16 %v5439_v40, %v5432_v39 }
 0x84e   : > { %v15907_v3 = vand.u32 4294901760, %v4873_v2  ;;  %v3507_v4 = vmul.f32 %v15201_v58, %v3503_v63  ;;  %v5453_v48 = vand.u32 4294901760, %v5452_v36  ;;  %v14590_v60 = vpack.c.bf16 %v5452_v36, %v15975_v35  ;;  %v5863_v35 = vld [vmem:[%s16873_s12] sm:$0xff] }
 0x84f   : > { %v5877_v39 = vand.u32 4294901760, %v5863_v35 }
 0x850   : > { %v4942_v6 = vsub.f32 %v4873_v2, %v15907_v3  ;;  %v3511_v8 = vmul.f32 %v15854_v14, %v3507_v4  ;;  %13660 = vmatmul.mubr.f32.vlgmr.msra.gmra.mrb[10].mxu0 %v4037_v38  ;;  %v4503_v14 = vsub.f32 %v4501_v7, %v4502_v12  ;;  %v5454_v55 = vsub.f32 %v5452_v36, %v5453_v48  ;;  %v5864_v36 = vld [vmem:[%s16873_s12 + $0x8] sm:$0xff] }
 0x851   : > { %13693 = vmatpush3.msra.mxu0 %v15899_v57  ;;  %13694 = vmatprep.mubr.msk.f32.mxu0 %vm15377_vm0, %v15378_v1  ;;  %v5880_v40 = vand.u32 4294901760, %v5864_v36  ;;  %v5957_v46 = vsub.f32 %v5863_v35, %v5877_v39  ;;  %v6394_v35 = vld [vmem:[%s16946_s15 + $0x30] sm:$0xff] }
 0x852   : > { %v4421_v37 = vsel %vm1650_vm3, %v3511_v8, 0  ;;  %13697 = vmatprep.subr.mxu0 %v15378_v1  ;;  %v4943_v9 = vand.u32 4294901760, %v4942_v6  ;;  %v4504_v20 = vand.u32 4294901760, %v4503_v14 }
 0x853   : > { %v4489_v10 = vand.u32 4294901760, %v4421_v37  ;;  %v16028_v44 = vpack.c.bf16 %v5880_v40, %v5877_v39 }
 0x854   : > { %v4944_v45 = vsub.f32 %v4942_v6, %v4943_v9 }
 0x855   : > { %v4490_v13 = vsub.f32 %v4421_v37, %v4489_v10 }
 0x856   : > { %v4945_v15 = vand.u32 4294901760, %v4944_v45 }
 0x857   : > { %v4491_v17 = vand.u32 4294901760, %v4490_v13 }
 0x858   : > { %13695 = vmatmul.mubr.f32.vlgmr.msra.gmra.mrb[12].mxu0 %v4945_v15 }
 0x859   : > { %13698 = vmatpush3.msra.mxu0 %v4956_v16  ;;  %v4492_v18 = vsub.f32 %v4490_v13, %v4491_v17  ;;  %13699 = vmatprep.mubr.msk.f32.mxu0 %vm15377_vm0, %v15378_v1  ;;  %v12865_v16 = vld [vmem:[%s16870_s9] ss:$0 sm:$0xff] }
 0x85a   : > { %13702 = vmatprep.subr.mxu0 %v15378_v1 }
 0x85b   : > { %v4493_v19 = vand.u32 4294901760, %v4492_v18 }
 0x85d   : > { %13665 = vmatmul.mubr.f32.vlgmr.msra.gmra.mrb[6].mxu1 %v4493_v19 }
 0x85e   : > { %13668 = vmatpush3.msra.mxu1 %v4504_v20  ;;  %13669 = vmatprep.mubr.msk.f32.mxu1 %vm15377_vm0, %v15378_v1 }
 0x85f   : > { %13672 = vmatprep.subr.mxu1 %v15378_v1 }
 0x860   : > { %13700 = vmatmul.mubr.f32.vlgmr.msra.gmra.mrb[12].mxu0 %v15907_v3 }
 0x861   : > { %13703 = vmatpush3.msra.mxu0 %v4953_v62  ;;  %13704 = vmatprep.mubr.msk.f32.mxu0 %vm15377_vm0, %v15378_v1  ;;  %v14602_v62 = vpack.c.bf16 %v5453_v48, %v5446_v47  ;;  %v5964_v47 = vsub.f32 %v5864_v36, %v5880_v40  ;;  %v6395_v36 = vld [vmem:[%s16946_s15 + $0x38] sm:$0xff] }
 0x862   : > { %13707 = vmatprep.subr.mxu0 %v15378_v1  ;;  %v6428_v39 = vand.u32 4294901760, %v6395_v36 }
 0x863   : > { %v5965_v53 = vand.u32 4294901760, %v5964_v47 }
 0x865   : > { %13670 = vmatmul.mubr.f32.vlgmr.msra.gmra.mrb[6].mxu1 %v4489_v10 }
 0x866   : > { %13673 = vmatpush3.msra.mxu1 %v4501_v7  ;;  %13674 = vmatprep.mubr.msk.f32.mxu1 %vm15377_vm0, %v15378_v1 }
 0x867   : > { %13677 = vmatprep.subr.mxu1 %v15378_v1 }
 0x868   : > { %13705 = vmatmul.mubr.f32.vlgmr.msra.gmra.mrb[12].mxu0 %v4942_v6 }
 0x869   : > { %13708 = vmatpush3.msra.mxu0 %v15899_v57  ;;  %13709 = vmatprep.mubr.msk.f32.mxu0 %vm15377_vm0, %v15378_v1 }
 0x86a   : > { %13712 = vmatprep.subr.mxu0 %v15378_v1 }
 0x86d   : > { %13675 = vmatmul.mubr.f32.vlgmr.msra.gmra.mrb[6].mxu1 %v4490_v13 }
 0x86e   : > { %13678 = vmatpush3.msra.mxu1 %v15892_v49  ;;  %13679 = vmatprep.mubr.msk.f32.mxu1 %vm15377_vm0, %v15378_v1 }
 0x86f   : > { %13682 = vmatprep.subr.mxu1 %v15378_v1 }
 0x870   : > { %13710 = vmatmul.mubr.f32.vlgmr.msra.gmra.mrb[12].mxu0 %v4943_v9 }
 0x871   : > { %13713 = vmatpush3.msra.mxu0 %v4954_v5  ;;  %13714 = vmatprep.mubr.msk.f32.mxu0 %vm15377_vm0, %v15378_v1 }
 0x872   : > { %13717 = vmatprep.subr.mxu0 %v15378_v1 }
 0x875   : > { %13680 = vmatmul.mubr.f32.vlgmr.msra.gmra.mrb[6].mxu1 %v4491_v17 }
 0x876   : > { %13683 = vmatpush3.msra.mxu1 %v4502_v12  ;;  %13684 = vmatprep.mubr.msk.f32.mxu1 %vm15377_vm0, %v15378_v1 }
 0x877   : > { %13687 = vmatprep.subr.mxu1 %v15378_v1 }
 0x878   : > { %13715 = vmatmul.mubr.f32.vlgmr.msra.gmra.mrb[12].mxu0 %v15907_v3 }
 0x879   : > { %13718 = vmatpush3.msra.mxu0 %v15899_v57  ;;  %13719 = vmatprep.mubr.msk.f32.mxu0 %vm15377_vm0, %v15378_v1  ;;  %v5455_v57 = vand.u32 4294901760, %v5454_v55 }
 0x87a   : > { %14592 = vmatprep.subr.bf16.mxu0 %v15376_v0 }
 0x87b   : > { %v14584_v58 = vpack.c.bf16 %v5455_v57, %v5448_v56  ;;  %v5966_v56 = vsub.f32 %v5964_v47, %v5965_v53 }
 0x87d   : > { %13685 = vmatmul.mubr.f32.vlgmr.msra.gmra.mrb[6].mxu1 %v4489_v10 }
 0x87e   : > { %13688 = vmatpush3.msra.mxu1 %v15892_v49  ;;  %13689 = vmatprep.mubr.msk.f32.mxu1 %vm15377_vm0, %v15378_v1 }
 0x87f   : > { %14574 = vmatprep.subr.bf16.mxu1 %v15376_v0 }
 0x880   : > { %13720 = vmatmul.mubr.f32.vlgmr.msra.gmra.mrb[12].mxu0 %v15907_v3 }
 0x881   : > { %13763 = vmatprep.mubr.msk.f32.mxu0 %vm15377_vm0, %v15378_v1  ;;  %14594 = vmatpush3.bf16.msra.mxu0 %v14575_v50 }
 0x882   : > { %14595 = vmatprep.subr.bf16.mxu0 %v15376_v0 }
 0x885   : > { %13690 = vmatmul.mubr.f32.vlgmr.msra.gmra.mrb[6].mxu1 %v4489_v10  ;;  %14597 = vmatpush3.bf16.msra.mxu0 %v14578_v34 }
 0x886   : > { %13730 = vmatprep.mubr.msk.f32.mxu1 %vm15377_vm0, %v15378_v1  ;;  %14576 = vmatpush3.bf16.msra.mxu1 %v14575_v50 }
 0x887   : > { %14577 = vmatprep.subr.bf16.mxu1 %v15376_v0  ;;  %14604 = vmatprep.subr.bf16.mxu0 %v15376_v0 }
 0x88a   : > { %14579 = vmatpush3.bf16.msra.mxu1 %v14578_v34 }
 0x88b   : > { %14580 = vmatprep.subr.bf16.mxu1 %v15376_v0 }
 0x8ba   : > { %v3961_v21 = vpop.f32.mrb[4].mxu1 }
 0x8bb   : > { %v13631_v22 = vpop.f32.mrb[5].mxu1 }
 0x923   : > { %v4413_v23 = vpop.f32.mrb[10].mxu0 }
 0x924   : > { %5322 = vrot.lane.b32.xlu1 %v4413_v23, %s16901_s1  ;;  %v13661_v24 = vpop.f32.mrb[11].mxu0  ;;  %s16948_s1 = sld [smem:[#allocation24_spill]] }
 0x953   : > { %v5317_v38 = vpop.f32.mrb[12].mxu0 }
 0x954   : > { %5330 = vrot.lane.b32.xlu0 %v5317_v38, %s16899_s19  ;;  %v13721_v41 = vpop.f32.mrb[13].mxu0  ;;  %v5865_v38 = vld [vmem:[%s16873_s12 + $0x10] sm:$0xff]  ;;  %s16947_s19 = sld [smem:[#allocation22_spill]] }
 0x955   : > { %v5866_v41 = vld [vmem:[%s16873_s12 + $0x18] sm:$0xff]  ;;  %v5883_v42 = vand.u32 4294901760, %v5865_v38 }
 0x956   : > { %v5886_v43 = vand.u32 4294901760, %v5866_v41 }
 0x957   : > { %v5971_v48 = vsub.f32 %v5865_v38, %v5883_v42  ;;  %v6425_v38 = vand.u32 4294901760, %v6394_v35 }
 0x958   : > { %v4865_v49 = vpop.f32.mrb[6].mxu1 }
 0x959   : > { %v13691_v51 = vpop.f32.mrb[7].mxu1  ;;  %5326 = vrot.lane.b32.xlu1 %v4865_v49, %s16900_s23  ;;  %v5978_v49 = vsub.f32 %v5866_v41, %v5886_v43 }
 0x95a   : > { %v16031_v51 = vpack.c.bf16 %v5886_v43, %v5883_v42  ;;  %v16118_v42 = vpack.c.bf16 %v6428_v39, %v6425_v38 }
 0x996   : > { %v5323_v63 = vpop.permute.xlu1 %5322 }
 0x997   : > { %v5333_v2 = vsel %vm1650_vm3, %v3961_v21, %v5323_v63 }
 0x9c6   : > { %v5331_v4 = vpop.permute.xlu0 %5330 }
 0x9cb   : > { %v5327_v3 = vpop.permute.xlu1 %5326 }
 0x9cc   : > { %v5334_v5 = vsel %vm616_vm1, %v5333_v2, %v5327_v3 }
 0x9cd   : > { %v5336_v6 = vsel %vm5335_vm4, %v5334_v5, %v5331_v4  ;;  %v14623_v5 = vpack.c.bf16 %v5964_v47, %v5957_v46 }
 0x9ce   : > { %v5348_v7 = vsel %vm1081_vm2, %v5336_v6, 0 }
 0x9cf   : > { %v5419_v8 = vand.u32 4294901760, %v5348_v7 }
 0x9d1   : > { %v5420_v37 = vsub.f32 %v5348_v7, %v5419_v8 }
 0x9d3   : > { %v5421_v9 = vand.u32 4294901760, %v5420_v37 }
 0x9d5   : > { %13764 = vmatmul.mubr.f32.vlgmr.msra.gmra.mrb[14].mxu0 %v5421_v9  ;;  %v5422_v10 = vsub.f32 %v5420_v37, %v5421_v9 }
 0x9d6   : > { %14606 = vmatpush3.bf16.msra.mxu0 %v14575_v50  ;;  %13785 = vmatprep.mubr.msk.f32.mxu0 %vm15377_vm0, %v15378_v1 }
 0x9d7   : > { %14607 = vmatprep.subr.bf16.mxu0 %v15376_v0  ;;  %v5423_v11 = vand.u32 4294901760, %v5422_v10 }
 0x9d9   : > { %13731 = vmatmul.mubr.f32.vlgmr.msra.gmra.mrb[8].mxu1 %v5423_v11 }
 0x9da   : > { %14582 = vmatpush3.bf16.msra.mxu1 %v14581_v52  ;;  %14609 = vmatpush3.bf16.msra.mxu0 %v14578_v34  ;;  %v5958_v52 = vand.u32 4294901760, %v5957_v46 }
 0x9db   : > { %14583 = vmatprep.subr.bf16.mxu1 %v15376_v0  ;;  %13741 = vmatprep.mubr.msk.f32.mxu1 %vm15377_vm0, %v15378_v1 }
 0x9dc   : > { %14646 = vmatprep.subr.bf16.mxu0 %v15376_v0  ;;  %v5959_v55 = vsub.f32 %v5957_v46, %v5958_v52  ;;  %v14635_v7 = vpack.c.bf16 %v5965_v53, %v5958_v52 }
 0x9dd   : > { %13786 = vmatmul.mubr.f32.vlgmr.msra.gmra.mrb[16].mxu0 %v5419_v8 }
 0x9de   : > { %14585 = vmatpush3.bf16.msra.mxu1 %v14584_v58  ;;  %13870 = vmatprep.mubr.msk.f32.mxu0 %vm15377_vm0, %v15378_v1  ;;  %v5960_v57 = vand.u32 4294901760, %v5959_v55  ;;  %v5967_v58 = vand.u32 4294901760, %v5966_v56 }
 0x9df   : > { %14586 = vmatprep.subr.bf16.mxu1 %v15376_v0 }
 0x9e1   : > { %13742 = vmatmul.mubr.f32.vlgmr.msra.gmra.mrb[10].mxu1 %v5419_v8 }
 0x9e2   : > { %14588 = vmatpush3.bf16.msra.mxu1 %v14587_v59  ;;  %13752 = vmatprep.mubr.msk.f32.mxu1 %vm15377_vm0, %v15378_v1  ;;  %v5972_v59 = vand.u32 4294901760, %v5971_v48 }
 0x9e3   : > { %14589 = vmatprep.subr.bf16.mxu1 %v15376_v0 }
 0x9e6   : > { %14591 = vmatpush3.bf16.msra.mxu1 %v14590_v60  ;;  %v5979_v60 = vand.u32 4294901760, %v5978_v49 }
 0x9e7   : > { %14598 = vmatprep.subr.bf16.mxu1 %v15376_v0 }
 0x9e8   : > { %v5980_v63 = vsub.f32 %v5978_v49, %v5979_v60 }
 0x9e9   : > { %13753 = vmatmul.mubr.f32.vlgmr.msra.gmra.mrb[12].mxu1 %v5420_v37 }
 0x9ea   : > { %14600 = vmatpush3.bf16.msra.mxu1 %v14599_v61  ;;  %13774 = vmatprep.mubr.msk.f32.mxu1 %vm15377_vm0, %v15378_v1  ;;  %v14617_v61 = vpack.c.bf16 %v5967_v58, %v5960_v57  ;;  %v5981_v3 = vand.u32 4294901760, %v5980_v63 }
 0x9eb   : > { %14601 = vmatprep.subr.bf16.mxu1 %v15376_v0 }
 0x9ee   : > { %14603 = vmatpush3.bf16.msra.mxu1 %v14602_v62  ;;  %v5973_v62 = vsub.f32 %v5971_v48, %v5972_v59 }
 0x9ef   : > { %14610 = vmatprep.subr.bf16.mxu1 %v15376_v0 }
 0x9f0   : > { %v5974_v2 = vand.u32 4294901760, %v5973_v62 }
 0x9f1   : > { %13775 = vmatmul.mubr.f32.vlgmr.msra.gmra.mrb[14].mxu1 %v5419_v8  ;;  %v14638_v8 = vpack.c.bf16 %v5979_v60, %v5972_v59 }
 0x9f2   : > { %13796 = vmatprep.mubr.msk.f32.mxu1 %vm15377_vm0, %v15378_v1  ;;  %14612 = vmatpush3.bf16.msra.mxu1 %v16028_v44  ;;  %v14620_v4 = vpack.c.bf16 %v5981_v3, %v5974_v2 }
 0x9f3   : > { %14613 = vmatprep.subr.bf16.mxu1 %v15376_v0 }
 0x9f6   : > { %14615 = vmatpush3.bf16.msra.mxu1 %v16031_v51 }
 0x9f7   : > { %14616 = vmatprep.subr.bf16.mxu1 %v15376_v0 }
 0xaa8   : > { %v5673_v12 = vpop.f32.mrb[14].mxu0 }
 0xaa9   : > { %v13765_v45 = vpop.f32.mrb[15].mxu0 }
 0xaac   : > { %v5425_v13 = vpop.f32.mrb[8].mxu1 }
 0xaad   : > { %v13732_v15 = vpop.f32.mrb[9].mxu1  ;;  %v5426_v18 = vadd.f32 %v12865_v16, %v5425_v13  ;;  %v12867_v13 = vld [vmem:[%s16945_s16] ss:$0 sm:$0xff] }
 0xab0   : > { %v5831_v17 = vpop.f32.mrb[16].mxu0 }
 0xab1   : > { %v13787_v14 = vpop.f32.mrb[17].mxu0 }
 0xab4   : > { %v5516_v19 = vpop.f32.mrb[10].mxu1 }
 0xab5   : > { %v5517_v20 = vadd.f32 %v5516_v19, %v5426_v18  ;;  %v13743_v21 = vpop.f32.mrb[11].mxu1 }
 0xabc   : > { %v5596_v22 = vpop.f32.mrb[12].mxu1 }
 0xabd   : > { %v5597_v23 = vadd.f32 %v5596_v22, %v5517_v20  ;;  %v13754_v24 = vpop.f32.mrb[13].mxu1  ;;  %v6388_v22 = vld [vmem:[%s16946_s15] sm:$0xff] }
 0xabe   : > { %v6407_v24 = vand.u32 4294901760, %v6388_v22 }
 0xabf   : > { %v5674_v25 = vadd.f32 %v5673_v12, %v5597_v23  ;;  %v12866_v12 = vld [vmem:[%s16871_s10] ss:$0 sm:$0xff]  ;;  %v6389_v23 = vld [vmem:[%s16946_s15 + $0x8] sm:$0xff] }
 0xac0   : > { %v16114_v40 = vsub.f32 %v6388_v22, %v6407_v24 }
 0xac4   : > { %v5756_v26 = vpop.f32.mrb[14].mxu1 }
 0xac5   : > { %v5757_v27 = vadd.f32 %v5756_v26, %v5674_v25  ;;  %v13776_v28 = vpop.f32.mrb[15].mxu1  ;;  %v6410_v25 = vand.u32 4294901760, %v6389_v23 }
 0xac6   : > { %v6391_v28 = vld [vmem:[%s16946_s15 + $0x18] sm:$0xff] }
 0xac7   : > { %v5832_v50 = vadd.f32 %v5831_v17, %v5757_v27  ;;  %v16078_v26 = vpack.c.bf16 %v6410_v25, %v6407_v24  ;;  %v6390_v27 = vld [vmem:[%s16946_s15 + $0x10] sm:$0xff]  ;;  %v16116_v41 = vsub.f32 %v6389_v23, %v6410_v25  ;;  %v12868_v25 = vld [vmem:[%s16947_s19] ss:$0 sm:$0xff] }
 0xac9   : > { %v5835_v54 = vadd.f32 %v5832_v50, %v5336_v6  ;;  %v14626_v6 = vpack.c.bf16 %v5978_v49, %v5971_v48  ;;  %14648 = vmatpush3.bf16.msra.mxu0 %v16078_v26  ;;  %v6413_v50 = vand.u32 4294901760, %v6390_v27  ;;  %v16128_v48 = vsub.f32 %v6394_v35, %v6425_v38 }
 0xaca   : > { %14649 = vmatprep.subr.bf16.mxu0 %v15376_v0  ;;  %v16130_v49 = vsub.f32 %v6395_v36, %v6428_v39  ;;  %v6499_v52 = vand.u32 4294901760, %v16116_v41 }
 0xacb   : > { %v5836_v29 = vsel %vm1081_vm2, %v5835_v54, 0.0  ;;  %v16120_v43 = vsub.f32 %v6390_v27, %v6413_v50 }
 0xacc   : > { %5837 = vadd.xlane.f32.xlu1 %v5836_v29  ;;  %v6500_v55 = vsub.f32 %v16116_v41, %v6499_v52 }
 0xacd   : > { %v6506_v58 = vand.u32 4294901760, %v16120_v43 }
 0xace   : > { %v6501_v57 = vand.u32 4294901760, %v6500_v55 }
 0xb59   : > { %v5838_v30 = vpop.xlane.xlu1 %5837 }
 0xb5a   : > { %v5839_v31 = vmul.f32 0.03125, %v5838_v30  ;;  %v6392_v30 = vld [vmem:[%s16946_s15 + $0x20] sm:$0xff] }
 0xb5c   : > { %v5840_v32 = vsub.f32 %v5835_v54, %v5839_v31  ;;  %v6416_v54 = vand.u32 4294901760, %v6391_v28  ;;  %v6393_v31 = vld [vmem:[%s16946_s15 + $0x28] sm:$0xff] }
 0xb5e   : > { %v5841_v33 = vmul.f32 %v5840_v32, %v5840_v32  ;;  %v16090_v29 = vpack.c.bf16 %v6416_v54, %v6413_v50 }
 0xb60   : > { %v5842_v34 = vsel %vm1081_vm2, %v5841_v33, 0.0  ;;  %14651 = vmatpush3.bf16.msra.mxu0 %v16090_v29  ;;  %v6422_v33 = vand.u32 4294901760, %v6393_v31 }
 0xb61   : > { %5843 = vadd.xlane.f32.xlu0 %v5842_v34  ;;  %14652 = vmatprep.subr.bf16.mxu0 %v15376_v0 }
 0xb62   : > { %v16126_v47 = vsub.f32 %v6393_v31, %v6422_v33 }
 0xbee   : > { %v5844_v37 = vpop.xlane.xlu0 %5843 }
 0xbef   : > { %v5845_v9 = vmul.f32 0.03125, %v5844_v37 }
 0xbf1   : > { %v5846_v10 = vadd.f32 1e-12, %v5845_v9  ;;  %v6534_v9 = vand.u32 4294901760, %v16128_v48 }
 0xbf3   : > { %15202 = vrsqrt.f32 %v5846_v10  ;;  %v6541_v10 = vand.u32 4294901760, %v16130_v49 }
 0xbf5   : > { %v16174_v24 = vpack.c.bf16 %v6541_v10, %v6534_v9 }
 0xbfd   : > { %v15203_v11 = vpop.eup %15202 }
 0xbfe   : > { %v5848_v45 = vmul.f32 %v15203_v11, %v5840_v32  ;;  %v6419_v32 = vand.u32 4294901760, %v6392_v30 }
 0xc00   : > { %v5855_v15 = vmul.f32 %v12866_v12, %v5848_v45  ;;  %v16102_v34 = vpack.c.bf16 %v6422_v33, %v6419_v32  ;;  %v16124_v46 = vsub.f32 %v6392_v30, %v6419_v32  ;;  %v6535_v12 = vsub.f32 %v16128_v48, %v6534_v9 }
 0xc01   : > { %v6542_v45 = vsub.f32 %v16130_v49, %v6541_v10 }
 0xc02   : > { %v16042_v16 = vadd.f32 %v12867_v13, %v5855_v15  ;;  %14654 = vmatpush3.bf16.msra.mxu0 %v16102_v34  ;;  %v6520_v3 = vand.u32 4294901760, %v16124_v46  ;;  %v6536_v13 = vand.u32 4294901760, %v6535_v12 }
 0xc03   : > { %14655 = vmatprep.subr.bf16.mxu0 %v15376_v0  ;;  %v6543_v15 = vand.u32 4294901760, %v6542_v45 }
 0xc04   : > { %v5874_v17 = vsel %vm1081_vm2, %v16042_v16, 0 }
 0xc05   : > { %v5945_v14 = vand.u32 4294901760, %v5874_v17 }
 0xc06   : > { %14657 = vmatpush3.bf16.msra.mxu0 %v16118_v42 }
 0xc07   : > { %v5946_v18 = vsub.f32 %v5874_v17, %v5945_v14  ;;  %14658 = vmatprep.subr.bf16.mxu0 %v15376_v0  ;;  %v16158_v17 = vpack.c.bf16 %v6543_v15, %v6536_v13 }
 0xc09   : > { %v5947_v19 = vand.u32 4294901760, %v5946_v18 }
 0xc0b   : > { %v5948_v20 = vsub.f32 %v5946_v18, %v5947_v19 }
 0xc0d   : > { %v5949_v21 = vand.u32 4294901760, %v5948_v20  ;;  %v14680_v20 = vpack.c.bf16 %v16130_v49, %v16128_v48 }
 0xc0f   : > { %13797 = vmatmul.mubr.f32.vlgmr.msra.gmra.mrb[16].mxu1 %v5949_v21 }
 0xc10   : > { %14618 = vmatpush3.bf16.msra.mxu1 %v14617_v61  ;;  %13807 = vmatprep.mubr.msk.f32.mxu1 %vm15377_vm0, %v15378_v1  ;;  %v6507_v61 = vsub.f32 %v16120_v43, %v6506_v58 }
 0xc11   : > { %14619 = vmatprep.subr.bf16.mxu1 %v15376_v0 }
 0xc12   : > { %v6508_v63 = vand.u32 4294901760, %v6507_v61 }
 0xc14   : > { %14621 = vmatpush3.bf16.msra.mxu1 %v14620_v4  ;;  %v6527_v4 = vand.u32 4294901760, %v16126_v47 }
 0xc15   : > { %14622 = vmatprep.subr.bf16.mxu1 %v15376_v0 }
 0xc16   : > { %v16172_v23 = vpack.c.bf16 %v6527_v4, %v6520_v3 }
 0xc17   : > { %13808 = vmatmul.mubr.f32.vlgmr.msra.gmra.mrb[16].mxu1 %v5945_v14 }
 0xc18   : > { %14624 = vmatpush3.bf16.msra.mxu1 %v14623_v5  ;;  %13818 = vmatprep.mubr.msk.f32.mxu1 %vm15377_vm0, %v15378_v1 }
 0xc19   : > { %14625 = vmatprep.subr.bf16.mxu1 %v15376_v0 }
 0xc1c   : > { %14627 = vmatpush3.bf16.msra.mxu1 %v14626_v6  ;;  %v6521_v6 = vsub.f32 %v16124_v46, %v6520_v3 }
 0xc1d   : > { %14628 = vmatprep.subr.bf16.mxu1 %v15376_v0 }
 0xc1f   : > { %13819 = vmatmul.mubr.f32.vlgmr.msra.gmra.mrb[16].mxu1 %v5946_v18 }
 0xc20   : > { %14630 = vmatpush3.bf16.msra.mxu1 %v16028_v44  ;;  %13829 = vmatprep.mubr.msk.f32.mxu1 %vm15377_vm0, %v15378_v1 }
 0xc21   : > { %14631 = vmatprep.subr.bf16.mxu1 %v15376_v0 }
 0xc24   : > { %14633 = vmatpush3.bf16.msra.mxu1 %v16031_v51 }
 0xc25   : > { %14634 = vmatprep.subr.bf16.mxu1 %v15376_v0 }
 0xc27   : > { %13830 = vmatmul.mubr.f32.vlgmr.msra.gmra.mrb[16].mxu1 %v5947_v19  ;;  %v14677_v19 = vpack.c.bf16 %v16126_v47, %v16124_v46 }
 0xc28   : > { %14636 = vmatpush3.bf16.msra.mxu1 %v14635_v7  ;;  %13840 = vmatprep.mubr.msk.f32.mxu1 %vm15377_vm0, %v15378_v1  ;;  %v6528_v7 = vsub.f32 %v16126_v47, %v6527_v4 }
 0xc29   : > { %14637 = vmatprep.subr.bf16.mxu1 %v15376_v0 }
 0xc2a   : > { %v6529_v37 = vand.u32 4294901760, %v6528_v7 }
 0xc2c   : > { %14639 = vmatpush3.bf16.msra.mxu1 %v14638_v8  ;;  %v6522_v8 = vand.u32 4294901760, %v6521_v6 }
 0xc2d   : > { %14640 = vmatprep.subr.bf16.mxu1 %v15376_v0 }
 0xc2e   : > { %v16154_v11 = vpack.c.bf16 %v6529_v37, %v6522_v8 }
 0xc2f   : > { %13841 = vmatmul.mubr.f32.vlgmr.msra.gmra.mrb[16].mxu1 %v5945_v14 }
 0xc30   : > { %14642 = vmatpush3.bf16.msra.mxu1 %v16028_v44  ;;  %13851 = vmatprep.mubr.msk.f32.mxu1 %vm15377_vm0, %v15378_v1  ;;  %v16122_v44 = vsub.f32 %v6391_v28, %v6416_v54 }
 0xc31   : > { %14643 = vmatprep.subr.bf16.mxu1 %v15376_v0 }
 0xc32   : > { %v6513_v59 = vand.u32 4294901760, %v16122_v44  ;;  %v14674_v18 = vpack.c.bf16 %v16122_v44, %v16120_v43 }
 0xc34   : > { %14645 = vmatpush3.bf16.msra.mxu1 %v16031_v51  ;;  %v6492_v51 = vand.u32 4294901760, %v16114_v40  ;;  %v6514_v62 = vsub.f32 %v16122_v44, %v6513_v59  ;;  %v16170_v22 = vpack.c.bf16 %v6513_v59, %v6506_v58 }
 0xc35   : > { %14682 = vmatprep.subr.bf16.mxu1 %v15376_v0 }
 0xc36   : > { %v6493_v53 = vsub.f32 %v16114_v40, %v6492_v51  ;;  %v6515_v2 = vand.u32 4294901760, %v6514_v62  ;;  %v16168_v21 = vpack.c.bf16 %v6499_v52, %v6492_v51 }
 0xc37   : > { %13852 = vmatmul.mubr.f32.vlgmr.msra.gmra.mrb[16].mxu1 %v5945_v14  ;;  %v14671_v14 = vpack.c.bf16 %v16116_v41, %v16114_v40  ;;  %v12869_v41 = vld [vmem:[%s16948_s1] ss:$0 sm:$0xff] }
 0xc38   : > { %13927 = vmatprep.mubr.msk.f32.mxu1 %vm15377_vm0, %v15378_v1  ;;  %14684 = vmatpush3.bf16.msra.mxu1 %v16078_v26  ;;  %v6494_v56 = vand.u32 4294901760, %v6493_v53  ;;  %v16148_v5 = vpack.c.bf16 %v6515_v2, %v6508_v63 }
 0xc39   : > { %14685 = vmatprep.subr.bf16.mxu1 %v15376_v0 }
 0xc3a   : > { %v16142_v60 = vpack.c.bf16 %v6501_v57, %v6494_v56 }
 0xc3c   : > { %14687 = vmatpush3.bf16.msra.mxu1 %v16090_v29 }
 0xc3d   : > { %14688 = vmatprep.subr.bf16.mxu1 %v15376_v0 }
 0xc40   : > { %14690 = vmatpush3.bf16.msra.mxu1 %v16102_v34 }
 0xc41   : > { %14691 = vmatprep.subr.bf16.mxu1 %v15376_v0 }
 0xc44   : > { %14693 = vmatpush3.bf16.msra.mxu1 %v16118_v42 }
 0xc45   : > { %14706 = vmatprep.subr.bf16.mxu1 %v15376_v0 }
 0xd0a   : > { %v6357_v27 = vpop.f32.mrb[16].mxu1 }
 0xd0b   : > { %v14901_v28 = vadd.f32 %v12868_v25, %v6357_v27  ;;  %v13853_v50 = vpop.f32.mrb[17].mxu1  ;;  %v6971_v25 = vld [vmem:[%s16944_s6] sm:$0xff]  ;;  %v6972_v27 = vld [vmem:[%s16944_s6 + $0x8] sm:$0xff] }
 0xd0c   : > { %v6982_v50 = vand.u32 4294901760, %v6972_v27 }
 0xd0d   : > { %v6362_v54 = vmul.f32 0.70710677, %v14901_v28  ;;  %v6361_v4 = vmul.f32 0.5, %v14901_v28  ;;  %v6979_v28 = vand.u32 4294901760, %v6971_v25 }
 0xd0f   : > { %v6363_v30 = vand.u32 2147483647, %v6362_v54  ;;  %vm6383_vm5 = vcmp.ge.f32.partialorder %v6362_v54, 0.0  ;;  %v6974_v54 = vld [vmem:[%s16944_s6 + $0x18] sm:$0xff] }
 0xd11   : > { %v6364_v31 = vmul.f32 0.3275911, %v6363_v30  ;;  %v6377_v33 = vsub.f32 0.0, %v6363_v30 }
 0xd13   : > { %v6365_v32 = vadd.f32 1.0, %v6364_v31  ;;  %v6378_v36 = vmul.f32 %v6377_v33, %v6363_v30  ;;  %v6988_v31 = vand.u32 4294901760, %v6974_v54  ;;  %v7059_v33 = vsub.f32 %v6971_v25, %v6979_v28 }
 0xd15   : > { %15204 = vrcp.f32 %v6365_v32  ;;  %v6379_v51 = vmul.f32 1.442695, %v6378_v36  ;;  %v16250_v32 = vpack.c.bf16 %v6982_v50, %v6979_v28 }
 0xd17   : > { %15206 = vpow2.f32 %v6379_v51  ;;  %v7060_v51 = vand.u32 4294901760, %v7059_v33 }
 0xd1f   : > { %v15205_v35 = vpop.eup %15204 }
 0xd20   : > { %v6368_v38 = vmul.f32 1.0614054, %v15205_v35 }
 0xd21   : > { %v15207_v61 = vpop.eup %15206 }
 0xd22   : > { %v6369_v39 = vadd.f32 -1.4531521, %v6368_v38  ;;  %v7080_v38 = vsub.f32 %v6974_v54, %v6988_v31 }
 0xd24   : > { %v6370_v52 = vmul.f32 %v15205_v35, %v6369_v39 }
 0xd26   : > { %v6371_v53 = vadd.f32 1.4214138, %v6370_v52 }
 0xd28   : > { %v6372_v55 = vmul.f32 %v15205_v35, %v6371_v53  ;;  %v7061_v53 = vsub.f32 %v7059_v33, %v7060_v51 }
 0xd2a   : > { %v6373_v56 = vadd.f32 -0.28449672, %v6372_v55 }
 0xd2c   : > { %v6374_v57 = vmul.f32 %v15205_v35, %v6373_v56  ;;  %v7062_v56 = vand.u32 4294901760, %v7061_v53 }
 0xd2e   : > { %v6375_v58 = vadd.f32 0.2548296, %v6374_v57 }
 0xd30   : > { %v6376_v59 = vmul.f32 %v15205_v35, %v6375_v58  ;;  %v7066_v35 = vsub.f32 %v6972_v27, %v6982_v50 }
 0xd32   : > { %v6381_v62 = vmul.f32 %v15207_v61, %v6376_v59  ;;  %v7067_v52 = vand.u32 4294901760, %v7066_v35  ;;  %v7081_v59 = vand.u32 4294901760, %v7080_v38 }
 0xd34   : > { %v6382_v63 = vsub.f32 1.0, %v6381_v62  ;;  %v7068_v55 = vsub.f32 %v7066_v35, %v7067_v52 }
 0xd36   : > { %v6384_v2 = vsub.f32 0.0, %v6382_v63  ;;  %v7069_v57 = vand.u32 4294901760, %v7068_v55 }
 0xd38   : > { %v6385_v3 = vsel %vm6383_vm5, %v6382_v63, %v6384_v2  ;;  %v14725_v61 = vpack.c.bf16 %v7069_v57, %v7062_v56  ;;  %v7082_v63 = vsub.f32 %v7080_v38, %v7081_v59 }
 0xd39   : > { %v6386_v6 = vadd.f32 1.0, %v6385_v3 }
 0xd3a   : > { %v7083_v3 = vand.u32 4294901760, %v7082_v63 }
 0xd3b   : > { %v6387_v7 = vmul.f32 %v6386_v6, %v6361_v4  ;;  %v14731_v6 = vpack.c.bf16 %v7066_v35, %v7059_v33 }
 0xd3d   : > { %v6404_v8 = vsel %vm6402_vm6, %v6387_v7, 0 }
 0xd3e   : > { %v6479_v37 = vand.u32 4294901760, %v6404_v8 }
 0xd40   : > { %v6480_v9 = vsub.f32 %v6404_v8, %v6479_v37  ;;  %v14743_v8 = vpack.c.bf16 %v7067_v52, %v7060_v51 }
 0xd42   : > { %v6481_v10 = vand.u32 4294901760, %v6480_v9 }
 0xd44   : > { %13928 = vmatmul.mubr.f32.vlgmr.msra.gmra.mrb[18].mxu1 %v6481_v10  ;;  %v6482_v12 = vsub.f32 %v6480_v9, %v6481_v10 }
 0xd45   : > { %14708 = vmatpush3.bf16.msra.mxu1 %v16078_v26  ;;  %13965 = vmatprep.mubr.msk.f32.mxu1 %vm15377_vm0, %v15378_v1 }
 0xd46   : > { %14709 = vmatprep.subr.bf16.mxu1 %v15376_v0  ;;  %v6483_v45 = vand.u32 4294901760, %v6482_v12 }
 0xd48   : > { %13871 = vmatmul.mubr.f32.vlgmr.msra.gmra.mrb[18].mxu0 %v6483_v45 }
 0xd49   : > { %14660 = vmatpush3.bf16.msra.mxu0 %v16142_v60  ;;  %14711 = vmatpush3.bf16.msra.mxu1 %v16090_v29 }
 0xd4a   : > { %14661 = vmatprep.subr.bf16.mxu0 %v15376_v0  ;;  %14712 = vmatprep.subr.bf16.mxu1 %v15376_v0 }
 0xd4b   : > { %13889 = vmatprep.mubr.msk.f32.mxu0 %vm15377_vm0, %v15378_v1 }
 0xd4d   : > { %14663 = vmatpush3.bf16.msra.mxu0 %v16148_v5  ;;  %14714 = vmatpush3.bf16.msra.mxu1 %v16102_v34 }
 0xd4e   : > { %14664 = vmatprep.subr.bf16.mxu0 %v15376_v0  ;;  %14715 = vmatprep.subr.bf16.mxu1 %v15376_v0 }
 0xd51   : > { %14666 = vmatpush3.bf16.msra.mxu0 %v16154_v11  ;;  %14717 = vmatpush3.bf16.msra.mxu1 %v16118_v42 }
 0xd52   : > { %14667 = vmatprep.subr.bf16.mxu0 %v15376_v0  ;;  %14034 = vmatprep.subr.mxu1 %v15378_v1 }
 0xd54   : > { %13966 = vmatmul.mubr.f32.vlgmr.msra.gmra.mrb[20].mxu1 %v6479_v37 }
 0xd55   : > { %14669 = vmatpush3.bf16.msra.mxu0 %v16158_v17  ;;  %14036 = vmatprep.mubr.msk.f32.mxu1 %vm15377_vm0, %v15378_v1 }
 0xd56   : > { %14670 = vmatprep.subr.bf16.mxu0 %v15376_v0 }
 0xd58   : > { %13890 = vmatmul.mubr.f32.vlgmr.msra.gmra.mrb[20].mxu0 %v6479_v37 }
 0xd59   : > { %14672 = vmatpush3.bf16.msra.mxu0 %v14671_v14  ;;  %13908 = vmatprep.mubr.msk.f32.mxu0 %vm15377_vm0, %v15378_v1 }
 0xd5a   : > { %14673 = vmatprep.subr.bf16.mxu0 %v15376_v0 }
 0xd5d   : > { %14675 = vmatpush3.bf16.msra.mxu0 %v14674_v18 }
 0xd5e   : > { %14676 = vmatprep.subr.bf16.mxu0 %v15376_v0 }
 0xd61   : > { %14678 = vmatpush3.bf16.msra.mxu0 %v14677_v19 }
 0xd62   : > { %14679 = vmatprep.subr.bf16.mxu0 %v15376_v0 }
 0xd65   : > { %14681 = vmatpush3.bf16.msra.mxu0 %v14680_v20 }
 0xd66   : > { %14694 = vmatprep.subr.bf16.mxu0 %v15376_v0 }
 0xd68   : > { %13909 = vmatmul.mubr.f32.vlgmr.msra.gmra.mrb[22].mxu0 %v6480_v9 }
 0xd69   : > { %14696 = vmatpush3.bf16.msra.mxu0 %v16168_v21  ;;  %13946 = vmatprep.mubr.msk.f32.mxu0 %vm15377_vm0, %v15378_v1 }
 0xd6a   : > { %14697 = vmatprep.subr.bf16.mxu0 %v15376_v0 }
 0xd6d   : > { %14699 = vmatpush3.bf16.msra.mxu0 %v16170_v22 }
 0xd6e   : > { %14700 = vmatprep.subr.bf16.mxu0 %v15376_v0 }
 0xd71   : > { %14702 = vmatpush3.bf16.msra.mxu0 %v16172_v23 }
 0xd72   : > { %14703 = vmatprep.subr.bf16.mxu0 %v15376_v0 }
 0xd75   : > { %14705 = vmatpush3.bf16.msra.mxu0 %v16174_v24 }
 0xd76   : > { %14718 = vmatprep.subr.bf16.mxu0 %v15376_v0 }
 0xd78   : > { %13947 = vmatmul.mubr.f32.vlgmr.msra.gmra.mrb[24].mxu0 %v6479_v37 }
 0xd79   : > { %13976 = vmatprep.mubr.msk.f32.mxu0 %vm15377_vm0, %v15378_v1  ;;  %14720 = vmatpush3.bf16.msra.mxu0 %v16250_v32 }
 0xd7a   : > { %14721 = vmatprep.subr.bf16.mxu0 %v15376_v0 }
 0xe17   : > { %v6765_v26 = vpop.f32.mrb[18].mxu1 }
 0xe18   : > { %v13929_v29 = vpop.f32.mrb[19].mxu1 }
 0xe1b   : > { %v6485_v34 = vpop.f32.mrb[18].mxu0 }
 0xe1c   : > { %v13872_v40 = vpop.f32.mrb[19].mxu0  ;;  %v6486_v44 = vadd.f32 %v12869_v41, %v6485_v34  ;;  %v12871_v34 = vld [vmem:[%s16950_s21] ss:$0 sm:$0xff] }
 0xe27   : > { %v6939_v42 = vpop.f32.mrb[20].mxu1 }
 0xe28   : > { %v13967_v43 = vpop.f32.mrb[21].mxu1 }
 0xe2b   : > { %v6596_v46 = vpop.f32.mrb[20].mxu0 }
 0xe2c   : > { %v6597_v47 = vadd.f32 %v6596_v46, %v6486_v44  ;;  %v13891_v48 = vpop.f32.mrb[21].mxu0 }
 0xe3b   : > { %v6684_v49 = vpop.f32.mrb[22].mxu0 }
 0xe3c   : > { %v6685_v60 = vadd.f32 %v6684_v49, %v6597_v47  ;;  %v13910_v5 = vpop.f32.mrb[23].mxu0 }
 0xe3e   : > { %v6766_v11 = vadd.f32 %v6765_v26, %v6685_v60  ;;  %v12870_v26 = vld [vmem:[%s16949_s25] ss:$0 sm:$0xff] }
 0xe3f   : > { %v15234_v60 = vld [vmem:[%s16868_s7] ss:$0 sm:$0xff] }
 0xe4b   : > { %v6860_v13 = vpop.f32.mrb[24].mxu0 }
 0xe4c   : > { %v6861_v15 = vadd.f32 %v6860_v13, %v6766_v11  ;;  %v13948_v17 = vpop.f32.mrb[25].mxu0 }
 0xe4e   : > { %v6940_v14 = vadd.f32 %v6939_v42, %v6861_v15 }
 0xe50   : > { %v6943_v18 = vadd.f32 %v6940_v14, %v16042_v16  ;;  %v6973_v16 = vld [vmem:[%s16944_s6 + $0x10] sm:$0xff]  ;;  %s16816_s6 = scalar_lea.hbm %s16959_s5, %s12873_s3 }
 0xe51   : > { %v6985_v30 = vand.u32 4294901760, %v6973_v16 }
 0xe52   : > { %v6944_v19 = vsel %vm1081_vm2, %v6943_v18, 0.0 }
 0xe53   : > { %6945 = vadd.xlane.f32.xlu0 %v6944_v19  ;;  %v7073_v36 = vsub.f32 %v6973_v16, %v6985_v30  ;;  %v16253_v39 = vpack.c.bf16 %v6988_v31, %v6985_v30 }
 0xe55   : > { %14723 = vmatpush3.bf16.msra.mxu0 %v16253_v39  ;;  %v7074_v58 = vand.u32 4294901760, %v7073_v36  ;;  %v14734_v7 = vpack.c.bf16 %v7080_v38, %v7073_v36 }
 0xe56   : > { %14724 = vmatprep.subr.bf16.mxu0 %v15376_v0 }
 0xe57   : > { %v7075_v62 = vsub.f32 %v7073_v36, %v7074_v58  ;;  %v14746_v37 = vpack.c.bf16 %v7081_v59, %v7074_v58 }
 0xe59   : > { %v7076_v2 = vand.u32 4294901760, %v7075_v62 }
 0xe5b   : > { %v14728_v4 = vpack.c.bf16 %v7083_v3, %v7076_v2 }
 0xee0   : > { %v6946_v20 = vpop.xlane.xlu0 %6945 }
 0xee1   : > { %v6947_v21 = vmul.f32 0.03125, %v6946_v20 }
 0xee3   : > { %v6948_v22 = vsub.f32 %v6943_v18, %v6947_v21 }
 0xee5   : > { %v6949_v23 = vmul.f32 %v6948_v22, %v6948_v22 }
 0xee7   : > { %v6950_v24 = vsel %vm1081_vm2, %v6949_v23, 0.0 }
 0xee8   : > { %6951 = vadd.xlane.f32.xlu0 %v6950_v24 }
 0xf75   : > { %v6952_v9 = vpop.xlane.xlu0 %6951 }
 0xf76   : > { %v6953_v10 = vmul.f32 0.03125, %v6952_v9 }
 0xf78   : > { %v6954_v12 = vadd.f32 1e-12, %v6953_v10 }
 0xf7a   : > { %15208 = vrsqrt.f32 %v6954_v12 }
 0xf84   : > { %v15209_v45 = vpop.eup %15208 }
 0xf85   : > { %v6956_v29 = vmul.f32 %v15209_v45, %v6948_v22 }
 0xf87   : > { %v6963_v40 = vmul.f32 %v12870_v26, %v6956_v29 }
 0xf89   : > { %v6970_v41 = vadd.f32 %v12871_v34, %v6963_v40 }
 0xf8b   : > { %v6976_v42 = vsel %vm1081_vm2, %v6970_v41, 0 }
 0xf8c   : > { %v7047_v43 = vand.u32 4294901760, %v6976_v42 }
 0xf8e   : > { %v7048_v44 = vsub.f32 %v6976_v42, %v7047_v43 }
 0xf90   : > { %v7049_v46 = vand.u32 4294901760, %v7048_v44 }
 0xf92   : > { %v7050_v47 = vsub.f32 %v7048_v44, %v7049_v46 }
 0xf94   : > { %v7051_v48 = vand.u32 4294901760, %v7050_v47 }
 0xf96   : > { %13977 = vmatmul.mubr.f32.vlgmr.msra.gmra.mrb[26].mxu0 %v7051_v48 }
 0xf97   : > { %14726 = vmatpush3.bf16.msra.mxu0 %v14725_v61  ;;  %13987 = vmatprep.mubr.msk.f32.mxu0 %vm15377_vm0, %v15378_v1 }
 0xf98   : > { %14727 = vmatprep.subr.bf16.mxu0 %v15376_v0 }
 0xf9b   : > { %14729 = vmatpush3.bf16.msra.mxu0 %v14728_v4 }
 0xf9c   : > { %14730 = vmatprep.subr.bf16.mxu0 %v15376_v0 }
 0xf9e   : > { %13988 = vmatmul.mubr.f32.vlgmr.msra.gmra.mrb[26].mxu0 %v7047_v43 }
 0xf9f   : > { %14732 = vmatpush3.bf16.msra.mxu0 %v14731_v6  ;;  %13998 = vmatprep.mubr.msk.f32.mxu0 %vm15377_vm0, %v15378_v1 }
 0xfa0   : > { %14733 = vmatprep.subr.bf16.mxu0 %v15376_v0 }
 0xfa3   : > { %14735 = vmatpush3.bf16.msra.mxu0 %v14734_v7 }
 0xfa4   : > { %14736 = vmatprep.subr.bf16.mxu0 %v15376_v0 }
 0xfa6   : > { %13999 = vmatmul.mubr.f32.vlgmr.msra.gmra.mrb[26].mxu0 %v7048_v44 }
 0xfa7   : > { %14738 = vmatpush3.bf16.msra.mxu0 %v16250_v32  ;;  %14009 = vmatprep.mubr.msk.f32.mxu0 %vm15377_vm0, %v15378_v1 }
 0xfa8   : > { %14739 = vmatprep.subr.bf16.mxu0 %v15376_v0 }
 0xfab   : > { %14741 = vmatpush3.bf16.msra.mxu0 %v16253_v39 }
 0xfac   : > { %14742 = vmatprep.subr.bf16.mxu0 %v15376_v0 }
 0xfae   : > { %14010 = vmatmul.mubr.f32.vlgmr.msra.gmra.mrb[26].mxu0 %v7049_v46 }
 0xfaf   : > { %14744 = vmatpush3.bf16.msra.mxu0 %v14743_v8  ;;  %14020 = vmatprep.mubr.msk.f32.mxu0 %vm15377_vm0, %v15378_v1 }
 0xfb0   : > { %14745 = vmatprep.subr.bf16.mxu0 %v15376_v0 }
 0xfb3   : > { %14747 = vmatpush3.bf16.msra.mxu0 %v14746_v37 }
 0xfb4   : > { %14748 = vmatprep.subr.bf16.mxu0 %v15376_v0 }
 0xfb6   : > { %14021 = vmatmul.mubr.f32.vlgmr.msra.gmra.mrb[26].mxu0 %v7047_v43 }
 0xfb7   : > { %14750 = vmatpush3.bf16.msra.mxu0 %v16250_v32  ;;  %14031 = vmatprep.mubr.msk.f32.mxu0 %vm15377_vm0, %v15378_v1 }
 0xfb8   : > { %14751 = vmatprep.subr.bf16.mxu0 %v15376_v0 }
 0xfbb   : > { %14753 = vmatpush3.bf16.msra.mxu0 %v16253_v39 }
 0xfbc   : > { %14094 = vmatprep.subr.mxu0 %v15378_v1 }
 0xfbe   : > { %14032 = vmatmul.mubr.f32.vlgmr.msra.gmra.mrb[26].mxu0 %v7047_v43 }
 0xfbf   : > { %14096 = vmatprep.mubr.msk.f32.mxu0 %vm15377_vm0, %v15378_v1 }
0x1091   : > { %v7459_v49 = vpop.f32.mrb[26].mxu0 }
0x1092   : > { %v16294_v5 = vadd.f32 %v15234_v60, %v7459_v49  ;;  %v14033_v11 = vpop.f32.mrb[27].mxu0 }
0x1094   : > { %7478 = vrot.lane.b32.xlu0 %v16294_v5, %s15379_s2  ;;  %7472 = vrot.lane.b32.xlu1 %v16294_v5, %s16951_s14  ;;  %v7463_v13 = vmul.f32 0.35355338, %v16294_v5 }
0x1096   : > { %v7480_v15 = vsel %vm1650_vm3, %v7463_v13, 0 }
0x1097   : > { %v7550_v17 = vand.u32 4294901760, %v7480_v15 }
0x1098   : > { %7474 = vrot.lane.b32.xlu1 %v16294_v5, %s16952_s17 }
0x1099   : > { %v7551_v14 = vsub.f32 %v7480_v15, %v7550_v17 }
0x109b   : > { %v7552_v18 = vand.u32 4294901760, %v7551_v14 }
0x109c   : > { %7476 = vrot.lane.b32.xlu1 %v16294_v5, %s16953_s26 }
0x109d   : > { %v7553_v22 = vsub.f32 %v7551_v14, %v7552_v18 }
0x109f   : > { %v7554_v27 = vand.u32 4294901760, %v7553_v22 }
0x10a0   : > { %7465 = vrot.lane.b32.xlu1 %v7463_v13, %s16951_s14  ;;  %s16957_s14 = smov 24  }
0x10a4   : > { %7467 = vrot.lane.b32.xlu1 %v7463_v13, %s16952_s17  ;;  %s16955_s17 = smov 8  }
0x1106   : > { %v7479_v19 = vpop.permute.xlu0 %7478  ;;  %v16308_v20 = vpop.permute.xlu1 %7472 }
0x1107   : > { %v7482_v21 = vsel %vm1650_vm3, %v7479_v19, 0  ;;  %7930 = vrot.lane.b32.xlu0 %v16308_v20, %s15379_s2 }
0x1108   : > { %v7485_v23 = vand.u32 4294901760, %v7482_v21 }
0x110a   : > { %v7562_v24 = vsub.f32 %v7482_v21, %v7485_v23  ;;  %14035 = vmatpush3.xpose.msra.mxu1 %v7485_v23  ;;  %v16313_v25 = vpop.permute.xlu1 %7474 }
0x110b   : > { %7469 = vrot.lane.b32.xlu0 %v7463_v13, %s16953_s26  ;;  %8382 = vrot.lane.b32.xlu1 %v16313_v25, %s15379_s2  ;;  %s16956_s26 = smov 16  }
0x110c   : > { %v7563_v16 = vand.u32 4294901760, %v7562_v24  ;;  %14039 = vmatprep.subr.mxu1 %v15378_v1 }
0x110d   : > { %14037 = vmatmul.mubr.f32.vlgmr.msra.gmra.mrb[22].mxu1 %v7554_v27 }
0x110e   : > { %v7564_v28 = vsub.f32 %v7562_v24, %v7563_v16  ;;  %v16319_v50 = vpop.permute.xlu1 %7476  ;;  %14041 = vmatprep.mubr.msk.f32.mxu1 %vm15377_vm0, %v15378_v1 }
0x110f   : > { %8834 = vrot.lane.b32.xlu0 %v16319_v50, %s15379_s2  ;;  %s16954_s2 = smov 64  }
0x1110   : > { %v7565_v54 = vand.u32 4294901760, %v7564_v28 }
0x1112   : > { %14040 = vmatpush3.xpose.msra.mxu1 %v7565_v54  ;;  %v7466_v30 = vpop.permute.xlu1 %7465 }
0x1113   : > { %14044 = vmatprep.subr.mxu1 %v15378_v1  ;;  %v7932_v31 = vsel %vm1650_vm3, %v7466_v30, 0 }
0x1114   : > { %v16341_v33 = vand.u32 4294901760, %v7932_v31 }
0x1115   : > { %14042 = vmatmul.mubr.f32.vlgmr.msra.gmra.mrb[22].mxu1 %v7550_v17 }
0x1116   : > { %14045 = vmatpush3.xpose.msra.mxu1 %v7562_v24  ;;  %14046 = vmatprep.mubr.msk.f32.mxu1 %vm15377_vm0, %v15378_v1  ;;  %v7468_v32 = vpop.permute.xlu1 %7467  ;;  %v8003_v36 = vsub.f32 %v7932_v31, %v16341_v33 }
0x1117   : > { %14049 = vmatprep.subr.mxu1 %v15378_v1  ;;  %v8384_v35 = vsel %vm1650_vm3, %v7468_v32, 0 }
0x1118   : > { %v16345_v38 = vand.u32 4294901760, %v8384_v35  ;;  %v8004_v39 = vand.u32 4294901760, %v8003_v36 }
0x111a   : > { %v8455_v51 = vsub.f32 %v8384_v35, %v16345_v38  ;;  %v8005_v53 = vsub.f32 %v8003_v36, %v8004_v39 }
0x111c   : > { %v8456_v55 = vand.u32 4294901760, %v8455_v51  ;;  %v8006_v61 = vand.u32 4294901760, %v8005_v53 }
0x111d   : > { %14047 = vmatmul.mubr.f32.vlgmr.msra.gmra.mrb[22].mxu1 %v7551_v14 }
0x111e   : > { %14050 = vmatpush3.xpose.msra.mxu1 %v7485_v23  ;;  %14051 = vmatprep.mubr.msk.f32.mxu1 %vm15377_vm0, %v15378_v1  ;;  %v8457_v62 = vsub.f32 %v8455_v51, %v8456_v55 }
0x111f   : > { %14054 = vmatprep.subr.mxu1 %v15378_v1 }
0x1120   : > { %v8458_v7 = vand.u32 4294901760, %v8457_v62 }
0x1125   : > { %14052 = vmatmul.mubr.f32.vlgmr.msra.gmra.mrb[22].mxu1 %v7552_v18 }
0x1126   : > { %14055 = vmatpush3.xpose.msra.mxu1 %v7563_v16  ;;  %14056 = vmatprep.mubr.msk.f32.mxu1 %vm15377_vm0, %v15378_v1 }
0x1127   : > { %14059 = vmatprep.subr.mxu1 %v15378_v1 }
0x112d   : > { %14057 = vmatmul.mubr.f32.vlgmr.msra.gmra.mrb[22].mxu1 %v7550_v17 }
0x112e   : > { %14060 = vmatpush3.xpose.msra.mxu1 %v7485_v23  ;;  %14061 = vmatprep.mubr.msk.f32.mxu1 %vm15377_vm0, %v15378_v1 }
0x112f   : > { %14064 = vmatprep.subr.mxu1 %v15378_v1 }
0x1135   : > { %14062 = vmatmul.mubr.f32.vlgmr.msra.gmra.mrb[22].mxu1 %v7550_v17 }
0x1136   : > { %14066 = vmatprep.mubr.msk.f32.mxu1 %vm15377_vm0, %v15378_v1 }
0x1179   : > { %v7931_v52 = vpop.permute.xlu0 %7930 }
0x117a   : > { %v7934_v56 = vsel %vm1650_vm3, %v7931_v52, 0 }
0x117b   : > { %v7937_v57 = vand.u32 4294901760, %v7934_v56 }
0x117d   : > { %v8014_v58 = vsub.f32 %v7934_v56, %v7937_v57  ;;  %v8383_v59 = vpop.permute.xlu1 %8382  ;;  %14065 = vmatpush3.xpose.msra.mxu1 %v7937_v57  ;;  %v7470_v12 = vpop.permute.xlu0 %7469 }
0x117e   : > { %v8386_v63 = vsel %vm1650_vm3, %v8383_v59, 0  ;;  %14069 = vmatprep.subr.mxu1 %v15378_v1  ;;  %v8836_v26 = vsel %vm1650_vm3, %v7470_v12, 0 }
0x117f   : > { %v8015_v2 = vand.u32 4294901760, %v8014_v58  ;;  %v8389_v3 = vand.u32 4294901760, %v8386_v63  ;;  %v8906_v34 = vand.u32 4294901760, %v8836_v26 }
0x1180   : > { %14067 = vmatmul.mubr.f32.vlgmr.msra.gmra.mrb[24].mxu1 %v8006_v61 }
0x1181   : > { %v8016_v4 = vsub.f32 %v8014_v58, %v8015_v2  ;;  %v8466_v6 = vsub.f32 %v8386_v63, %v8389_v3  ;;  %14095 = vmatpush3.xpose.msra.mxu0 %v8389_v3  ;;  %14071 = vmatprep.mubr.msk.f32.mxu1 %vm15377_vm0, %v15378_v1  ;;  %v8835_v45 = vpop.permute.xlu0 %8834  ;;  %v8907_v41 = vsub.f32 %v8836_v26, %v8906_v34 }
0x1182   : > { %14099 = vmatprep.subr.mxu0 %v15378_v1  ;;  %v8838_v29 = vsel %vm1650_vm3, %v8835_v45, 0 }
0x1183   : > { %v8017_v8 = vand.u32 4294901760, %v8016_v4  ;;  %v8467_v37 = vand.u32 4294901760, %v8466_v6  ;;  %v8841_v40 = vand.u32 4294901760, %v8838_v29  ;;  %v8908_v43 = vand.u32 4294901760, %v8907_v41 }
0x1184   : > { %14097 = vmatmul.mubr.f32.vlgmr.msra.gmra.mrb[28].mxu0 %v8458_v7 }
0x1185   : > { %v8468_v9 = vsub.f32 %v8466_v6, %v8467_v37  ;;  %14070 = vmatpush3.xpose.msra.mxu1 %v8017_v8  ;;  %14101 = vmatprep.mubr.msk.f32.mxu0 %vm15377_vm0, %v15378_v1  ;;  %v8918_v42 = vsub.f32 %v8838_v29, %v8841_v40  ;;  %v8909_v46 = vsub.f32 %v8907_v41, %v8908_v43 }
0x1186   : > { %14074 = vmatprep.subr.mxu1 %v15378_v1 }
0x1187   : > { %v8469_v10 = vand.u32 4294901760, %v8468_v9  ;;  %v8919_v44 = vand.u32 4294901760, %v8918_v42  ;;  %v8910_v48 = vand.u32 4294901760, %v8909_v46 }
0x1188   : > { %14072 = vmatmul.mubr.f32.vlgmr.msra.gmra.mrb[24].mxu1 %v16341_v33 }
0x1189   : > { %14075 = vmatpush3.xpose.msra.mxu1 %v8014_v58  ;;  %14100 = vmatpush3.xpose.msra.mxu0 %v8469_v10  ;;  %v8920_v47 = vsub.f32 %v8918_v42, %v8919_v44 }
0x118a   : > { %14104 = vmatprep.subr.mxu0 %v15378_v1  ;;  %14076 = vmatprep.mubr.msk.f32.mxu1 %vm15377_vm0, %v15378_v1 }
0x118b   : > { %14079 = vmatprep.subr.mxu1 %v15378_v1  ;;  %v8921_v49 = vand.u32 4294901760, %v8920_v47 }
0x118c   : > { %14102 = vmatmul.mubr.f32.vlgmr.msra.gmra.mrb[28].mxu0 %v16345_v38 }
0x118d   : > { %14105 = vmatpush3.xpose.msra.mxu0 %v8466_v6  ;;  %14106 = vmatprep.mubr.msk.f32.mxu0 %vm15377_vm0, %v15378_v1 }
0x118e   : > { %14109 = vmatprep.subr.mxu0 %v15378_v1 }
0x1190   : > { %14077 = vmatmul.mubr.f32.vlgmr.msra.gmra.mrb[24].mxu1 %v8003_v36 }
0x1191   : > { %14080 = vmatpush3.xpose.msra.mxu1 %v7937_v57  ;;  %14081 = vmatprep.mubr.msk.f32.mxu1 %vm15377_vm0, %v15378_v1 }
0x1192   : > { %14084 = vmatprep.subr.mxu1 %v15378_v1 }
0x1194   : > { %14107 = vmatmul.mubr.f32.vlgmr.msra.gmra.mrb[28].mxu0 %v8455_v51 }
0x1195   : > { %14110 = vmatpush3.xpose.msra.mxu0 %v8389_v3  ;;  %14111 = vmatprep.mubr.msk.f32.mxu0 %vm15377_vm0, %v15378_v1 }
0x1196   : > { %14114 = vmatprep.subr.mxu0 %v15378_v1 }
0x1198   : > { %14082 = vmatmul.mubr.f32.vlgmr.msra.gmra.mrb[24].mxu1 %v8004_v39 }
0x1199   : > { %14085 = vmatpush3.xpose.msra.mxu1 %v8015_v2  ;;  %14086 = vmatprep.mubr.msk.f32.mxu1 %vm15377_vm0, %v15378_v1 }
0x119a   : > { %14089 = vmatprep.subr.mxu1 %v15378_v1 }
0x119c   : > { %14112 = vmatmul.mubr.f32.vlgmr.msra.gmra.mrb[28].mxu0 %v8456_v55 }
0x119d   : > { %14115 = vmatpush3.xpose.msra.mxu0 %v8467_v37  ;;  %14116 = vmatprep.mubr.msk.f32.mxu0 %vm15377_vm0, %v15378_v1 }
0x119e   : > { %14119 = vmatprep.subr.mxu0 %v15378_v1 }
0x11a0   : > { %14087 = vmatmul.mubr.f32.vlgmr.msra.gmra.mrb[24].mxu1 %v16341_v33 }
0x11a1   : > { %14090 = vmatpush3.xpose.msra.mxu1 %v7937_v57  ;;  %14091 = vmatprep.mubr.msk.f32.mxu1 %vm15377_vm0, %v15378_v1 }
0x11a2   : > { %14124 = vmatprep.subr.mxu1 %v15378_v1 }
0x11a4   : > { %14117 = vmatmul.mubr.f32.vlgmr.msra.gmra.mrb[28].mxu0 %v16345_v38 }
0x11a5   : > { %14120 = vmatpush3.xpose.msra.mxu0 %v8389_v3  ;;  %14121 = vmatprep.mubr.msk.f32.mxu0 %vm15377_vm0, %v15378_v1 }
0x11a6   : > { %14154 = vmatprep.subr.mxu0 %v15378_v1 }
0x11a8   : > { %14092 = vmatmul.mubr.f32.vlgmr.msra.gmra.mrb[24].mxu1 %v16341_v33 }
0x11a9   : > { %14125 = vmatpush3.xpose.msra.mxu1 %v8841_v40  ;;  %14126 = vmatprep.mubr.msk.f32.mxu1 %vm15377_vm0, %v15378_v1 }
0x11aa   : > { %14129 = vmatprep.subr.mxu1 %v15378_v1 }
0x11ac   : > { %14122 = vmatmul.mubr.f32.vlgmr.msra.gmra.mrb[28].mxu0 %v16345_v38  ;;  %14127 = vmatmul.mubr.f32.vlgmr.msra.gmra.mrb[26].mxu1 %v8910_v48 }
0x11ad   : > { %14130 = vmatpush3.xpose.msra.mxu1 %v8921_v49  ;;  %14131 = vmatprep.mubr.msk.f32.mxu1 %vm15377_vm0, %v15378_v1 }
0x11ae   : > { %14134 = vmatprep.subr.mxu1 %v15378_v1  ;;  %14156 = vmatprep.mubr.msk.f32.mxu0 %vm15377_vm0, %v15378_v1 }
0x11b4   : > { %14132 = vmatmul.mubr.f32.vlgmr.msra.gmra.mrb[26].mxu1 %v8906_v34 }
0x11b5   : > { %14135 = vmatpush3.xpose.msra.mxu1 %v8918_v42  ;;  %14136 = vmatprep.mubr.msk.f32.mxu1 %vm15377_vm0, %v15378_v1 }
0x11b6   : > { %14139 = vmatprep.subr.mxu1 %v15378_v1 }
0x11bc   : > { %14137 = vmatmul.mubr.f32.vlgmr.msra.gmra.mrb[26].mxu1 %v8907_v41 }
0x11bd   : > { %14140 = vmatpush3.xpose.msra.mxu1 %v8841_v40  ;;  %14141 = vmatprep.mubr.msk.f32.mxu1 %vm15377_vm0, %v15378_v1 }
0x11be   : > { %14144 = vmatprep.subr.mxu1 %v15378_v1 }
0x11c4   : > { %14142 = vmatmul.mubr.f32.vlgmr.msra.gmra.mrb[26].mxu1 %v8908_v43 }
0x11c5   : > { %14145 = vmatpush3.xpose.msra.mxu1 %v8919_v44  ;;  %14146 = vmatprep.mubr.msk.f32.mxu1 %vm15377_vm0, %v15378_v1 }
0x11c6   : > { %14149 = vmatprep.subr.mxu1 %v15378_v1 }
0x11cc   : > { %14147 = vmatmul.mubr.f32.vlgmr.msra.gmra.mrb[26].mxu1 %v8906_v34 }
0x11cd   : > { %14150 = vmatpush3.xpose.msra.mxu1 %v8841_v40  ;;  %14151 = vmatprep.mubr.msk.f32.mxu1 %vm15377_vm0, %v15378_v1 }
0x11ce   : > { %14184 = vmatprep.subr.mxu1 %v15378_v1 }
0x11d4   : > { %14152 = vmatmul.mubr.f32.vlgmr.msra.gmra.mrb[26].mxu1 %v8906_v34 }
0x11d5   : > { %14186 = vmatprep.mubr.msk.f32.mxu1 %vm15377_vm0, %v15378_v1 }
0x1208   : > { %v7926_v60 = vpop.f32.mrb[22].mxu1 }
0x1209   : > { %v14063_v11 = vpop.f32.mrb[23].mxu1  ;;  %v9286_v13 = vsel %vm1650_vm3, %v7926_v60, -inf }
0x120a   : > { %9287 = vmax.xlane.f32.xlu1 %v9286_v13 }
0x127b   : > { %v8378_v15 = vpop.f32.mrb[24].mxu1 }
0x127c   : > { %v14093_v17 = vpop.f32.mrb[25].mxu1  ;;  %v9289_v14 = vsel %vm1650_vm3, %v8378_v15, -inf }
0x127d   : > { %9290 = vmax.xlane.f32.xlu0 %v9289_v14 }
0x127f   : > { %v8830_v18 = vpop.f32.mrb[28].mxu0 }
0x1280   : > { %v14123_v19 = vpop.f32.mrb[29].mxu0  ;;  %v9292_v21 = vsel %vm1650_vm3, %v8830_v18, -inf }
0x1281   : > { %9293 = vmax.xlane.f32.xlu0 %v9292_v21 }
0x1297   : > { %v9288_v22 = vpop.xlane.xlu1 %9287 }
0x1298   : > { %v9298_v23 = vsub.f32 %v7926_v60, %v9288_v22 }
0x129a   : > { %v9302_v24 = vmul.f32 1.442695, %v9298_v23 }
0x129c   : > { %15210 = vpow2.f32 %v9302_v24 }
0x12a6   : > { %v15211_v27 = vpop.eup %15210 }
0x12a7   : > { %v9282_v16 = vpop.f32.mrb[26].mxu1  ;;  %v9310_v28 = vsel %vm1650_vm3, %v15211_v27, 0.0 }
0x12a8   : > { %9311 = vadd.xlane.f32.xlu1 %v9310_v28  ;;  %v14153_v54 = vpop.f32.mrb[27].mxu1  ;;  %v9295_v30 = vsel %vm1650_vm3, %v9282_v16, -inf }
0x12a9   : > { %9296 = vmax.xlane.f32.xlu0 %v9295_v30 }
0x12b9   : > { %9342 = vrot.lane.b32.xlu1 %v16294_v5, %s16954_s2 }
0x130a   : > { %v9291_v31 = vpop.xlane.xlu0 %9290 }
0x130b   : > { %v9299_v32 = vsub.f32 %v8378_v15, %v9291_v31 }
0x130d   : > { %v9304_v33 = vmul.f32 1.442695, %v9299_v32 }
0x130e   : > { %v9294_v35 = vpop.xlane.xlu0 %9293 }
0x130f   : > { %15212 = vpow2.f32 %v9304_v33  ;;  %v9300_v36 = vsub.f32 %v8830_v18, %v9294_v35 }
0x1311   : > { %v9306_v38 = vmul.f32 1.442695, %v9300_v36 }
0x1313   : > { %15214 = vpow2.f32 %v9306_v38 }
0x1319   : > { %v16419_v39 = vpop.eup %15212 }
0x131a   : > { %v9313_v51 = vsel %vm1650_vm3, %v16419_v39, 0.0 }
0x131b   : > { %9314 = vadd.xlane.f32.xlu0 %v9313_v51 }
0x131d   : > { %v16423_v52 = vpop.eup %15214 }
0x131e   : > { %v9316_v53 = vsel %vm1650_vm3, %v16423_v52, 0.0 }
0x131f   : > { %9317 = vadd.xlane.f32.xlu1 %v9316_v53 }
0x1330   : > { %10246 = vrot.lane.b32.xlu1 %v16313_v25, %s16954_s2 }
0x1331   : > { %9794 = vrot.lane.b32.xlu0 %v16308_v20, %s16954_s2 }
0x1335   : > { %v9312_v5 = vpop.xlane.xlu1 %9311 }
0x1336   : > { %15216 = vrcp.f32 %v9312_v5  ;;  %v9297_v55 = vpop.xlane.xlu0 %9296 }
0x1337   : > { %v9301_v57 = vsub.f32 %v9282_v16, %v9297_v55 }
0x1339   : > { %v9343_v56 = vpop.permute.xlu1 %9342  ;;  %v9308_v59 = vmul.f32 1.442695, %v9301_v57 }
0x133a   : > { %v9349_v58 = vand.u32 4294901760, %v9343_v56 }
0x133b   : > { %15218 = vpow2.f32 %v9308_v59 }
0x133c   : > { %14155 = vmatpush3.msra.mxu0 %v9349_v58  ;;  %v9426_v25 = vsub.f32 %v9343_v56, %v9349_v58 }
0x133d   : > { %14159 = vmatprep.subr.mxu0 %v15378_v1 }
0x133e   : > { %v9427_v6 = vand.u32 4294901760, %v9426_v25 }
0x1340   : > { %v15217_v61 = vpop.eup %15216  ;;  %v9428_v9 = vsub.f32 %v9426_v25, %v9427_v6 }
0x1341   : > { %v9326_v62 = vmul.f32 %v15217_v61, %v9312_v5 }
0x1342   : > { %v9429_v26 = vand.u32 4294901760, %v9428_v9  ;;  %v11166_v9 = vld [vmem:[%s16869_s8 + $0x8] sm:$0xff] }
0x1343   : > { %v9330_v63 = vsub.f32 2.0, %v9326_v62 }
0x1345   : > { %v9334_v2 = vmul.f32 %v15217_v61, %v9330_v63  ;;  %v16433_v7 = vpop.eup %15218 }
0x1346   : > { %v9319_v10 = vsel %vm1650_vm3, %v16433_v7, 0.0 }
0x1347   : > { %v9338_v3 = vmul.f32 %v15211_v27, %v9334_v2 }
0x1349   : > { %v9346_v4 = vsel %vm1650_vm3, %v9338_v3, 0 }
0x134a   : > { %v9414_v20 = vand.u32 4294901760, %v9346_v4 }
0x134c   : > { %v9415_v8 = vsub.f32 %v9346_v4, %v9414_v20 }
0x134e   : > { %v9416_v37 = vand.u32 4294901760, %v9415_v8 }
0x1350   : > { %9320 = vadd.xlane.f32.xlu0 %v9319_v10  ;;  %v9417_v12 = vsub.f32 %v9415_v8, %v9416_v37 }
0x1352   : > { %v9418_v45 = vand.u32 4294901760, %v9417_v12  ;;  %v11176_v12 = vand.u32 4294901760, %v11166_v9 }
0x1354   : > { %14157 = vmatmul.mubr.f32.vlgmr.msra.gmra.mrb[30].mxu0 %v9418_v45 }
0x1355   : > { %14160 = vmatpush3.msra.mxu0 %v9429_v26  ;;  %14161 = vmatprep.mubr.msk.f32.mxu0 %vm15377_vm0, %v15378_v1  ;;  %v11260_v26 = vsub.f32 %v11166_v9, %v11176_v12 }
0x1356   : > { %14164 = vmatprep.subr.mxu0 %v15378_v1 }
0x135c   : > { %14162 = vmatmul.mubr.f32.vlgmr.msra.gmra.mrb[30].mxu0 %v9414_v20 }
0x135d   : > { %14165 = vmatpush3.msra.mxu0 %v9426_v25  ;;  %14166 = vmatprep.mubr.msk.f32.mxu0 %vm15377_vm0, %v15378_v1 }
0x135e   : > { %14169 = vmatprep.subr.mxu0 %v15378_v1 }
0x1364   : > { %14167 = vmatmul.mubr.f32.vlgmr.msra.gmra.mrb[30].mxu0 %v9415_v8 }
0x1365   : > { %14170 = vmatpush3.msra.mxu0 %v9349_v58  ;;  %14171 = vmatprep.mubr.msk.f32.mxu0 %vm15377_vm0, %v15378_v1 }
0x1366   : > { %10698 = vrot.lane.b32.xlu0 %v16319_v50, %s16954_s2  ;;  %14174 = vmatprep.subr.mxu0 %v15378_v1  ;;  %s16958_s2 = sshll.u32 %s15619_s13, 3 }
0x1367   : > { %s605_s24 = scalar_lea.vmem [#allocation7], %s16958_s2 }
0x1368   : > { %s12771_s23 = sshll.u32 %s605_s24, 4  ;;  %s16818_s23 = int_to_ptr.vmem [resolvable:$true] %s12771_s23 }
0x1369   : > { %s15300_s2 = scalar_lea.vmem %s16818_s23, 128 }
0x136a   : > { %p15301_p4 = scmp.ne.s32.totalorder %s16818_s23, %s15300_s2 }
0x136c   : > { %14172 = vmatmul.mubr.f32.vlgmr.msra.gmra.mrb[30].mxu0 %v9416_v37  ;;  %v11165_v37 = vld [vmem:[%s16869_s8] sm:$0xff]  ;;  %p15302_p6 = pnand %p15301_p4, %p15574_p12 }
0x136d   : > { %14175 = vmatpush3.msra.mxu0 %v9427_v6  ;;  %14176 = vmatprep.mubr.msk.f32.mxu0 %vm15377_vm0, %v15378_v1  ;;  %v11173_v10 = vand.u32 4294901760, %v11165_v37 }
0x136e   : > { %14179 = vmatprep.subr.mxu0 %v15378_v1  ;;  %p15303_p8 = pneg %p15302_p6 }
0x136f   : > { %v11253_v45 = vsub.f32 %v11165_v37, %v11173_v10 }
0x1374   : > { %14177 = vmatmul.mubr.f32.vlgmr.msra.gmra.mrb[30].mxu0 %v9414_v20 }
0x1375   : > { %14180 = vmatpush3.msra.mxu0 %v9349_v58  ;;  %14181 = vmatprep.mubr.msk.f32.mxu0 %vm15377_vm0, %v15378_v1 }
0x1376   : > { %14214 = vmatprep.subr.mxu0 %v15378_v1 }
0x137c   : > { %14182 = vmatmul.mubr.f32.vlgmr.msra.gmra.mrb[30].mxu0 %v9414_v20 }
0x137d   : > { %14216 = vmatprep.mubr.msk.f32.mxu0 %vm15377_vm0, %v15378_v1 }
0x13a8   : > { %v9315_v50 = vpop.xlane.xlu0 %9314 }
0x13a9   : > { %15220 = vrcp.f32 %v9315_v50 }
0x13ac   : > { %v9318_v29 = vpop.xlane.xlu1 %9317  ;;  %v9795_v34 = vpop.permute.xlu0 %9794 }
0x13ad   : > { %15222 = vrcp.f32 %v9318_v29  ;;  %v16456_v40 = vand.u32 4294901760, %v9795_v34 }
0x13af   : > { %14185 = vmatpush3.msra.mxu1 %v16456_v40  ;;  %v9878_v13 = vsub.f32 %v9795_v34, %v16456_v40 }
0x13b0   : > { %v10247_v41 = vpop.permute.xlu1 %10246  ;;  %14189 = vmatprep.subr.mxu1 %v15378_v1 }
0x13b1   : > { %v16460_v42 = vand.u32 4294901760, %v10247_v41  ;;  %v9879_v19 = vand.u32 4294901760, %v9878_v13 }
0x13b3   : > { %v15221_v43 = vpop.eup %15220  ;;  %14215 = vmatpush3.msra.mxu0 %v16460_v42  ;;  %v10330_v21 = vsub.f32 %v10247_v41, %v16460_v42  ;;  %v9880_v16 = vsub.f32 %v9878_v13, %v9879_v19 }
0x13b4   : > { %v9327_v44 = vmul.f32 %v15221_v43, %v9315_v50  ;;  %14219 = vmatprep.subr.mxu0 %v15378_v1  ;;  %v14767_v50 = vpack.c.bf16 %v11260_v26, %v11253_v45 }
0x13b5   : > { %v10331_v28 = vand.u32 4294901760, %v10330_v21  ;;  %v9881_v33 = vand.u32 4294901760, %v9880_v16 }
0x13b6   : > { %v9331_v46 = vsub.f32 2.0, %v9327_v44 }
0x13b7   : > { %v15223_v47 = vpop.eup %15222  ;;  %v10332_v35 = vsub.f32 %v10330_v21, %v10331_v28 }
0x13b8   : > { %v9335_v48 = vmul.f32 %v15221_v43, %v9331_v46  ;;  %v9328_v49 = vmul.f32 %v15223_v47, %v9318_v29  ;;  %v11168_v43 = vld [vmem:[%s16869_s8 + $0x18] sm:$0xff] }
0x13b9   : > { %v11182_v46 = vand.u32 4294901760, %v11168_v43 }
0x13ba   : > { %v9339_v60 = vmul.f32 %v16419_v39, %v9335_v48  ;;  %v9332_v11 = vsub.f32 2.0, %v9328_v49  ;;  %v10333_v39 = vand.u32 4294901760, %v10332_v35 }
0x13bb   : > { %v11274_v48 = vsub.f32 %v11168_v43, %v11182_v46 }
0x13bc   : > { %v9798_v15 = vsel %vm1650_vm3, %v9339_v60, 0  ;;  %v9336_v17 = vmul.f32 %v15223_v47, %v9332_v11  ;;  %v14755_v60 = vpack.c.bf16 %v11176_v12, %v11173_v10  ;;  %v11254_v11 = vand.u32 4294901760, %v11253_v45 }
0x13bd   : > { %v16467_v14 = vand.u32 4294901760, %v9798_v15 }
0x13be   : > { %v9340_v18 = vmul.f32 %v16423_v52, %v9336_v17 }
0x13bf   : > { %v9867_v22 = vsub.f32 %v9798_v15, %v16467_v14 }
0x13c0   : > { %v10250_v23 = vsel %vm1650_vm3, %v9340_v18, 0  ;;  %v11275_v18 = vand.u32 4294901760, %v11274_v48 }
0x13c1   : > { %v16473_v24 = vand.u32 4294901760, %v10250_v23  ;;  %v9868_v27 = vand.u32 4294901760, %v9867_v22 }
0x13c2   : > { %v11276_v16 = vsub.f32 %v11274_v48, %v11275_v18 }
0x13c3   : > { %v10319_v54 = vsub.f32 %v10250_v23, %v16473_v24  ;;  %v9869_v30 = vsub.f32 %v9867_v22, %v9868_v27 }
0x13c5   : > { %v9870_v31 = vand.u32 4294901760, %v9869_v30  ;;  %v10320_v32 = vand.u32 4294901760, %v10319_v54 }
0x13c7   : > { %14187 = vmatmul.mubr.f32.vlgmr.msra.gmra.mrb[28].mxu1 %v9870_v31  ;;  %v10321_v36 = vsub.f32 %v10319_v54, %v10320_v32 }
0x13c8   : > { %14190 = vmatpush3.msra.mxu1 %v9881_v33  ;;  %14191 = vmatprep.mubr.msk.f32.mxu1 %vm15377_vm0, %v15378_v1 }
0x13c9   : > { %v10322_v38 = vand.u32 4294901760, %v10321_v36  ;;  %14194 = vmatprep.subr.mxu1 %v15378_v1 }
0x13cb   : > { %14217 = vmatmul.mubr.f32.vlgmr.msra.gmra.mrb[32].mxu0 %v10322_v38 }
0x13cc   : > { %14220 = vmatpush3.msra.mxu0 %v10333_v39  ;;  %14221 = vmatprep.mubr.msk.f32.mxu0 %vm15377_vm0, %v15378_v1 }
0x13cd   : > { %14224 = vmatprep.subr.mxu0 %v15378_v1 }
0x13cf   : > { %14192 = vmatmul.mubr.f32.vlgmr.msra.gmra.mrb[28].mxu1 %v16467_v14 }
0x13d0   : > { %14195 = vmatpush3.msra.mxu1 %v9878_v13  ;;  %14196 = vmatprep.mubr.msk.f32.mxu1 %vm15377_vm0, %v15378_v1  ;;  %v11261_v13 = vand.u32 4294901760, %v11260_v26 }
0x13d1   : > { %14199 = vmatprep.subr.mxu1 %v15378_v1 }
0x13d2   : > { %v14779_v15 = vpack.c.bf16 %v11261_v13, %v11254_v11 }
0x13d3   : > { %14222 = vmatmul.mubr.f32.vlgmr.msra.gmra.mrb[32].mxu0 %v16473_v24 }
0x13d4   : > { %14225 = vmatpush3.msra.mxu0 %v10330_v21  ;;  %14226 = vmatprep.mubr.msk.f32.mxu0 %vm15377_vm0, %v15378_v1  ;;  %v11262_v21 = vsub.f32 %v11260_v26, %v11261_v13 }
0x13d5   : > { %14229 = vmatprep.subr.mxu0 %v15378_v1 }
0x13d7   : > { %14197 = vmatmul.mubr.f32.vlgmr.msra.gmra.mrb[28].mxu1 %v9867_v22 }
0x13d8   : > { %14200 = vmatpush3.msra.mxu1 %v16456_v40  ;;  %14201 = vmatprep.mubr.msk.f32.mxu1 %vm15377_vm0, %v15378_v1 }
0x13d9   : > { %14204 = vmatprep.subr.mxu1 %v15378_v1 }
0x13db   : > { %14227 = vmatmul.mubr.f32.vlgmr.msra.gmra.mrb[32].mxu0 %v10319_v54 }
0x13dc   : > { %14230 = vmatpush3.msra.mxu0 %v16460_v42  ;;  %14231 = vmatprep.mubr.msk.f32.mxu0 %vm15377_vm0, %v15378_v1 }
0x13dd   : > { %v9321_v51 = vpop.xlane.xlu0 %9320  ;;  %14234 = vmatprep.subr.mxu0 %v15378_v1 }
0x13de   : > { %15224 = vrcp.f32 %v9321_v51 }
0x13df   : > { %14202 = vmatmul.mubr.f32.vlgmr.msra.gmra.mrb[28].mxu1 %v9868_v27 }
0x13e0   : > { %14205 = vmatpush3.msra.mxu1 %v9879_v19  ;;  %14206 = vmatprep.mubr.msk.f32.mxu1 %vm15377_vm0, %v15378_v1  ;;  %v11255_v19 = vsub.f32 %v11253_v45, %v11254_v11  ;;  %v11676_v11 = vld [vmem:[%s16873_s12 + $0x18] sm:$0xff] }
0x13e1   : > { %14209 = vmatprep.subr.mxu1 %v15378_v1  ;;  %v10699_v53 = vpop.permute.xlu0 %10698 }
0x13e2   : > { %v10705_v56 = vand.u32 4294901760, %v10699_v53  ;;  %v11256_v23 = vand.u32 4294901760, %v11255_v19 }
0x13e3   : > { %14232 = vmatmul.mubr.f32.vlgmr.msra.gmra.mrb[32].mxu0 %v10320_v32  ;;  %v11277_v32 = vand.u32 4294901760, %v11276_v16 }
0x13e4   : > { %14235 = vmatpush3.msra.mxu0 %v10331_v28  ;;  %14236 = vmatprep.mubr.msk.f32.mxu0 %vm15377_vm0, %v15378_v1  ;;  %v10782_v59 = vsub.f32 %v10699_v53, %v10705_v56 }
0x13e5   : > { %14239 = vmatprep.subr.mxu0 %v15378_v1 }
0x13e6   : > { %v10783_v63 = vand.u32 4294901760, %v10782_v59 }
0x13e7   : > { %14207 = vmatmul.mubr.f32.vlgmr.msra.gmra.mrb[28].mxu1 %v16467_v14 }
0x13e8   : > { %v15225_v52 = vpop.eup %15224  ;;  %14210 = vmatpush3.msra.mxu1 %v16456_v40  ;;  %14211 = vmatprep.mubr.msk.f32.mxu1 %vm15377_vm0, %v15378_v1  ;;  %v10784_v25 = vsub.f32 %v10782_v59, %v10783_v63 }
0x13e9   : > { %v9329_v5 = vmul.f32 %v15225_v52, %v9321_v51  ;;  %14244 = vmatprep.subr.mxu1 %v15378_v1 }
0x13ea   : > { %v10785_v6 = vand.u32 4294901760, %v10784_v25  ;;  %v15235_v25 = vld [vmem:[%s16870_s9] ss:$0 sm:$0xff] }
0x13eb   : > { %v9333_v55 = vsub.f32 2.0, %v9329_v5  ;;  %14237 = vmatmul.mubr.f32.vlgmr.msra.gmra.mrb[32].mxu0 %v16473_v24 }
0x13ec   : > { %14240 = vmatpush3.msra.mxu0 %v16460_v42  ;;  %14241 = vmatprep.mubr.msk.f32.mxu0 %vm15377_vm0, %v15378_v1  ;;  %v11167_v42 = vld [vmem:[%s16869_s8 + $0x10] sm:$0xff] }
0x13ed   : > { %v9337_v57 = vmul.f32 %v15225_v52, %v9333_v55  ;;  %14754 = vmatprep.subr.bf16.mxu0 %v15376_v0  ;;  %v11179_v44 = vand.u32 4294901760, %v11167_v42 }
0x13ef   : > { %v9341_v58 = vmul.f32 %v16433_v7, %v9337_v57  ;;  %14212 = vmatmul.mubr.f32.vlgmr.msra.gmra.mrb[28].mxu1 %v16467_v14  ;;  %v11267_v47 = vsub.f32 %v11167_v42, %v11179_v44  ;;  %v14758_v17 = vpack.c.bf16 %v11182_v46, %v11179_v44  ;;  %v11673_v46 = vld [vmem:[%s16873_s12] sm:$0xff] }
0x13f0   : > { %14245 = vmatpush3.msra.mxu1 %v10705_v56  ;;  %14246 = vmatprep.mubr.msk.f32.mxu1 %vm15377_vm0, %v15378_v1 }
0x13f1   : > { %v10702_v61 = vsel %vm1650_vm3, %v9341_v58, 0  ;;  %14249 = vmatprep.subr.mxu1 %v15378_v1  ;;  %v14770_v49 = vpack.c.bf16 %v11274_v48, %v11267_v47  ;;  %v11268_v14 = vand.u32 4294901760, %v11267_v47  ;;  %v11675_v48 = vld [vmem:[%s16873_s12 + $0x10] sm:$0xff] }
0x13f2   : > { %v10770_v62 = vand.u32 4294901760, %v10702_v61  ;;  %v11687_v13 = vand.u32 4294901760, %v11675_v48 }
0x13f3   : > { %14242 = vmatmul.mubr.f32.vlgmr.msra.gmra.mrb[32].mxu0 %v16473_v24  ;;  %v14782_v22 = vpack.c.bf16 %v11275_v18, %v11268_v14  ;;  %v11263_v24 = vand.u32 4294901760, %v11262_v21  ;;  %v11269_v27 = vsub.f32 %v11267_v47, %v11268_v14  ;;  %v11674_v47 = vld [vmem:[%s16873_s12 + $0x8] sm:$0xff] }
0x13f4   : > { %v10771_v2 = vsub.f32 %v10702_v61, %v10770_v62  ;;  %14282 = vmatprep.mubr.msk.f32.mxu0 %vm15377_vm0, %v15378_v1  ;;  %14756 = vmatpush3.bf16.msra.mxu0 %v14755_v60  ;;  %v11775_v19 = vsub.f32 %v11675_v48, %v11687_v13 }
0x13f5   : > { %14757 = vmatprep.subr.bf16.mxu0 %v15376_v0  ;;  %v14761_v54 = vpack.c.bf16 %v11263_v24, %v11256_v23  ;;  %v11270_v31 = vand.u32 4294901760, %v11269_v27 }
0x13f6   : > { %v10772_v3 = vand.u32 4294901760, %v10771_v2 }
0x13f7   : > { %v14764_v33 = vpack.c.bf16 %v11277_v32, %v11270_v31 }
0x13f8   : > { %v10773_v4 = vsub.f32 %v10771_v2, %v10772_v3  ;;  %14759 = vmatpush3.bf16.msra.mxu0 %v14758_v17 }
0x13f9   : > { %14760 = vmatprep.subr.bf16.mxu0 %v15376_v0 }
0x13fa   : > { %v10774_v20 = vand.u32 4294901760, %v10773_v4 }
0x13fc   : > { %14247 = vmatmul.mubr.f32.vlgmr.msra.gmra.mrb[30].mxu1 %v10774_v20 }
0x13fd   : > { %14250 = vmatpush3.msra.mxu1 %v10785_v6  ;;  %14251 = vmatprep.mubr.msk.f32.mxu1 %vm15377_vm0, %v15378_v1 }
0x13fe   : > { %14254 = vmatprep.subr.mxu1 %v15378_v1 }
0x1404   : > { %14252 = vmatmul.mubr.f32.vlgmr.msra.gmra.mrb[30].mxu1 %v10770_v62 }
0x1405   : > { %14255 = vmatpush3.msra.mxu1 %v10782_v59  ;;  %14256 = vmatprep.mubr.msk.f32.mxu1 %vm15377_vm0, %v15378_v1 }
0x1406   : > { %14259 = vmatprep.subr.mxu1 %v15378_v1 }
0x140c   : > { %14257 = vmatmul.mubr.f32.vlgmr.msra.gmra.mrb[30].mxu1 %v10771_v2 }
0x140d   : > { %14260 = vmatpush3.msra.mxu1 %v10705_v56  ;;  %14261 = vmatprep.mubr.msk.f32.mxu1 %vm15377_vm0, %v15378_v1 }
0x140e   : > { %14264 = vmatprep.subr.mxu1 %v15378_v1 }
0x1414   : > { %14262 = vmatmul.mubr.f32.vlgmr.msra.gmra.mrb[30].mxu1 %v10772_v3 }
0x1415   : > { %14265 = vmatpush3.msra.mxu1 %v10783_v63  ;;  %14266 = vmatprep.mubr.msk.f32.mxu1 %vm15377_vm0, %v15378_v1 }
0x1416   : > { %14269 = vmatprep.subr.mxu1 %v15378_v1 }
0x141c   : > { %14267 = vmatmul.mubr.f32.vlgmr.msra.gmra.mrb[30].mxu1 %v10770_v62 }
0x141d   : > { %14270 = vmatpush3.msra.mxu1 %v10705_v56  ;;  %14271 = vmatprep.mubr.msk.f32.mxu1 %vm15377_vm0, %v15378_v1 }
0x141e   : > { %14766 = vmatprep.subr.bf16.mxu1 %v15376_v0 }
0x1424   : > { %14272 = vmatmul.mubr.f32.vlgmr.msra.gmra.mrb[30].mxu1 %v10770_v62 }
0x1425   : > { %14304 = vmatprep.mubr.msk.f32.mxu1 %vm15377_vm0, %v15378_v1  ;;  %14768 = vmatpush3.bf16.msra.mxu1 %v14767_v50 }
0x1426   : > { %14769 = vmatprep.subr.bf16.mxu1 %v15376_v0 }
0x1429   : > { %14771 = vmatpush3.bf16.msra.mxu1 %v14770_v49  ;;  %v11681_v49 = vand.u32 4294901760, %v11673_v46 }
0x142a   : > { %14778 = vmatprep.subr.bf16.mxu1 %v15376_v0 }
0x142b   : > { %v11761_v14 = vsub.f32 %v11673_v46, %v11681_v49  ;;  %v12198_v46 = vld [vmem:[%s16946_s15 + $0x30] sm:$0xff] }
0x142c   : > { %v12222_v48 = vand.u32 4294901760, %v12198_v46 }
0x142d   : > { %v11762_v23 = vand.u32 4294901760, %v11761_v14 }
0x142f   : > { %v11763_v27 = vsub.f32 %v11761_v14, %v11762_v23 }
0x144f   : > { %v9790_v7 = vpop.f32.mrb[30].mxu0 }
0x1450   : > { %v14183_v8 = vpop.f32.mrb[31].mxu0 }
0x14c2   : > { %v10242_v29 = vpop.f32.mrb[28].mxu1 }
0x14c3   : > { %11151 = vrot.lane.b32.xlu1 %v10242_v29, %s16955_s17  ;;  %v14213_v34 = vpop.f32.mrb[29].mxu1 }
0x14c6   : > { %v10694_v40 = vpop.f32.mrb[32].mxu0 }
0x14c7   : > { %11155 = vrot.lane.b32.xlu1 %v10694_v40, %s16956_s26  ;;  %v14243_v41 = vpop.f32.mrb[33].mxu0 }
0x14f7   : > { %v11146_v28 = vpop.f32.mrb[30].mxu1 }
0x14f8   : > { %v14273_v30 = vpop.f32.mrb[31].mxu1  ;;  %11159 = vrot.lane.b32.xlu1 %v11146_v28, %s16957_s14  ;;  %v11764_v28 = vand.u32 4294901760, %v11763_v27  ;;  %s15304_s14 = sshll.u32 %s15387_s22, 4  ;;  %s15305_s14 = int_to_ptr.vmem [resolvable:$false] %s15304_s14 }
0x14f9   : > { %v11776_v30 = vand.u32 4294901760, %v11775_v19  ;;  %s15306_s17 = scalar_lea.vmem %s15305_s14, 256  ;;  %p15307_p10 = scmp.lt.s32.totalorder %s16818_s23, %s15305_s14 }
0x14fa   : > { %p15308_p13 = scmp.lt.s32.totalorder %s15306_s17, %s15300_s2 }
0x14fc   : > { %p15309_p3 = por %p15308_p13, %p15307_p10 }
0x14fe   : > { %p15310_p7 = pnand %p15309_p3, %p15303_p8 }
0x1535   : > { %v11152_v35 = vpop.permute.xlu1 %11151 }
0x1536   : > { %v11162_v38 = vsel %vm1650_vm3, %v9790_v7, %v11152_v35 }
0x1539   : > { %v11156_v36 = vpop.permute.xlu1 %11155 }
0x153a   : > { %v11163_v39 = vsel %vm616_vm1, %v11162_v38, %v11156_v36 }
0x156a   : > { %v11160_v51 = vpop.permute.xlu1 %11159 }
0x156b   : > { %v11164_v52 = vsel %vm5335_vm4, %v11163_v39, %v11160_v51 }
0x156c   : > { %v11170_v53 = vsel %vm1081_vm2, %v11164_v52, 0 }
0x156d   : > { %v11241_v5 = vand.u32 4294901760, %v11170_v53 }
0x156f   : > { %v11242_v55 = vsub.f32 %v11170_v53, %v11241_v5 }
0x1571   : > { %v11243_v56 = vand.u32 4294901760, %v11242_v55  ;;  %14305 = vmatmul.mubr.f32.vlgmr.msra.gmra.mrb[32].mxu1 %v11242_v55 }
0x1572   : > { %14780 = vmatpush3.bf16.msra.mxu1 %v14779_v15  ;;  %14326 = vmatprep.mubr.msk.f32.mxu1 %vm15377_vm0, %v15378_v1  ;;  %v11690_v15 = vand.u32 4294901760, %v11676_v11 }
0x1573   : > { %14781 = vmatprep.subr.bf16.mxu1 %v15376_v0  ;;  %v11244_v57 = vsub.f32 %v11242_v55, %v11243_v56 }
0x1574   : > { %v11782_v21 = vsub.f32 %v11676_v11, %v11690_v15 }
0x1575   : > { %v11245_v58 = vand.u32 4294901760, %v11244_v57 }
0x1576   : > { %14783 = vmatpush3.bf16.msra.mxu1 %v14782_v22  ;;  %v16603_v22 = vpack.c.bf16 %v11690_v15, %v11687_v13  ;;  %v11783_v31 = vand.u32 4294901760, %v11782_v21 }
0x1577   : > { %14283 = vmatmul.mubr.f32.vlgmr.msra.gmra.mrb[34].mxu0 %v11245_v58  ;;  %14790 = vmatprep.subr.bf16.mxu1 %v15376_v0 }
0x1578   : > { %14762 = vmatpush3.bf16.msra.mxu0 %v14761_v54  ;;  %14293 = vmatprep.mubr.msk.f32.mxu0 %vm15377_vm0, %v15378_v1  ;;  %v11784_v35 = vsub.f32 %v11782_v21, %v11783_v31 }
0x1579   : > { %14327 = vmatmul.mubr.f32.vlgmr.msra.gmra.mrb[34].mxu1 %v11241_v5  ;;  %14763 = vmatprep.subr.bf16.mxu0 %v15376_v0 }
0x157a   : > { %14348 = vmatprep.mubr.msk.f32.mxu1 %vm15377_vm0, %v15378_v1  ;;  %v11785_v38 = vand.u32 4294901760, %v11784_v35 }
0x157c   : > { %14765 = vmatpush3.bf16.msra.mxu0 %v14764_v33  ;;  %v11777_v33 = vsub.f32 %v11775_v19, %v11776_v30 }
0x157d   : > { %14772 = vmatprep.subr.bf16.mxu0 %v15376_v0 }
0x157e   : > { %v11778_v36 = vand.u32 4294901760, %v11777_v33 }
0x157f   : > { %14294 = vmatmul.mubr.f32.vlgmr.msra.gmra.mrb[36].mxu0 %v11241_v5 }
0x1580   : > { %14774 = vmatpush3.bf16.msra.mxu0 %v14755_v60  ;;  %14315 = vmatprep.mubr.msk.f32.mxu0 %vm15377_vm0, %v15378_v1  ;;  %v14800_v39 = vpack.c.bf16 %v11785_v38, %v11778_v36 }
0x1581   : > { %14775 = vmatprep.subr.bf16.mxu0 %v15376_v0 }
0x1584   : > { %14777 = vmatpush3.bf16.msra.mxu0 %v14758_v17 }
0x1585   : > { %14784 = vmatprep.subr.bf16.mxu0 %v15376_v0 }
0x1587   : > { %14316 = vmatmul.mubr.f32.vlgmr.msra.gmra.mrb[38].mxu0 %v11243_v56 }
0x1588   : > { %14786 = vmatpush3.bf16.msra.mxu0 %v14755_v60  ;;  %14337 = vmatprep.mubr.msk.f32.mxu0 %vm15377_vm0, %v15378_v1  ;;  %v11684_v60 = vand.u32 4294901760, %v11674_v47 }
0x1589   : > { %14787 = vmatprep.subr.bf16.mxu0 %v15376_v0 }
0x158a   : > { %v11768_v18 = vsub.f32 %v11674_v47, %v11684_v60  ;;  %v12199_v47 = vld [vmem:[%s16946_s15 + $0x38] sm:$0xff] }
0x158c   : > { %14789 = vmatpush3.bf16.msra.mxu0 %v14758_v17  ;;  %v16600_v17 = vpack.c.bf16 %v11684_v60, %v11681_v49  ;;  %v11769_v24 = vand.u32 4294901760, %v11768_v18  ;;  %v14803_v51 = vpack.c.bf16 %v11768_v18, %v11761_v14  ;;  %v12225_v49 = vand.u32 4294901760, %v12199_v47 }
0x158d   : > { %14826 = vmatprep.subr.bf16.mxu0 %v15376_v0 }
0x158e   : > { %14792 = vmatpush3.bf16.msra.mxu1 %v16600_v17  ;;  %v11770_v16 = vsub.f32 %v11768_v18, %v11769_v24  ;;  %v14815_v53 = vpack.c.bf16 %v11769_v24, %v11762_v23  ;;  %v16690_v13 = vpack.c.bf16 %v12225_v49, %v12222_v48 }
0x158f   : > { %14338 = vmatmul.mubr.f32.vlgmr.msra.gmra.mrb[40].mxu0 %v11241_v5  ;;  %14793 = vmatprep.subr.bf16.mxu1 %v15376_v0  ;;  %v14818_v5 = vpack.c.bf16 %v11783_v31, %v11776_v30 }
0x1590   : > { %14422 = vmatprep.mubr.msk.f32.mxu0 %vm15377_vm0, %v15378_v1  ;;  %v11771_v54 = vand.u32 4294901760, %v11770_v16 }
0x1592   : > { %14795 = vmatpush3.bf16.msra.mxu1 %v16603_v22  ;;  %v14797_v32 = vpack.c.bf16 %v11771_v54, %v11764_v28 }
0x1593   : > { %14796 = vmatprep.subr.bf16.mxu1 %v15376_v0 }
0x1644   : > { %v11418_v59 = vpop.f32.mrb[32].mxu1 }
0x1645   : > { %v14306_v61 = vpop.f32.mrb[33].mxu1 }
0x1646   : > { %v15236_v61 = vld [vmem:[%s16871_s10] ss:$0 sm:$0xff] }
0x164a   : > { %v11247_v62 = vpop.f32.mrb[34].mxu0 }
0x164b   : > { %v14284_v63 = vpop.f32.mrb[35].mxu0  ;;  %v11248_v4 = vadd.f32 %v15235_v25, %v11247_v62 }
0x164c   : > { %v11578_v2 = vpop.f32.mrb[34].mxu1  ;;  %v15237_v63 = vld [vmem:[%s16945_s16] ss:$0 sm:$0xff] }
0x164d   : > { %v14328_v3 = vpop.f32.mrb[35].mxu1 }
0x1652   : > { %v11338_v20 = vpop.f32.mrb[36].mxu0 }
0x1653   : > { %v11339_v6 = vadd.f32 %v11338_v20, %v11248_v4  ;;  %v14295_v7 = vpop.f32.mrb[37].mxu0 }
0x1655   : > { %v11419_v8 = vadd.f32 %v11418_v59, %v11339_v6 }
0x165a   : > { %v11495_v37 = vpop.f32.mrb[38].mxu0 }
0x165b   : > { %v11496_v9 = vadd.f32 %v11495_v37, %v11419_v8  ;;  %v14317_v10 = vpop.f32.mrb[39].mxu0  ;;  %v12192_v8 = vld [vmem:[%s16946_s15] sm:$0xff]  ;;  %v12193_v37 = vld [vmem:[%s16946_s15 + $0x8] sm:$0xff] }
0x165c   : > { %v12207_v10 = vand.u32 4294901760, %v12193_v37 }
0x165d   : > { %v11579_v12 = vadd.f32 %v11578_v2, %v11496_v9  ;;  %v12204_v9 = vand.u32 4294901760, %v12192_v8 }
0x165e   : > { %v16688_v11 = vsub.f32 %v12193_v37, %v12207_v10 }
0x165f   : > { %v16686_v60 = vsub.f32 %v12192_v8, %v12204_v9 }
0x1660   : > { %v12296_v23 = vand.u32 4294901760, %v16688_v11 }
0x1662   : > { %v11653_v45 = vpop.f32.mrb[40].mxu0  ;;  %v12297_v27 = vsub.f32 %v16688_v11, %v12296_v23 }
0x1663   : > { %v11654_v26 = vadd.f32 %v11653_v45, %v11579_v12  ;;  %v14339_v50 = vpop.f32.mrb[41].mxu0  ;;  %v16650_v12 = vpack.c.bf16 %v12207_v10, %v12204_v9  ;;  %v12194_v45 = vld [vmem:[%s16946_s15 + $0x10] sm:$0xff] }
0x1664   : > { %v12210_v50 = vand.u32 4294901760, %v12194_v45  ;;  %v12298_v28 = vand.u32 4294901760, %v12297_v27 }
0x1665   : > { %v11657_v29 = vadd.f32 %v11654_v26, %v11164_v52  ;;  %v14806_v52 = vpack.c.bf16 %v11782_v21, %v11775_v19  ;;  %v12195_v26 = vld [vmem:[%s16946_s15 + $0x18] sm:$0xff]  ;;  %14828 = vmatpush3.bf16.msra.mxu0 %v16650_v12  ;;  %v16701_v19 = vsub.f32 %v12198_v46, %v12222_v48  ;;  %v16703_v21 = vsub.f32 %v12199_v47, %v12225_v49 }
0x1666   : > { %14829 = vmatprep.subr.bf16.mxu0 %v15376_v0  ;;  %v16692_v15 = vsub.f32 %v12194_v45, %v12210_v50  ;;  %v15238_v45 = vld [vmem:[%s16947_s19] ss:$0 sm:$0xff] }
0x1667   : > { %v11658_v34 = vsel %vm1081_vm2, %v11657_v29, 0.0 }
0x1668   : > { %11659 = vadd.xlane.f32.xlu0 %v11658_v34  ;;  %v12303_v54 = vand.u32 4294901760, %v16692_v15 }
0x16f5   : > { %v11660_v40 = vpop.xlane.xlu0 %11659 }
0x16f6   : > { %v11661_v41 = vmul.f32 0.03125, %v11660_v40  ;;  %v12196_v40 = vld [vmem:[%s16946_s15 + $0x20] sm:$0xff] }
0x16f8   : > { %v11662_v42 = vsub.f32 %v11657_v29, %v11661_v41  ;;  %v12213_v29 = vand.u32 4294901760, %v12195_v26  ;;  %v12197_v41 = vld [vmem:[%s16946_s15 + $0x28] sm:$0xff] }
0x16fa   : > { %v11663_v43 = vmul.f32 %v11662_v42, %v11662_v42  ;;  %v16662_v34 = vpack.c.bf16 %v12213_v29, %v12210_v50 }
0x16fc   : > { %v11664_v44 = vsel %vm1081_vm2, %v11663_v43, 0.0  ;;  %14831 = vmatpush3.bf16.msra.mxu0 %v16662_v34  ;;  %v12219_v43 = vand.u32 4294901760, %v12197_v41 }
0x16fd   : > { %11665 = vadd.xlane.f32.xlu1 %v11664_v44  ;;  %14832 = vmatprep.subr.bf16.mxu0 %v15376_v0 }
0x16fe   : > { %v16698_v18 = vsub.f32 %v12197_v41, %v12219_v43 }
0x178a   : > { %v11666_v55 = vpop.xlane.xlu1 %11665 }
0x178b   : > { %v11667_v56 = vmul.f32 0.03125, %v11666_v55 }
0x178d   : > { %v11668_v57 = vadd.f32 1e-12, %v11667_v56  ;;  %v12331_v56 = vand.u32 4294901760, %v16701_v19 }
0x178f   : > { %15226 = vrsqrt.f32 %v11668_v57  ;;  %v12338_v57 = vand.u32 4294901760, %v16703_v21 }
0x1791   : > { %v16746_v9 = vpack.c.bf16 %v12338_v57, %v12331_v56 }
0x1799   : > { %v15227_v58 = vpop.eup %15226 }
0x179a   : > { %v11670_v59 = vmul.f32 %v15227_v58, %v11662_v42  ;;  %v12216_v42 = vand.u32 4294901760, %v12196_v40 }
0x179c   : > { %v11671_v62 = vmul.f32 %v15236_v61, %v11670_v59  ;;  %v16674_v44 = vpack.c.bf16 %v12219_v43, %v12216_v42  ;;  %v16696_v14 = vsub.f32 %v12196_v40, %v12216_v42  ;;  %v12332_v59 = vsub.f32 %v16701_v19, %v12331_v56 }
0x179d   : > { %v12339_v61 = vsub.f32 %v16703_v21, %v12338_v57 }
0x179e   : > { %v16614_v2 = vadd.f32 %v15237_v63, %v11671_v62  ;;  %14834 = vmatpush3.bf16.msra.mxu0 %v16674_v44  ;;  %v12317_v38 = vand.u32 4294901760, %v16696_v14  ;;  %v12333_v62 = vand.u32 4294901760, %v12332_v59 }
0x179f   : > { %14835 = vmatprep.subr.bf16.mxu0 %v15376_v0  ;;  %v12340_v63 = vand.u32 4294901760, %v12339_v61 }
0x17a0   : > { %v11678_v3 = vsel %vm1081_vm2, %v16614_v2, 0 }
0x17a1   : > { %v11749_v25 = vand.u32 4294901760, %v11678_v3 }
0x17a2   : > { %14837 = vmatpush3.bf16.msra.mxu0 %v16690_v13 }
0x17a3   : > { %v11750_v4 = vsub.f32 %v11678_v3, %v11749_v25  ;;  %14838 = vmatprep.subr.bf16.mxu0 %v15376_v0  ;;  %v16730_v3 = vpack.c.bf16 %v12340_v63, %v12333_v62 }
0x17a5   : > { %v11751_v20 = vand.u32 4294901760, %v11750_v4 }
0x17a7   : > { %v11752_v6 = vsub.f32 %v11750_v4, %v11751_v20 }
0x17a9   : > { %v11753_v7 = vand.u32 4294901760, %v11752_v6  ;;  %v14860_v6 = vpack.c.bf16 %v16703_v21, %v16701_v19 }
0x17ab   : > { %14349 = vmatmul.mubr.f32.vlgmr.msra.gmra.mrb[36].mxu1 %v11753_v7 }
0x17ac   : > { %14798 = vmatpush3.bf16.msra.mxu1 %v14797_v32  ;;  %14359 = vmatprep.mubr.msk.f32.mxu1 %vm15377_vm0, %v15378_v1  ;;  %v12304_v32 = vsub.f32 %v16692_v15, %v12303_v54 }
0x17ad   : > { %14799 = vmatprep.subr.bf16.mxu1 %v15376_v0 }
0x17ae   : > { %v12305_v35 = vand.u32 4294901760, %v12304_v32 }
0x17b0   : > { %14801 = vmatpush3.bf16.msra.mxu1 %v14800_v39  ;;  %v12324_v39 = vand.u32 4294901760, %v16698_v18 }
0x17b1   : > { %14802 = vmatprep.subr.bf16.mxu1 %v15376_v0 }
0x17b2   : > { %v16744_v37 = vpack.c.bf16 %v12324_v39, %v12317_v38 }
0x17b3   : > { %14360 = vmatmul.mubr.f32.vlgmr.msra.gmra.mrb[36].mxu1 %v11749_v25 }
0x17b4   : > { %14804 = vmatpush3.bf16.msra.mxu1 %v14803_v51  ;;  %14370 = vmatprep.mubr.msk.f32.mxu1 %vm15377_vm0, %v15378_v1 }
0x17b5   : > { %14805 = vmatprep.subr.bf16.mxu1 %v15376_v0 }
0x17b8   : > { %14807 = vmatpush3.bf16.msra.mxu1 %v14806_v52  ;;  %v12318_v52 = vsub.f32 %v16696_v14, %v12317_v38 }
0x17b9   : > { %14808 = vmatprep.subr.bf16.mxu1 %v15376_v0 }
0x17bb   : > { %14371 = vmatmul.mubr.f32.vlgmr.msra.gmra.mrb[36].mxu1 %v11750_v4 }
0x17bc   : > { %14810 = vmatpush3.bf16.msra.mxu1 %v16600_v17  ;;  %14381 = vmatprep.mubr.msk.f32.mxu1 %vm15377_vm0, %v15378_v1 }
0x17bd   : > { %14811 = vmatprep.subr.bf16.mxu1 %v15376_v0 }
0x17c0   : > { %14813 = vmatpush3.bf16.msra.mxu1 %v16603_v22 }
0x17c1   : > { %14814 = vmatprep.subr.bf16.mxu1 %v15376_v0 }
0x17c3   : > { %14382 = vmatmul.mubr.f32.vlgmr.msra.gmra.mrb[36].mxu1 %v11751_v20  ;;  %v14857_v20 = vpack.c.bf16 %v16698_v18, %v16696_v14 }
0x17c4   : > { %14816 = vmatpush3.bf16.msra.mxu1 %v14815_v53  ;;  %14392 = vmatprep.mubr.msk.f32.mxu1 %vm15377_vm0, %v15378_v1  ;;  %v12325_v53 = vsub.f32 %v16698_v18, %v12324_v39 }
0x17c5   : > { %14817 = vmatprep.subr.bf16.mxu1 %v15376_v0 }
0x17c6   : > { %v12326_v55 = vand.u32 4294901760, %v12325_v53 }
0x17c8   : > { %14819 = vmatpush3.bf16.msra.mxu1 %v14818_v5  ;;  %v12319_v5 = vand.u32 4294901760, %v12318_v52 }
0x17c9   : > { %14820 = vmatprep.subr.bf16.mxu1 %v15376_v0 }
0x17ca   : > { %v16726_v58 = vpack.c.bf16 %v12326_v55, %v12319_v5 }
0x17cb   : > { %14393 = vmatmul.mubr.f32.vlgmr.msra.gmra.mrb[36].mxu1 %v11749_v25 }
0x17cc   : > { %14822 = vmatpush3.bf16.msra.mxu1 %v16600_v17  ;;  %14403 = vmatprep.mubr.msk.f32.mxu1 %vm15377_vm0, %v15378_v1  ;;  %v16694_v17 = vsub.f32 %v12195_v26, %v12213_v29 }
0x17cd   : > { %14823 = vmatprep.subr.bf16.mxu1 %v15376_v0 }
0x17ce   : > { %v12310_v30 = vand.u32 4294901760, %v16694_v17  ;;  %v14854_v4 = vpack.c.bf16 %v16694_v17, %v16692_v15 }
0x17d0   : > { %14825 = vmatpush3.bf16.msra.mxu1 %v16603_v22  ;;  %v12289_v22 = vand.u32 4294901760, %v16686_v60  ;;  %v12311_v33 = vsub.f32 %v16694_v17, %v12310_v30  ;;  %v16742_v8 = vpack.c.bf16 %v12310_v30, %v12303_v54 }
0x17d1   : > { %14862 = vmatprep.subr.bf16.mxu1 %v15376_v0 }
0x17d2   : > { %v12290_v24 = vsub.f32 %v16686_v60, %v12289_v22  ;;  %v12312_v36 = vand.u32 4294901760, %v12311_v33  ;;  %v16740_v7 = vpack.c.bf16 %v12296_v23, %v12289_v22 }
0x17d3   : > { %14404 = vmatmul.mubr.f32.vlgmr.msra.gmra.mrb[36].mxu1 %v11749_v25  ;;  %v14851_v25 = vpack.c.bf16 %v16688_v11, %v16686_v60 }
0x17d4   : > { %14479 = vmatprep.mubr.msk.f32.mxu1 %vm15377_vm0, %v15378_v1  ;;  %14864 = vmatpush3.bf16.msra.mxu1 %v16650_v12  ;;  %v12291_v16 = vand.u32 4294901760, %v12290_v24  ;;  %v16720_v51 = vpack.c.bf16 %v12312_v36, %v12305_v35 }
0x17d5   : > { %14865 = vmatprep.subr.bf16.mxu1 %v15376_v0 }
0x17d6   : > { %v16714_v31 = vpack.c.bf16 %v12298_v28, %v12291_v16 }
0x17d8   : > { %14867 = vmatpush3.bf16.msra.mxu1 %v16662_v34 }
0x17d9   : > { %14868 = vmatprep.subr.bf16.mxu1 %v15376_v0 }
0x17dc   : > { %14870 = vmatpush3.bf16.msra.mxu1 %v16674_v44 }
0x17dd   : > { %14871 = vmatprep.subr.bf16.mxu1 %v15376_v0 }
0x17e0   : > { %14873 = vmatpush3.bf16.msra.mxu1 %v16690_v13 }
0x17e1   : > { %14886 = vmatprep.subr.bf16.mxu1 %v15376_v0 }
0x18a6   : > { %v12161_v10 = vpop.f32.mrb[36].mxu1 }
0x18a7   : > { %v14903_v26 = vadd.f32 %v15238_v45, %v12161_v10  ;;  %v14405_v50 = vpop.f32.mrb[37].mxu1 }
0x18a9   : > { %v12166_v29 = vmul.f32 0.70710677, %v14903_v26  ;;  %v12165_v39 = vmul.f32 0.5, %v14903_v26 }
0x18ab   : > { %v12167_v40 = vand.u32 2147483647, %v12166_v29  ;;  %vm12187_vm7 = vcmp.ge.f32.partialorder %v12166_v29, 0.0  ;;  %v15241_v29 = vld [vmem:[%s16950_s21] ss:$0 sm:$0xff] }
0x18ad   : > { %v12168_v41 = vmul.f32 0.3275911, %v12167_v40  ;;  %v12181_v43 = vsub.f32 0.0, %v12167_v40 }
0x18af   : > { %v12169_v42 = vadd.f32 1.0, %v12168_v41  ;;  %v12182_v47 = vmul.f32 %v12181_v43, %v12167_v40 }
0x18b1   : > { %15228 = vrcp.f32 %v12169_v42  ;;  %v12183_v22 = vmul.f32 1.442695, %v12182_v47 }
0x18b3   : > { %15230 = vpow2.f32 %v12183_v22 }
0x18bb   : > { %v15229_v46 = vpop.eup %15228 }
0x18bc   : > { %v12172_v48 = vmul.f32 1.0614054, %v15229_v46 }
0x18bd   : > { %v15231_v32 = vpop.eup %15230 }
0x18be   : > { %v12173_v49 = vadd.f32 -1.4531521, %v12172_v48 }
0x18c0   : > { %v12174_v23 = vmul.f32 %v15229_v46, %v12173_v49 }
0x18c2   : > { %v12175_v24 = vadd.f32 1.4214138, %v12174_v23 }
0x18c4   : > { %v12176_v27 = vmul.f32 %v15229_v46, %v12175_v24 }
0x18c6   : > { %v12177_v16 = vadd.f32 -0.28449672, %v12176_v27 }
0x18c8   : > { %v12178_v28 = vmul.f32 %v15229_v46, %v12177_v16 }
0x18ca   : > { %v12179_v54 = vadd.f32 0.2548296, %v12178_v28 }
0x18cc   : > { %v12180_v30 = vmul.f32 %v15229_v46, %v12179_v54 }
0x18ce   : > { %v12185_v33 = vmul.f32 %v15231_v32, %v12180_v30 }
0x18d0   : > { %v12186_v35 = vsub.f32 1.0, %v12185_v33 }
0x18d2   : > { %v12188_v36 = vsub.f32 0.0, %v12186_v35 }
0x18d4   : > { %v12189_v38 = vsel %vm12187_vm7, %v12186_v35, %v12188_v36 }
0x18d5   : > { %v12190_v52 = vadd.f32 1.0, %v12189_v38 }
0x18d7   : > { %v12191_v53 = vmul.f32 %v12190_v52, %v12165_v39 }
0x18d9   : > { %v12201_v5 = vsel %vm6402_vm6, %v12191_v53, 0 }
0x18da   : > { %v12276_v55 = vand.u32 4294901760, %v12201_v5 }
0x18dc   : > { %v12277_v56 = vsub.f32 %v12201_v5, %v12276_v55 }
0x18de   : > { %v12278_v57 = vand.u32 4294901760, %v12277_v56 }
0x18e0   : > { %14480 = vmatmul.mubr.f32.vlgmr.msra.gmra.mrb[38].mxu1 %v12278_v57  ;;  %v12279_v59 = vsub.f32 %v12277_v56, %v12278_v57 }
0x18e1   : > { %14888 = vmatpush3.bf16.msra.mxu1 %v16650_v12  ;;  %14517 = vmatprep.mubr.msk.f32.mxu1 %vm15377_vm0, %v15378_v1 }
0x18e2   : > { %14889 = vmatprep.subr.bf16.mxu1 %v15376_v0  ;;  %v12280_v61 = vand.u32 4294901760, %v12279_v59 }
0x18e4   : > { %14423 = vmatmul.mubr.f32.vlgmr.msra.gmra.mrb[42].mxu0 %v12280_v61 }
0x18e5   : > { %14840 = vmatpush3.bf16.msra.mxu0 %v16714_v31  ;;  %14891 = vmatpush3.bf16.msra.mxu1 %v16662_v34 }
0x18e6   : > { %14841 = vmatprep.subr.bf16.mxu0 %v15376_v0  ;;  %14892 = vmatprep.subr.bf16.mxu1 %v15376_v0 }
0x18e7   : > { %14441 = vmatprep.mubr.msk.f32.mxu0 %vm15377_vm0, %v15378_v1 }
0x18e9   : > { %14843 = vmatpush3.bf16.msra.mxu0 %v16720_v51  ;;  %14894 = vmatpush3.bf16.msra.mxu1 %v16674_v44 }
0x18ea   : > { %14844 = vmatprep.subr.bf16.mxu0 %v15376_v0  ;;  %14895 = vmatprep.subr.bf16.mxu1 %v15376_v0 }
0x18ed   : > { %14846 = vmatpush3.bf16.msra.mxu0 %v16726_v58  ;;  %14897 = vmatpush3.bf16.msra.mxu1 %v16690_v13 }
0x18ee   : > { %14847 = vmatprep.subr.bf16.mxu0 %v15376_v0 }
0x18f0   : > { %14518 = vmatmul.mubr.f32.vlgmr.msra.gmra.mrb[40].mxu1 %v12276_v55 }
0x18f1   : > { %14849 = vmatpush3.bf16.msra.mxu0 %v16730_v3 }
0x18f2   : > { %14850 = vmatprep.subr.bf16.mxu0 %v15376_v0 }
0x18f4   : > { %14442 = vmatmul.mubr.f32.vlgmr.msra.gmra.mrb[44].mxu0 %v12276_v55 }
0x18f5   : > { %14852 = vmatpush3.bf16.msra.mxu0 %v14851_v25  ;;  %14460 = vmatprep.mubr.msk.f32.mxu0 %vm15377_vm0, %v15378_v1 }
0x18f6   : > { %14853 = vmatprep.subr.bf16.mxu0 %v15376_v0 }
0x18f9   : > { %14855 = vmatpush3.bf16.msra.mxu0 %v14854_v4 }
0x18fa   : > { %14856 = vmatprep.subr.bf16.mxu0 %v15376_v0 }
0x18fd   : > { %14858 = vmatpush3.bf16.msra.mxu0 %v14857_v20 }
0x18fe   : > { %14859 = vmatprep.subr.bf16.mxu0 %v15376_v0 }
0x1901   : > { %14861 = vmatpush3.bf16.msra.mxu0 %v14860_v6 }
0x1902   : > { %14874 = vmatprep.subr.bf16.mxu0 %v15376_v0 }
0x1904   : > { %14461 = vmatmul.mubr.f32.vlgmr.msra.gmra.mrb[46].mxu0 %v12277_v56 }
0x1905   : > { %14876 = vmatpush3.bf16.msra.mxu0 %v16740_v7  ;;  %14498 = vmatprep.mubr.msk.f32.mxu0 %vm15377_vm0, %v15378_v1  ;;  %v15239_v1 = vld [vmem:[%s16948_s1] ss:$0 sm:$0xff] }
0x1906   : > { %14877 = vmatprep.subr.bf16.mxu0 %v15376_v0 }
0x1909   : > { %14879 = vmatpush3.bf16.msra.mxu0 %v16742_v8 }
0x190a   : > { %14880 = vmatprep.subr.bf16.mxu0 %v15376_v0 }
0x190d   : > { %14882 = vmatpush3.bf16.msra.mxu0 %v16744_v37 }
0x190e   : > { %14883 = vmatprep.subr.bf16.mxu0 %v15376_v0 }
0x1911   : > { %14885 = vmatpush3.bf16.msra.mxu0 %v16746_v9 }
0x1914   : > { %14499 = vmatmul.mubr.f32.vlgmr.msra.gmra.mrb[48].mxu0 %v12276_v55 }
0x19b3   : > { %v12562_v12 = vpop.f32.mrb[38].mxu1 }
0x19b4   : > { %v14481_v34 = vpop.f32.mrb[39].mxu1 }
0x19b7   : > { %v12282_v44 = vpop.f32.mrb[42].mxu0 }
0x19b8   : > { %v14424_v60 = vpop.f32.mrb[43].mxu0  ;;  %v12283_v15 = vadd.f32 %v15239_v1, %v12282_v44 }
0x19c3   : > { %v12736_v11 = vpop.f32.mrb[40].mxu1 }
0x19c4   : > { %v14519_v13 = vpop.f32.mrb[41].mxu1 }
0x19c7   : > { %v12393_v17 = vpop.f32.mrb[44].mxu0 }
0x19c8   : > { %v12394_v14 = vadd.f32 %v12393_v17, %v12283_v15  ;;  %v14443_v18 = vpop.f32.mrb[45].mxu0 }
0x19d7   : > { %v12481_v19 = vpop.f32.mrb[46].mxu0 }
0x19d8   : > { %v12482_v21 = vadd.f32 %v12481_v19, %v12394_v14  ;;  %v14462_v0 = vpop.f32.mrb[47].mxu0 }
0x19da   : > { %v12563_v31 = vadd.f32 %v12562_v12, %v12482_v21 }
0x19e7   : > { %v12657_v51 = vpop.f32.mrb[48].mxu0 }
0x19e8   : > { %v12658_v58 = vadd.f32 %v12657_v51, %v12563_v31  ;;  %v14500_v62 = vpop.f32.mrb[49].mxu0 }
0x19ea   : > { %v12737_v63 = vadd.f32 %v12736_v11, %v12658_v58 }
0x19ec   : > { %v12740_v3 = vadd.f32 %v12737_v63, %v16614_v2  ;;  %v15240_v2 = vld [vmem:[%s16949_s25] ss:$0 sm:$0xff] }
0x19ee   : > { %v12741_v25 = vsel %vm1081_vm2, %v12740_v3, 0.0 }
0x19ef   : > { %12742 = vadd.xlane.f32.xlu0 %v12741_v25 }
0x1a7c   : > { %v12743_v4 = vpop.xlane.xlu0 %12742 }
0x1a7d   : > { %v12744_v20 = vmul.f32 0.03125, %v12743_v4 }
0x1a7f   : > { %v12745_v6 = vsub.f32 %v12740_v3, %v12744_v20 }
0x1a81   : > { %v12746_v7 = vmul.f32 %v12745_v6, %v12745_v6 }
0x1a83   : > { %v12747_v8 = vsel %vm1081_vm2, %v12746_v7, 0.0 }
0x1a84   : > { %12748 = vadd.xlane.f32.xlu0 %v12747_v8 }
0x1b11   : > { %v12749_v37 = vpop.xlane.xlu0 %12748 }
0x1b12   : > { %v12750_v9 = vmul.f32 0.03125, %v12749_v37 }
0x1b14   : > { %v12751_v10 = vadd.f32 1e-12, %v12750_v9 }
0x1b16   : > { %15232 = vrsqrt.f32 %v12751_v10 }
0x1b20   : > { %v15233_v45 = vpop.eup %15232 }
0x1b21   : > { %v12753_v26 = vmul.f32 %v15233_v45, %v12745_v6 }
0x1b23   : > { %v12754_v50 = vmul.f32 %v15240_v2, %v12753_v26 }
0x1b25   : > { %v12755_v40 = vadd.f32 %v15241_v29, %v12754_v50 }
0x1b27   : > { %12756 = vst.msk [vmem:[%s605_s24] sm:$0xff] %vm1081_vm2, %v12755_v40 }
0x1b28   : > { %15313 = shalt.err (!%p15310_p7)
}
0x1b29   : > { %s15314_s4 = scalar_lea.hbm %s16816_s6, 128  ;;  %s15318_s3 = scalar_lea.hbm %s16959_s5, 256 }
0x1b2a   : > { %p15315_p9 = scmp.ne.s32.totalorder %s16816_s6, %s15314_s4  ;;  %p15319_p0 = scmp.lt.u32.totalorder %s16816_s6, %s16959_s5 }
0x1b2b   : > { %p15320_p11 = scmp.lt.u32.totalorder %s15318_s3, %s15314_s4  ;;  %p15322_p4 = scmp.lt.u32.totalorder %s15314_s4, %s16816_s6 }
0x1b2c   : > { %p15316_p2 = pnand %p15315_p9, %p15574_p12 }
0x1b2d   : > { %p15321_p1 = por %p15320_p11, %p15319_p0 }
0x1b2e   : > { %p15317_p5 = pneg %p15316_p2 }
0x1b2f   : > { %p15323_p6 = por %p15322_p4, %p15321_p1 }
0x1b31   : > { %p15324_p8 = pnand %p15323_p6, %p15317_p5 }
0x1b33   : > { %15327 = shalt.err (!%p15324_p8)
}
0x1b34   : > { %15118 = dma.vmem_to_hbm [thread:$0]  (%p15574_p12), %s16818_s23, 128, %s16816_s6, %s12758_s0  }
0x1b35 PF: > { %s16960_s2 = sld [smem:[#allocation11_spill]]  ;;  %s16961_s22 = sld [smem:[#allocation12_spill]] }
0x1b36   : > { %p16963_p13 = scmp.ge.s32.totalorder %s15370_s30, 2 }
0x1b3b   : > { %s12783_s14 = sand.u32 1, %s16960_s2   ;;  %p16962_p10 = scmp.ne.s32.totalorder %s16961_s22, 0 }
0x1b3c   : > { %s12784_s17 = scalar_lea.sflag [#allocation4], %s12783_s14 }
0x1b3d   : > { %p15129_p3 = pnand %p16963_p13, %p16962_p10 }
0x1b3f   : > { %15353 = dma.done.wait (!%p15129_p3), %s12784_s17, 128  }
0x1b40   : > { %15355 = vsyncadd (!%p15129_p3), %s12784_s17, 4294967168  ;;  %s16964_s30 = sld [smem:[#allocation13_spill]]  ;;  %s16965_s4 = smov %s15570_s27 }
0x1b41   : > { %s16966_s27 = smov %s15362_s28  ;;  %s16967_s28 = smov %s15366_s29 }
0x1b42   : > { %s16968_s29 = smov %s16965_s4 }
0x1b46   : > { %p32_p7 = scmp.ge.s32.totalorder %s16964_s30, 4  }
0x1b48   :  { %34 = sbr.rel (!%p32_p7) target bundleno = 21 (0x15), region = 141 }
0x1b4f   :  { %12789 = vsyncpa [#allocation3], 1 }
0x1b50   :  { %12791 = vsyncpa [#allocation3 + $0x1], 1 }
0x1b51   :  { %12792 = vsyncpa [#allocation6], 1 }
0x1b52   :  { %12793 = vsyncpa [#allocation4], 1 }
0x1b53   :  { %12795 = vsyncpa [#allocation4 + $0x1], 1 }

</bundles_post_ra>
